<compile_context>
chip_gen: v5e
topology: v5e:2x2
jax: 0.10.0
libtpu: 0.0.40
codegen_flags: <defaults>
</compile_context>

<pallas_src>
import jax
import jax.numpy as jnp
from jax.experimental import pallas as pl
from jax.experimental.pallas import tpu as pltpu

EPS = 1e-5
CMID = 64  # ConvBlock output channels (fixed by the module)


def _pick_tile_rows(m, max_rows=1024):
    """Largest row tile <= max_rows dividing m that leaves >= 2 blocks (v7x 2-TC)."""
    for tm in (max_rows, 512, 256, 128, 64, 32, 16, 8):
        if tm <= m and m % tm == 0 and m // tm >= 2:
            return tm
    return m


# ---------------------------------------------------------------------------
# Kernel 1: fused BN(in_ch) + ReLU + 1x1 conv (+bias), plus per-tile partial
#           BN2 statistics (sum, sum of squares) so y1 is never re-read.
# ---------------------------------------------------------------------------
def _bn_relu_conv1x1_kernel(x_ref, scale_ref, shift_ref, w_ref, b_ref,
                            y_ref, stats_ref):
    # x: (TM, Cin) f32 | scale/shift: (1, Cin) f32 | w: (Cin, 64) bf16 | b: (1, 64) f32
    x = x_ref[...]
    xr = jnp.maximum(x * scale_ref[...] + shift_ref[...], 0.0)      # BN + ReLU (f32 VPU)
    y = jnp.dot(xr.astype(jnp.bfloat16), w_ref[...],
                preferred_element_type=jnp.float32) + b_ref[...]    # (TM, 64) f32
    y_ref[...] = y.astype(y_ref.dtype)                              # bf16 activation store

    # partial BN2 statistics in f32 (rides on spare VPU/XLU slots under the matmul)
    cm = y.shape[-1]
    s = jnp.sum(y, axis=0, keepdims=True)
    ss = jnp.sum(y * y, axis=0, keepdims=True)
    stats_ref[pl.ds(0, 1), pl.ds(0, 1), :] = s.reshape(1, 1, cm)
    stats_ref[pl.ds(0, 1), pl.ds(1, 1), :] = ss.reshape(1, 1, cm)


def bn_relu_conv1x1(x_flat, scale1, shift1, w1, b1, *, tm):
    m, cin = x_flat.shape
    cmid = w1.shape[1]
    t = m // tm
    return pl.pallas_call(
        _bn_relu_conv1x1_kernel,
        out_shape=(jax.ShapeDtypeStruct((m, cmid), jnp.bfloat16),
                   jax.ShapeDtypeStruct((t, 2, cmid), jnp.float32)),
        grid_spec=pltpu.PrefetchScalarGridSpec(
            num_scalar_prefetch=0,
            grid=(t,),
            in_specs=[
                pl.BlockSpec((tm, cin), lambda i: (i, 0)),
                pl.BlockSpec((1, cin), lambda i: (0, 0)),
                pl.BlockSpec((1, cin), lambda i: (0, 0)),
                pl.BlockSpec((cin, cmid), lambda i: (0, 0)),
                pl.BlockSpec((1, cmid), lambda i: (0, 0)),
            ],
            out_specs=(pl.BlockSpec((tm, cmid), lambda i: (i, 0)),
                       pl.BlockSpec((1, 2, cmid), lambda i: (i, 0, 0))),
        ),
        compiler_params=pltpu.CompilerParams(dimension_semantics=("parallel",)),
    )(x_flat, scale1, shift1, w1, b1)


# ---------------------------------------------------------------------------
# Kernel 2: fused BN2 affine + 3x3 conv (padding=1) + bias.
#   One grid step per sample: read y1 once, pad in VMEM, accumulate 9 taps.
# ---------------------------------------------------------------------------
def _bn_conv3x3_kernel(y_ref, s2_ref, t2_ref, w_ref, b_ref, o_ref, zp_ref):
    # y: (1, H, W, 64) bf16 | s2/t2: (1, 64) f32 | w: (9, 64, Cout) bf16
    # b: (1, Cout) f32 | o: (1, H, W, Cout) f32 | zp scratch: (H+2, W+2, 64) f32
    _, h, w, c = y_ref.shape
    cout = o_ref.shape[-1]

    # Fused BN2 affine (f32 VPU), then stage a zero-padded tile in VMEM scratch.
    # Halo stays exactly 0 == PyTorch's zero padding of the BN2 output.
    s2 = s2_ref[...].reshape(1, 1, c)
    t2 = t2_ref[...].reshape(1, 1, c)
    z = y_ref[0].astype(jnp.float32) * s2 + t2                      # (H, W, 64)
    zp_ref[...] = jnp.zeros_like(zp_ref)                            # re-zero every step
    zp_ref[pl.ds(1, h), pl.ds(1, w), :] = z

    # 9 taps = 9 accumulated MXU matmuls (K=64, bf16 operands, f32 accum) in a
    # single grid step -- no im2col duplication, no tap grid axis.
    acc = jnp.broadcast_to(b_ref[...], (h * w, cout)).astype(jnp.float32)
    for k in range(9):                       # static unrolled loop, static slices
        dy, dx = k // 3, k % 3
        tap = zp_ref[pl.ds(dy, h), pl.ds(dx, w), :].reshape(h * w, c)
        acc = acc + jnp.dot(tap.astype(jnp.bfloat16), w_ref[k],
                            preferred_element_type=jnp.float32)
    o_ref[...] = acc.reshape(1, h, w, cout).astype(o_ref.dtype)


def bn_conv3x3(y_nhwc, scale2, shift2, w_taps, b2):
    n, h, w, c = y_nhwc.shape
    cout = w_taps.shape[-1]

    # VMEM budget per grid step (double-buffered I/O); keep well under the 32 MiB
    # scoped default that also holds on v7x (64 MiB physical).
    vmem_bytes = (2 * h * w * c * 2                 # y block, bf16, x2 buffers
                  + (h + 2) * (w + 2) * c * 4       # padded f32 scratch
                  + 2 * h * w * cout * 4            # output block, f32, x2 buffers
                  + 2 * 9 * c * cout * 2)           # weight stack
    assert vmem_bytes < 24 * (1 << 20), "per-sample tile too large for VMEM"
    # TODO(synk): for large H*W, switch to row tiles with a manual halo DMA
    # (memory_space=pl.ANY + pltpu.make_async_copy) instead of whole-image blocks.

    return pl.pallas_call(
        _bn_conv3x3_kernel,
        out_shape=jax.ShapeDtypeStruct((n, h, w, cout), jnp.float32),
        grid_spec=pltpu.PrefetchScalarGridSpec(
            num_scalar_prefetch=0,
            grid=(n,),
            in_specs=[
                pl.BlockSpec((1, h, w, c), lambda i: (i, 0, 0, 0)),
                pl.BlockSpec((1, c), lambda i: (0, 0)),
                pl.BlockSpec((1, c), lambda i: (0, 0)),
                pl.BlockSpec((9, c, cout), lambda i: (0, 0, 0)),
                pl.BlockSpec((1, cout), lambda i: (0, 0)),
            ],
            out_specs=pl.BlockSpec((1, h, w, cout), lambda i: (i, 0, 0, 0)),
            scratch_shapes=[pltpu.VMEM((h + 2, w + 2, c), jnp.float32)],
        ),
        compiler_params=pltpu.CompilerParams(dimension_semantics=("parallel",)),
    )(y_nhwc, scale2, shift2, w_taps, b2)


# ---------------------------------------------------------------------------
# DenseLayer / DenseBlcok forward and parameter init
# ---------------------------------------------------------------------------
def _dense_layer_forward(p, x_nhwc):
    n, h, w, cin = x_nhwc.shape
    m = n * h * w
    cout = p["conv2_b"].shape[0]

    # BatchNorm2d(in_ch): training-mode batch stats in f32 (x has few channels).
    mean1 = jnp.mean(x_nhwc, axis=(0, 1, 2))
    var1 = jnp.var(x_nhwc, axis=(0, 1, 2))
    scale1 = p["bn1_gamma"] * jax.lax.rsqrt(var1 + EPS)
    shift1 = p["bn1_beta"] - mean1 * scale1

    tm = _pick_tile_rows(m)
    w1 = jnp.transpose(p["conv1_w"].reshape(CMID, cin)).astype(jnp.bfloat16)
    y1, stats = bn_relu_conv1x1(
        x_nhwc.reshape(m, cin), scale1[None, :], shift1[None, :],
        w1, p["conv1_b"][None, :], tm=tm)

    # Finish BN2 batch stats from per-tile partial sums (tiny (T, 2, 64) array).
    sums = jnp.sum(stats, axis=0)
    mean2 = sums[0] / m
    var2 = jnp.maximum(sums[1] / m - mean2 * mean2, 0.0)   # biased variance
    scale2 = p["bn2_gamma"] * jax.lax.rsqrt(var2 + EPS)
    shift2 = p["bn2_beta"] - mean2 * scale2

    w2 = jnp.transpose(p["conv2_w"], (2, 3, 1, 0)).reshape(9, CMID, cout)
    out = bn_conv3x3(y1.reshape(n, h, w, CMID), scale2[None, :], shift2[None, :],
                     w2.astype(jnp.bfloat16), p["conv2_b"][None, :])
    return out                                              # (N, H, W, growth) f32


def dense_block_forward(params, x_nchw):
    x = jnp.transpose(x_nchw, (0, 2, 3, 1)).astype(jnp.float32)   # NCHW -> NHWC
    for p in params["layers"]:
        out = _dense_layer_forward(p, x)
        x = jnp.concatenate([x, out], axis=-1)                    # dense connectivity
    return jnp.transpose(x, (0, 3, 1, 2))                         # NHWC -> NCHW


def init_params(key, in_channels, growth_rate, n_layers):
    layers = []
    for i in range(n_layers):
        key, k1, k2, k3, k4 = jax.random.split(key, 5)
        cin = in_channels + i * growth_rate
        layers.append(dict(
            bn1_gamma=jnp.ones((cin,), jnp.float32),
            bn1_beta=jnp.zeros((cin,), jnp.float32),
            conv1_w=0.1 * jax.random.normal(k1, (CMID, cin, 1, 1), jnp.float32),
            conv1_b=0.1 * jax.random.normal(k2, (CMID,), jnp.float32),
            bn2_gamma=jnp.ones((CMID,), jnp.float32),
            bn2_beta=jnp.zeros((CMID,), jnp.float32),
            conv2_w=0.05 * jax.random.normal(k3, (growth_rate, CMID, 3, 3), jnp.float32),
            conv2_b=0.05 * jax.random.normal(k4, (growth_rate,), jnp.float32),
        ))
    return dict(layers=layers)


if __name__ == "__main__":
    key = jax.random.PRNGKey(0)
    kx, kp = jax.random.split(key)

    N, Cin, H, W = 2, 4, 16, 16
    growth_rate, n_layers = 8, 3
    x = jax.random.normal(kx, (N, Cin, H, W), jnp.float32)
    params = init_params(kp, Cin, growth_rate, n_layers)

    fwd = jax.jit(dense_block_forward)
    out = fwd(params, x)
    jax.block_until_ready(out)
    assert out.shape == (N, Cin + growth_rate * n_layers, H, W), out.shape
    assert bool(jnp.all(jnp.isfinite(out)))
    print("KERNEL_OK")
</pallas_src>

<mosaic_0001>
module attributes {stable_mosaic.version = 11 : i64} {
  func.func @_bn_relu_conv1x1_kernel(%arg0: i32, %arg1: memref<256x4xf32, #tpu.memory_space<vmem>>, %arg2: memref<1x4xf32, #tpu.memory_space<vmem>>, %arg3: memref<1x4xf32, #tpu.memory_space<vmem>>, %arg4: memref<4x64xbf16, #tpu.memory_space<vmem>>, %arg5: memref<1x64xf32, #tpu.memory_space<vmem>>, %arg6: memref<256x64xbf16, #tpu.memory_space<vmem>>, %arg7: memref<1x2x64xf32, #tpu.memory_space<vmem>>) attributes {dimension_semantics = [#tpu.dimension_semantics<parallel>], iteration_bounds = array<i64: 2>, scalar_prefetch = 0 : i64, scratch_operands = 0 : i64, tpu.core_type = #tpu.core_type<tc>, window_params = [{transform_indices = @transform_0, window_bounds = array<i64: 256, 4>}, {pipeline_mode = #tpu.pipeline_mode<synchronous>, transform_indices = @transform_1, window_bounds = array<i64: 1, 4>}, {pipeline_mode = #tpu.pipeline_mode<synchronous>, transform_indices = @transform_2, window_bounds = array<i64: 1, 4>}, {pipeline_mode = #tpu.pipeline_mode<synchronous>, transform_indices = @transform_3, window_bounds = array<i64: 4, 64>}, {pipeline_mode = #tpu.pipeline_mode<synchronous>, transform_indices = @transform_4, window_bounds = array<i64: 1, 64>}, {transform_indices = @transform_5, window_bounds = array<i64: 256, 64>}, {transform_indices = @transform_6, window_bounds = array<i64: 1, 2, 64>}]} {
    %c0 = arith.constant 0 : index
    %c0_0 = arith.constant 0 : index
    %0 = vector.load %arg1[%c0, %c0_0] : memref<256x4xf32, #tpu.memory_space<vmem>>, vector<256x4xf32>
    %c0_1 = arith.constant 0 : index
    %c0_2 = arith.constant 0 : index
    %1 = vector.load %arg2[%c0_1, %c0_2] : memref<1x4xf32, #tpu.memory_space<vmem>>, vector<1x4xf32>
    %2 = vector.broadcast %1 : vector<1x4xf32> to vector<256x4xf32>
    %3 = arith.mulf %0, %2 : vector<256x4xf32>
    %c0_3 = arith.constant 0 : index
    %c0_4 = arith.constant 0 : index
    %4 = vector.load %arg3[%c0_3, %c0_4] : memref<1x4xf32, #tpu.memory_space<vmem>>, vector<1x4xf32>
    %5 = vector.broadcast %4 : vector<1x4xf32> to vector<256x4xf32>
    %6 = arith.addf %3, %5 : vector<256x4xf32>
    %cst = arith.constant 0.000000e+00 : f32
    %7 = vector.broadcast %cst : f32 to vector<256x4xf32>
    %8 = arith.maximumf %6, %7 : vector<256x4xf32>
    %9 = arith.truncf %8 : vector<256x4xf32> to vector<256x4xbf16>
    %c0_5 = arith.constant 0 : index
    %c0_6 = arith.constant 0 : index
    %10 = vector.load %arg4[%c0_5, %c0_6] : memref<4x64xbf16, #tpu.memory_space<vmem>>, vector<4x64xbf16>
    %cst_7 = arith.constant dense<0.000000e+00> : vector<256x64xf32>
    %11 = tpu.matmul %9, %10, %cst_7 {dimension_numbers = #tpu.dot_dimension_numbers<[1], [0], [0], [1], [0, 0, 1, 1], [], []>} : vector<256x4xbf16>, vector<4x64xbf16>, vector<256x64xf32> -> vector<256x64xf32>
    %c0_8 = arith.constant 0 : index
    %c0_9 = arith.constant 0 : index
    %12 = vector.load %arg5[%c0_8, %c0_9] : memref<1x64xf32, #tpu.memory_space<vmem>>, vector<1x64xf32>
    %13 = vector.broadcast %12 : vector<1x64xf32> to vector<256x64xf32>
    %14 = arith.addf %11, %13 : vector<256x64xf32>
    %15 = arith.truncf %14 : vector<256x64xf32> to vector<256x64xbf16>
    %c0_10 = arith.constant 0 : index
    %c0_11 = arith.constant 0 : index
    %16 = vector.load %arg6[%c0_10, %c0_11] : memref<256x64xbf16, #tpu.memory_space<vmem>>, vector<256x64xbf16>
    tpu.vector_store %arg6[%c0_10, %c0_11], %15 {strides = array<i32>} : memref<256x64xbf16, #tpu.memory_space<vmem>>, vector<256x64xbf16>,
    %cst_12 = arith.constant dense<0.000000e+00> : vector<64xf32>
    %17 = vector.multi_reduction <add>, %14, %cst_12 [0] : vector<256x64xf32> to vector<64xf32>
    %18 = vector.shape_cast %17 : vector<64xf32> to vector<1x64xf32>
    %19 = arith.mulf %14, %14 : vector<256x64xf32>
    %cst_13 = arith.constant dense<0.000000e+00> : vector<64xf32>
    %20 = vector.multi_reduction <add>, %19, %cst_13 [0] : vector<256x64xf32> to vector<64xf32>
    %21 = vector.shape_cast %20 : vector<64xf32> to vector<1x64xf32>
    %22 = vector.shape_cast %18 : vector<1x64xf32> to vector<1x1x64xf32>
    %c0_14 = arith.constant 0 : index
    %c0_15 = arith.constant 0 : index
    %c0_16 = arith.constant 0 : index
    %23 = vector.load %arg7[%c0_14, %c0_15, %c0_16] : memref<1x2x64xf32, #tpu.memory_space<vmem>>, vector<1x1x64xf32>
    tpu.vector_store %arg7[%c0_14, %c0_15, %c0_16], %22 {strides = array<i32>} : memref<1x2x64xf32, #tpu.memory_space<vmem>>, vector<1x1x64xf32>,
    %24 = vector.shape_cast %21 : vector<1x64xf32> to vector<1x1x64xf32>
    %c0_17 = arith.constant 0 : index
    %c1 = arith.constant 1 : index
    %c0_18 = arith.constant 0 : index
    %25 = vector.load %arg7[%c0_17, %c1, %c0_18] : memref<1x2x64xf32, #tpu.memory_space<vmem>>, vector<1x1x64xf32>
    tpu.vector_store %arg7[%c0_17, %c1, %c0_18], %24 {strides = array<i32>} : memref<1x2x64xf32, #tpu.memory_space<vmem>>, vector<1x1x64xf32>,
    return
  }
  func.func @transform_0(%arg0: i32) -> (i32, i32) {
    %c0_i32 = arith.constant 0 : i32
    %c0_i32_0 = arith.constant 0 : i32
    return %arg0, %c0_i32 : i32, i32
  }
  func.func @transform_1(%arg0: i32) -> (i32, i32) {
    %c0_i32 = arith.constant 0 : i32
    %c0_i32_0 = arith.constant 0 : i32
    %c0_i32_1 = arith.constant 0 : i32
    return %c0_i32, %c0_i32_0 : i32, i32
  }
  func.func @transform_2(%arg0: i32) -> (i32, i32) {
    %c0_i32 = arith.constant 0 : i32
    %c0_i32_0 = arith.constant 0 : i32
    %c0_i32_1 = arith.constant 0 : i32
    return %c0_i32, %c0_i32_0 : i32, i32
  }
  func.func @transform_3(%arg0: i32) -> (i32, i32) {
    %c0_i32 = arith.constant 0 : i32
    %c0_i32_0 = arith.constant 0 : i32
    %c0_i32_1 = arith.constant 0 : i32
    return %c0_i32, %c0_i32_0 : i32, i32
  }
  func.func @transform_4(%arg0: i32) -> (i32, i32) {
    %c0_i32 = arith.constant 0 : i32
    %c0_i32_0 = arith.constant 0 : i32
    %c0_i32_1 = arith.constant 0 : i32
    return %c0_i32, %c0_i32_0 : i32, i32
  }
  func.func @transform_5(%arg0: i32) -> (i32, i32) {
    %c0_i32 = arith.constant 0 : i32
    %c0_i32_0 = arith.constant 0 : i32
    return %arg0, %c0_i32 : i32, i32
  }
  func.func @transform_6(%arg0: i32) -> (i32, i32, i32) {
    %c0_i32 = arith.constant 0 : i32
    %c0_i32_0 = arith.constant 0 : i32
    %c0_i32_1 = arith.constant 0 : i32
    return %arg0, %c0_i32, %c0_i32_0 : i32, i32, i32
  }
}

module attributes {stable_mosaic.version = 11 : i64} {
  func.func @_bn_conv3x3_kernel(%arg0: i32, %arg1: memref<1x16x16x64xbf16, #tpu.memory_space<vmem>>, %arg2: memref<1x64xf32, #tpu.memory_space<vmem>>, %arg3: memref<1x64xf32, #tpu.memory_space<vmem>>, %arg4: memref<9x64x8xbf16, #tpu.memory_space<vmem>>, %arg5: memref<1x8xf32, #tpu.memory_space<vmem>>, %arg6: memref<1x16x16x8xf32, #tpu.memory_space<vmem>>, %arg7: memref<18x18x64xf32, #tpu.memory_space<vmem>>) attributes {dimension_semantics = [#tpu.dimension_semantics<parallel>], iteration_bounds = array<i64: 2>, scalar_prefetch = 0 : i64, scratch_operands = 1 : i64, tpu.core_type = #tpu.core_type<tc>, window_params = [{transform_indices = @transform_0, window_bounds = array<i64: 1, 16, 16, 64>}, {pipeline_mode = #tpu.pipeline_mode<synchronous>, transform_indices = @transform_1, window_bounds = array<i64: 1, 64>}, {pipeline_mode = #tpu.pipeline_mode<synchronous>, transform_indices = @transform_2, window_bounds = array<i64: 1, 64>}, {pipeline_mode = #tpu.pipeline_mode<synchronous>, transform_indices = @transform_3, window_bounds = array<i64: 9, 64, 8>}, {pipeline_mode = #tpu.pipeline_mode<synchronous>, transform_indices = @transform_4, window_bounds = array<i64: 1, 8>}, {transform_indices = @transform_5, window_bounds = array<i64: 1, 16, 16, 8>}]} {
    %c0 = arith.constant 0 : index
    %c0_0 = arith.constant 0 : index
    %0 = vector.load %arg2[%c0, %c0_0] : memref<1x64xf32, #tpu.memory_space<vmem>>, vector<1x64xf32>
    %1 = vector.shape_cast %0 : vector<1x64xf32> to vector<1x1x64xf32>
    %c0_1 = arith.constant 0 : index
    %c0_2 = arith.constant 0 : index
    %2 = vector.load %arg3[%c0_1, %c0_2] : memref<1x64xf32, #tpu.memory_space<vmem>>, vector<1x64xf32>
    %3 = vector.shape_cast %2 : vector<1x64xf32> to vector<1x1x64xf32>
    %c0_3 = arith.constant 0 : index
    %c0_4 = arith.constant 0 : index
    %c0_5 = arith.constant 0 : index
    %c0_6 = arith.constant 0 : index
    %4 = vector.load %arg1[%c0_3, %c0_4, %c0_5, %c0_6] : memref<1x16x16x64xbf16, #tpu.memory_space<vmem>>, vector<1x16x16x64xbf16>
    %5 = vector.shape_cast %4 : vector<1x16x16x64xbf16> to vector<16x16x64xbf16>
    %6 = arith.extf %5 : vector<16x16x64xbf16> to vector<16x16x64xf32>
    %7 = vector.broadcast %1 : vector<1x1x64xf32> to vector<16x16x64xf32>
    %8 = arith.mulf %6, %7 : vector<16x16x64xf32>
    %9 = vector.broadcast %3 : vector<1x1x64xf32> to vector<16x16x64xf32>
    %10 = arith.addf %8, %9 : vector<16x16x64xf32>
    %cst = arith.constant 0.000000e+00 : f32
    %11 = vector.broadcast %cst : f32 to vector<18x18x64xf32>
    %c0_7 = arith.constant 0 : index
    %c0_8 = arith.constant 0 : index
    %c0_9 = arith.constant 0 : index
    %12 = vector.load %arg7[%c0_7, %c0_8, %c0_9] : memref<18x18x64xf32, #tpu.memory_space<vmem>>, vector<18x18x64xf32>
    tpu.vector_store %arg7[%c0_7, %c0_8, %c0_9], %11 {strides = array<i32>} : memref<18x18x64xf32, #tpu.memory_space<vmem>>, vector<18x18x64xf32>,
    %c1 = arith.constant 1 : index
    %c1_10 = arith.constant 1 : index
    %c0_11 = arith.constant 0 : index
    %13 = vector.load %arg7[%c1, %c1_10, %c0_11] : memref<18x18x64xf32, #tpu.memory_space<vmem>>, vector<16x16x64xf32>
    tpu.vector_store %arg7[%c1, %c1_10, %c0_11], %10 {strides = array<i32>} : memref<18x18x64xf32, #tpu.memory_space<vmem>>, vector<16x16x64xf32>,
    %c0_12 = arith.constant 0 : index
    %c0_13 = arith.constant 0 : index
    %14 = vector.load %arg5[%c0_12, %c0_13] : memref<1x8xf32, #tpu.memory_space<vmem>>, vector<1x8xf32>
    %15 = vector.shape_cast %14 : vector<1x8xf32> to vector<1x8xf32>
    %16 = vector.broadcast %15 : vector<1x8xf32> to vector<256x8xf32>
    %c0_14 = arith.constant 0 : index
    %c0_15 = arith.constant 0 : index
    %c0_16 = arith.constant 0 : index
    %17 = vector.load %arg7[%c0_14, %c0_15, %c0_16] : memref<18x18x64xf32, #tpu.memory_space<vmem>>, vector<16x16x64xf32>
    %18 = vector.shape_cast %17 : vector<16x16x64xf32> to vector<256x64xf32>
    %19 = arith.truncf %18 : vector<256x64xf32> to vector<256x64xbf16>
    %c0_17 = arith.constant 0 : index
    %c0_18 = arith.constant 0 : index
    %c0_19 = arith.constant 0 : index
    %20 = vector.load %arg4[%c0_17, %c0_18, %c0_19] : memref<9x64x8xbf16, #tpu.memory_space<vmem>>, vector<1x64x8xbf16>
    %21 = vector.shape_cast %20 : vector<1x64x8xbf16> to vector<64x8xbf16>
    %cst_20 = arith.constant dense<0.000000e+00> : vector<256x8xf32>
    %22 = tpu.matmul %19, %21, %cst_20 {dimension_numbers = #tpu.dot_dimension_numbers<[1], [0], [0], [1], [0, 0, 1, 1], [], []>} : vector<256x64xbf16>, vector<64x8xbf16>, vector<256x8xf32> -> vector<256x8xf32>
    %23 = arith.addf %16, %22 : vector<256x8xf32>
    %c0_21 = arith.constant 0 : index
    %c1_22 = arith.constant 1 : index
    %c0_23 = arith.constant 0 : index
    %24 = vector.load %arg7[%c0_21, %c1_22, %c0_23] : memref<18x18x64xf32, #tpu.memory_space<vmem>>, vector<16x16x64xf32>
    %25 = vector.shape_cast %24 : vector<16x16x64xf32> to vector<256x64xf32>
    %26 = arith.truncf %25 : vector<256x64xf32> to vector<256x64xbf16>
    %c1_24 = arith.constant 1 : index
    %c0_25 = arith.constant 0 : index
    %c0_26 = arith.constant 0 : index
    %27 = vector.load %arg4[%c1_24, %c0_25, %c0_26] : memref<9x64x8xbf16, #tpu.memory_space<vmem>>, vector<1x64x8xbf16>
    %28 = vector.shape_cast %27 : vector<1x64x8xbf16> to vector<64x8xbf16>
    %cst_27 = arith.constant dense<0.000000e+00> : vector<256x8xf32>
    %29 = tpu.matmul %26, %28, %cst_27 {dimension_numbers = #tpu.dot_dimension_numbers<[1], [0], [0], [1], [0, 0, 1, 1], [], []>} : vector<256x64xbf16>, vector<64x8xbf16>, vector<256x8xf32> -> vector<256x8xf32>
    %30 = arith.addf %23, %29 : vector<256x8xf32>
    %c0_28 = arith.constant 0 : index
    %c2 = arith.constant 2 : index
    %c0_29 = arith.constant 0 : index
    %31 = vector.load %arg7[%c0_28, %c2, %c0_29] : memref<18x18x64xf32, #tpu.memory_space<vmem>>, vector<16x16x64xf32>
    %32 = vector.shape_cast %31 : vector<16x16x64xf32> to vector<256x64xf32>
    %33 = arith.truncf %32 : vector<256x64xf32> to vector<256x64xbf16>
    %c2_30 = arith.constant 2 : index
    %c0_31 = arith.constant 0 : index
    %c0_32 = arith.constant 0 : index
    %34 = vector.load %arg4[%c2_30, %c0_31, %c0_32] : memref<9x64x8xbf16, #tpu.memory_space<vmem>>, vector<1x64x8xbf16>
    %35 = vector.shape_cast %34 : vector<1x64x8xbf16> to vector<64x8xbf16>
    %cst_33 = arith.constant dense<0.000000e+00> : vector<256x8xf32>
    %36 = tpu.matmul %33, %35, %cst_33 {dimension_numbers = #tpu.dot_dimension_numbers<[1], [0], [0], [1], [0, 0, 1, 1], [], []>} : vector<256x64xbf16>, vector<64x8xbf16>, vector<256x8xf32> -> vector<256x8xf32>
    %37 = arith.addf %30, %36 : vector<256x8xf32>
    %c1_34 = arith.constant 1 : index
    %c0_35 = arith.constant 0 : index
    %c0_36 = arith.constant 0 : index
    %38 = vector.load %arg7[%c1_34, %c0_35, %c0_36] : memref<18x18x64xf32, #tpu.memory_space<vmem>>, vector<16x16x64xf32>
    %39 = vector.shape_cast %38 : vector<16x16x64xf32> to vector<256x64xf32>
    %40 = arith.truncf %39 : vector<256x64xf32> to vector<256x64xbf16>
    %c3 = arith.constant 3 : index
    %c0_37 = arith.constant 0 : index
    %c0_38 = arith.constant 0 : index
    %41 = vector.load %arg4[%c3, %c0_37, %c0_38] : memref<9x64x8xbf16, #tpu.memory_space<vmem>>, vector<1x64x8xbf16>
    %42 = vector.shape_cast %41 : vector<1x64x8xbf16> to vector<64x8xbf16>
    %cst_39 = arith.constant dense<0.000000e+00> : vector<256x8xf32>
    %43 = tpu.matmul %40, %42, %cst_39 {dimension_numbers = #tpu.dot_dimension_numbers<[1], [0], [0], [1], [0, 0, 1, 1], [], []>} : vector<256x64xbf16>, vector<64x8xbf16>, vector<256x8xf32> -> vector<256x8xf32>
    %44 = arith.addf %37, %43 : vector<256x8xf32>
    %c1_40 = arith.constant 1 : index
    %c1_41 = arith.constant 1 : index
    %c0_42 = arith.constant 0 : index
    %45 = vector.load %arg7[%c1_40, %c1_41, %c0_42] : memref<18x18x64xf32, #tpu.memory_space<vmem>>, vector<16x16x64xf32>
    %46 = vector.shape_cast %45 : vector<16x16x64xf32> to vector<256x64xf32>
    %47 = arith.truncf %46 : vector<256x64xf32> to vector<256x64xbf16>
    %c4 = arith.constant 4 : index
    %c0_43 = arith.constant 0 : index
    %c0_44 = arith.constant 0 : index
    %48 = vector.load %arg4[%c4, %c0_43, %c0_44] : memref<9x64x8xbf16, #tpu.memory_space<vmem>>, vector<1x64x8xbf16>
    %49 = vector.shape_cast %48 : vector<1x64x8xbf16> to vector<64x8xbf16>
    %cst_45 = arith.constant dense<0.000000e+00> : vector<256x8xf32>
    %50 = tpu.matmul %47, %49, %cst_45 {dimension_numbers = #tpu.dot_dimension_numbers<[1], [0], [0], [1], [0, 0, 1, 1], [], []>} : vector<256x64xbf16>, vector<64x8xbf16>, vector<256x8xf32> -> vector<256x8xf32>
    %51 = arith.addf %44, %50 : vector<256x8xf32>
    %c1_46 = arith.constant 1 : index
    %c2_47 = arith.constant 2 : index
    %c0_48 = arith.constant 0 : index
    %52 = vector.load %arg7[%c1_46, %c2_47, %c0_48] : memref<18x18x64xf32, #tpu.memory_space<vmem>>, vector<16x16x64xf32>
    %53 = vector.shape_cast %52 : vector<16x16x64xf32> to vector<256x64xf32>
    %54 = arith.truncf %53 : vector<256x64xf32> to vector<256x64xbf16>
    %c5 = arith.constant 5 : index
    %c0_49 = arith.constant 0 : index
    %c0_50 = arith.constant 0 : index
    %55 = vector.load %arg4[%c5, %c0_49, %c0_50] : memref<9x64x8xbf16, #tpu.memory_space<vmem>>, vector<1x64x8xbf16>
    %56 = vector.shape_cast %55 : vector<1x64x8xbf16> to vector<64x8xbf16>
    %cst_51 = arith.constant dense<0.000000e+00> : vector<256x8xf32>
    %57 = tpu.matmul %54, %56, %cst_51 {dimension_numbers = #tpu.dot_dimension_numbers<[1], [0], [0], [1], [0, 0, 1, 1], [], []>} : vector<256x64xbf16>, vector<64x8xbf16>, vector<256x8xf32> -> vector<256x8xf32>
    %58 = arith.addf %51, %57 : vector<256x8xf32>
    %c2_52 = arith.constant 2 : index
    %c0_53 = arith.constant 0 : index
    %c0_54 = arith.constant 0 : index
    %59 = vector.load %arg7[%c2_52, %c0_53, %c0_54] : memref<18x18x64xf32, #tpu.memory_space<vmem>>, vector<16x16x64xf32>
    %60 = vector.shape_cast %59 : vector<16x16x64xf32> to vector<256x64xf32>
    %61 = arith.truncf %60 : vector<256x64xf32> to vector<256x64xbf16>
    %c6 = arith.constant 6 : index
    %c0_55 = arith.constant 0 : index
    %c0_56 = arith.constant 0 : index
    %62 = vector.load %arg4[%c6, %c0_55, %c0_56] : memref<9x64x8xbf16, #tpu.memory_space<vmem>>, vector<1x64x8xbf16>
    %63 = vector.shape_cast %62 : vector<1x64x8xbf16> to vector<64x8xbf16>
    %cst_57 = arith.constant dense<0.000000e+00> : vector<256x8xf32>
    %64 = tpu.matmul %61, %63, %cst_57 {dimension_numbers = #tpu.dot_dimension_numbers<[1], [0], [0], [1], [0, 0, 1, 1], [], []>} : vector<256x64xbf16>, vector<64x8xbf16>, vector<256x8xf32> -> vector<256x8xf32>
    %65 = arith.addf %58, %64 : vector<256x8xf32>
    %c2_58 = arith.constant 2 : index
    %c1_59 = arith.constant 1 : index
    %c0_60 = arith.constant 0 : index
    %66 = vector.load %arg7[%c2_58, %c1_59, %c0_60] : memref<18x18x64xf32, #tpu.memory_space<vmem>>, vector<16x16x64xf32>
    %67 = vector.shape_cast %66 : vector<16x16x64xf32> to vector<256x64xf32>
    %68 = arith.truncf %67 : vector<256x64xf32> to vector<256x64xbf16>
    %c7 = arith.constant 7 : index
    %c0_61 = arith.constant 0 : index
    %c0_62 = arith.constant 0 : index
    %69 = vector.load %arg4[%c7, %c0_61, %c0_62] : memref<9x64x8xbf16, #tpu.memory_space<vmem>>, vector<1x64x8xbf16>
    %70 = vector.shape_cast %69 : vector<1x64x8xbf16> to vector<64x8xbf16>
    %cst_63 = arith.constant dense<0.000000e+00> : vector<256x8xf32>
    %71 = tpu.matmul %68, %70, %cst_63 {dimension_numbers = #tpu.dot_dimension_numbers<[1], [0], [0], [1], [0, 0, 1, 1], [], []>} : vector<256x64xbf16>, vector<64x8xbf16>, vector<256x8xf32> -> vector<256x8xf32>
    %72 = arith.addf %65, %71 : vector<256x8xf32>
    %c2_64 = arith.constant 2 : index
    %c2_65 = arith.constant 2 : index
    %c0_66 = arith.constant 0 : index
    %73 = vector.load %arg7[%c2_64, %c2_65, %c0_66] : memref<18x18x64xf32, #tpu.memory_space<vmem>>, vector<16x16x64xf32>
    %74 = vector.shape_cast %73 : vector<16x16x64xf32> to vector<256x64xf32>
    %75 = arith.truncf %74 : vector<256x64xf32> to vector<256x64xbf16>
    %c8 = arith.constant 8 : index
    %c0_67 = arith.constant 0 : index
    %c0_68 = arith.constant 0 : index
    %76 = vector.load %arg4[%c8, %c0_67, %c0_68] : memref<9x64x8xbf16, #tpu.memory_space<vmem>>, vector<1x64x8xbf16>
    %77 = vector.shape_cast %76 : vector<1x64x8xbf16> to vector<64x8xbf16>
    %cst_69 = arith.constant dense<0.000000e+00> : vector<256x8xf32>
    %78 = tpu.matmul %75, %77, %cst_69 {dimension_numbers = #tpu.dot_dimension_numbers<[1], [0], [0], [1], [0, 0, 1, 1], [], []>} : vector<256x64xbf16>, vector<64x8xbf16>, vector<256x8xf32> -> vector<256x8xf32>
    %79 = arith.addf %72, %78 : vector<256x8xf32>
    %80 = vector.shape_cast %79 : vector<256x8xf32> to vector<1x16x16x8xf32>
    %c0_70 = arith.constant 0 : index
    %c0_71 = arith.constant 0 : index
    %c0_72 = arith.constant 0 : index
    %c0_73 = arith.constant 0 : index
    %81 = vector.load %arg6[%c0_70, %c0_71, %c0_72, %c0_73] : memref<1x16x16x8xf32, #tpu.memory_space<vmem>>, vector<1x16x16x8xf32>
    tpu.vector_store %arg6[%c0_70, %c0_71, %c0_72, %c0_73], %80 {strides = array<i32>} : memref<1x16x16x8xf32, #tpu.memory_space<vmem>>, vector<1x16x16x8xf32>,
    return
  }
  func.func @transform_0(%arg0: i32) -> (i32, i32, i32, i32) {
    %c0_i32 = arith.constant 0 : i32
    %c0_i32_0 = arith.constant 0 : i32
    %c0_i32_1 = arith.constant 0 : i32
    %c0_i32_2 = arith.constant 0 : i32
    return %arg0, %c0_i32, %c0_i32_0, %c0_i32_1 : i32, i32, i32, i32
  }
  func.func @transform_1(%arg0: i32) -> (i32, i32) {
    %c0_i32 = arith.constant 0 : i32
    %c0_i32_0 = arith.constant 0 : i32
    %c0_i32_1 = arith.constant 0 : i32
    return %c0_i32, %c0_i32_0 : i32, i32
  }
  func.func @transform_2(%arg0: i32) -> (i32, i32) {
    %c0_i32 = arith.constant 0 : i32
    %c0_i32_0 = arith.constant 0 : i32
    %c0_i32_1 = arith.constant 0 : i32
    return %c0_i32, %c0_i32_0 : i32, i32
  }
  func.func @transform_3(%arg0: i32) -> (i32, i32, i32) {
    %c0_i32 = arith.constant 0 : i32
    %c0_i32_0 = arith.constant 0 : i32
    %c0_i32_1 = arith.constant 0 : i32
    %c0_i32_2 = arith.constant 0 : i32
    return %c0_i32, %c0_i32_0, %c0_i32_1 : i32, i32, i32
  }
  func.func @transform_4(%arg0: i32) -> (i32, i32) {
    %c0_i32 = arith.constant 0 : i32
    %c0_i32_0 = arith.constant 0 : i32
    %c0_i32_1 = arith.constant 0 : i32
    return %c0_i32, %c0_i32_0 : i32, i32
  }
  func.func @transform_5(%arg0: i32) -> (i32, i32, i32, i32) {
    %c0_i32 = arith.constant 0 : i32
    %c0_i32_0 = arith.constant 0 : i32
    %c0_i32_1 = arith.constant 0 : i32
    %c0_i32_2 = arith.constant 0 : i32
    return %arg0, %c0_i32, %c0_i32_0, %c0_i32_1 : i32, i32, i32, i32
  }
}

module attributes {stable_mosaic.version = 11 : i64} {
  func.func @_bn_relu_conv1x1_kernel(%arg0: i32, %arg1: memref<256x12xf32, #tpu.memory_space<vmem>>, %arg2: memref<1x12xf32, #tpu.memory_space<vmem>>, %arg3: memref<1x12xf32, #tpu.memory_space<vmem>>, %arg4: memref<12x64xbf16, #tpu.memory_space<vmem>>, %arg5: memref<1x64xf32, #tpu.memory_space<vmem>>, %arg6: memref<256x64xbf16, #tpu.memory_space<vmem>>, %arg7: memref<1x2x64xf32, #tpu.memory_space<vmem>>) attributes {dimension_semantics = [#tpu.dimension_semantics<parallel>], iteration_bounds = array<i64: 2>, scalar_prefetch = 0 : i64, scratch_operands = 0 : i64, tpu.core_type = #tpu.core_type<tc>, window_params = [{transform_indices = @transform_0, window_bounds = array<i64: 256, 12>}, {pipeline_mode = #tpu.pipeline_mode<synchronous>, transform_indices = @transform_1, window_bounds = array<i64: 1, 12>}, {pipeline_mode = #tpu.pipeline_mode<synchronous>, transform_indices = @transform_2, window_bounds = array<i64: 1, 12>}, {pipeline_mode = #tpu.pipeline_mode<synchronous>, transform_indices = @transform_3, window_bounds = array<i64: 12, 64>}, {pipeline_mode = #tpu.pipeline_mode<synchronous>, transform_indices = @transform_4, window_bounds = array<i64: 1, 64>}, {transform_indices = @transform_5, window_bounds = array<i64: 256, 64>}, {transform_indices = @transform_6, window_bounds = array<i64: 1, 2, 64>}]} {
    %c0 = arith.constant 0 : index
    %c0_0 = arith.constant 0 : index
    %0 = vector.load %arg1[%c0, %c0_0] : memref<256x12xf32, #tpu.memory_space<vmem>>, vector<256x12xf32>
    %c0_1 = arith.constant 0 : index
    %c0_2 = arith.constant 0 : index
    %1 = vector.load %arg2[%c0_1, %c0_2] : memref<1x12xf32, #tpu.memory_space<vmem>>, vector<1x12xf32>
    %2 = vector.broadcast %1 : vector<1x12xf32> to vector<256x12xf32>
    %3 = arith.mulf %0, %2 : vector<256x12xf32>
    %c0_3 = arith.constant 0 : index
    %c0_4 = arith.constant 0 : index
    %4 = vector.load %arg3[%c0_3, %c0_4] : memref<1x12xf32, #tpu.memory_space<vmem>>, vector<1x12xf32>
    %5 = vector.broadcast %4 : vector<1x12xf32> to vector<256x12xf32>
    %6 = arith.addf %3, %5 : vector<256x12xf32>
    %cst = arith.constant 0.000000e+00 : f32
    %7 = vector.broadcast %cst : f32 to vector<256x12xf32>
    %8 = arith.maximumf %6, %7 : vector<256x12xf32>
    %9 = arith.truncf %8 : vector<256x12xf32> to vector<256x12xbf16>
    %c0_5 = arith.constant 0 : index
    %c0_6 = arith.constant 0 : index
    %10 = vector.load %arg4[%c0_5, %c0_6] : memref<12x64xbf16, #tpu.memory_space<vmem>>, vector<12x64xbf16>
    %cst_7 = arith.constant dense<0.000000e+00> : vector<256x64xf32>
    %11 = tpu.matmul %9, %10, %cst_7 {dimension_numbers = #tpu.dot_dimension_numbers<[1], [0], [0], [1], [0, 0, 1, 1], [], []>} : vector<256x12xbf16>, vector<12x64xbf16>, vector<256x64xf32> -> vector<256x64xf32>
    %c0_8 = arith.constant 0 : index
    %c0_9 = arith.constant 0 : index
    %12 = vector.load %arg5[%c0_8, %c0_9] : memref<1x64xf32, #tpu.memory_space<vmem>>, vector<1x64xf32>
    %13 = vector.broadcast %12 : vector<1x64xf32> to vector<256x64xf32>
    %14 = arith.addf %11, %13 : vector<256x64xf32>
    %15 = arith.truncf %14 : vector<256x64xf32> to vector<256x64xbf16>
    %c0_10 = arith.constant 0 : index
    %c0_11 = arith.constant 0 : index
    %16 = vector.load %arg6[%c0_10, %c0_11] : memref<256x64xbf16, #tpu.memory_space<vmem>>, vector<256x64xbf16>
    tpu.vector_store %arg6[%c0_10, %c0_11], %15 {strides = array<i32>} : memref<256x64xbf16, #tpu.memory_space<vmem>>, vector<256x64xbf16>,
    %cst_12 = arith.constant dense<0.000000e+00> : vector<64xf32>
    %17 = vector.multi_reduction <add>, %14, %cst_12 [0] : vector<256x64xf32> to vector<64xf32>
    %18 = vector.shape_cast %17 : vector<64xf32> to vector<1x64xf32>
    %19 = arith.mulf %14, %14 : vector<256x64xf32>
    %cst_13 = arith.constant dense<0.000000e+00> : vector<64xf32>
    %20 = vector.multi_reduction <add>, %19, %cst_13 [0] : vector<256x64xf32> to vector<64xf32>
    %21 = vector.shape_cast %20 : vector<64xf32> to vector<1x64xf32>
    %22 = vector.shape_cast %18 : vector<1x64xf32> to vector<1x1x64xf32>
    %c0_14 = arith.constant 0 : index
    %c0_15 = arith.constant 0 : index
    %c0_16 = arith.constant 0 : index
    %23 = vector.load %arg7[%c0_14, %c0_15, %c0_16] : memref<1x2x64xf32, #tpu.memory_space<vmem>>, vector<1x1x64xf32>
    tpu.vector_store %arg7[%c0_14, %c0_15, %c0_16], %22 {strides = array<i32>} : memref<1x2x64xf32, #tpu.memory_space<vmem>>, vector<1x1x64xf32>,
    %24 = vector.shape_cast %21 : vector<1x64xf32> to vector<1x1x64xf32>
    %c0_17 = arith.constant 0 : index
    %c1 = arith.constant 1 : index
    %c0_18 = arith.constant 0 : index
    %25 = vector.load %arg7[%c0_17, %c1, %c0_18] : memref<1x2x64xf32, #tpu.memory_space<vmem>>, vector<1x1x64xf32>
    tpu.vector_store %arg7[%c0_17, %c1, %c0_18], %24 {strides = array<i32>} : memref<1x2x64xf32, #tpu.memory_space<vmem>>, vector<1x1x64xf32>,
    return
  }
  func.func @transform_0(%arg0: i32) -> (i32, i32) {
    %c0_i32 = arith.constant 0 : i32
    %c0_i32_0 = arith.constant 0 : i32
    return %arg0, %c0_i32 : i32, i32
  }
  func.func @transform_1(%arg0: i32) -> (i32, i32) {
    %c0_i32 = arith.constant 0 : i32
    %c0_i32_0 = arith.constant 0 : i32
    %c0_i32_1 = arith.constant 0 : i32
    return %c0_i32, %c0_i32_0 : i32, i32
  }
  func.func @transform_2(%arg0: i32) -> (i32, i32) {
    %c0_i32 = arith.constant 0 : i32
    %c0_i32_0 = arith.constant 0 : i32
    %c0_i32_1 = arith.constant 0 : i32
    return %c0_i32, %c0_i32_0 : i32, i32
  }
  func.func @transform_3(%arg0: i32) -> (i32, i32) {
    %c0_i32 = arith.constant 0 : i32
    %c0_i32_0 = arith.constant 0 : i32
    %c0_i32_1 = arith.constant 0 : i32
    return %c0_i32, %c0_i32_0 : i32, i32
  }
  func.func @transform_4(%arg0: i32) -> (i32, i32) {
    %c0_i32 = arith.constant 0 : i32
    %c0_i32_0 = arith.constant 0 : i32
    %c0_i32_1 = arith.constant 0 : i32
    return %c0_i32, %c0_i32_0 : i32, i32
  }
  func.func @transform_5(%arg0: i32) -> (i32, i32) {
    %c0_i32 = arith.constant 0 : i32
    %c0_i32_0 = arith.constant 0 : i32
    return %arg0, %c0_i32 : i32, i32
  }
  func.func @transform_6(%arg0: i32) -> (i32, i32, i32) {
    %c0_i32 = arith.constant 0 : i32
    %c0_i32_0 = arith.constant 0 : i32
    %c0_i32_1 = arith.constant 0 : i32
    return %arg0, %c0_i32, %c0_i32_0 : i32, i32, i32
  }
}

module attributes {stable_mosaic.version = 11 : i64} {
  func.func @_bn_relu_conv1x1_kernel(%arg0: i32, %arg1: memref<256x20xf32, #tpu.memory_space<vmem>>, %arg2: memref<1x20xf32, #tpu.memory_space<vmem>>, %arg3: memref<1x20xf32, #tpu.memory_space<vmem>>, %arg4: memref<20x64xbf16, #tpu.memory_space<vmem>>, %arg5: memref<1x64xf32, #tpu.memory_space<vmem>>, %arg6: memref<256x64xbf16, #tpu.memory_space<vmem>>, %arg7: memref<1x2x64xf32, #tpu.memory_space<vmem>>) attributes {dimension_semantics = [#tpu.dimension_semantics<parallel>], iteration_bounds = array<i64: 2>, scalar_prefetch = 0 : i64, scratch_operands = 0 : i64, tpu.core_type = #tpu.core_type<tc>, window_params = [{transform_indices = @transform_0, window_bounds = array<i64: 256, 20>}, {pipeline_mode = #tpu.pipeline_mode<synchronous>, transform_indices = @transform_1, window_bounds = array<i64: 1, 20>}, {pipeline_mode = #tpu.pipeline_mode<synchronous>, transform_indices = @transform_2, window_bounds = array<i64: 1, 20>}, {pipeline_mode = #tpu.pipeline_mode<synchronous>, transform_indices = @transform_3, window_bounds = array<i64: 20, 64>}, {pipeline_mode = #tpu.pipeline_mode<synchronous>, transform_indices = @transform_4, window_bounds = array<i64: 1, 64>}, {transform_indices = @transform_5, window_bounds = array<i64: 256, 64>}, {transform_indices = @transform_6, window_bounds = array<i64: 1, 2, 64>}]} {
    %c0 = arith.constant 0 : index
    %c0_0 = arith.constant 0 : index
    %0 = vector.load %arg1[%c0, %c0_0] : memref<256x20xf32, #tpu.memory_space<vmem>>, vector<256x20xf32>
    %c0_1 = arith.constant 0 : index
    %c0_2 = arith.constant 0 : index
    %1 = vector.load %arg2[%c0_1, %c0_2] : memref<1x20xf32, #tpu.memory_space<vmem>>, vector<1x20xf32>
    %2 = vector.broadcast %1 : vector<1x20xf32> to vector<256x20xf32>
    %3 = arith.mulf %0, %2 : vector<256x20xf32>
    %c0_3 = arith.constant 0 : index
    %c0_4 = arith.constant 0 : index
    %4 = vector.load %arg3[%c0_3, %c0_4] : memref<1x20xf32, #tpu.memory_space<vmem>>, vector<1x20xf32>
    %5 = vector.broadcast %4 : vector<1x20xf32> to vector<256x20xf32>
    %6 = arith.addf %3, %5 : vector<256x20xf32>
    %cst = arith.constant 0.000000e+00 : f32
    %7 = vector.broadcast %cst : f32 to vector<256x20xf32>
    %8 = arith.maximumf %6, %7 : vector<256x20xf32>
    %9 = arith.truncf %8 : vector<256x20xf32> to vector<256x20xbf16>
    %c0_5 = arith.constant 0 : index
    %c0_6 = arith.constant 0 : index
    %10 = vector.load %arg4[%c0_5, %c0_6] : memref<20x64xbf16, #tpu.memory_space<vmem>>, vector<20x64xbf16>
    %cst_7 = arith.constant dense<0.000000e+00> : vector<256x64xf32>
    %11 = tpu.matmul %9, %10, %cst_7 {dimension_numbers = #tpu.dot_dimension_numbers<[1], [0], [0], [1], [0, 0, 1, 1], [], []>} : vector<256x20xbf16>, vector<20x64xbf16>, vector<256x64xf32> -> vector<256x64xf32>
    %c0_8 = arith.constant 0 : index
    %c0_9 = arith.constant 0 : index
    %12 = vector.load %arg5[%c0_8, %c0_9] : memref<1x64xf32, #tpu.memory_space<vmem>>, vector<1x64xf32>
    %13 = vector.broadcast %12 : vector<1x64xf32> to vector<256x64xf32>
    %14 = arith.addf %11, %13 : vector<256x64xf32>
    %15 = arith.truncf %14 : vector<256x64xf32> to vector<256x64xbf16>
    %c0_10 = arith.constant 0 : index
    %c0_11 = arith.constant 0 : index
    %16 = vector.load %arg6[%c0_10, %c0_11] : memref<256x64xbf16, #tpu.memory_space<vmem>>, vector<256x64xbf16>
    tpu.vector_store %arg6[%c0_10, %c0_11], %15 {strides = array<i32>} : memref<256x64xbf16, #tpu.memory_space<vmem>>, vector<256x64xbf16>,
    %cst_12 = arith.constant dense<0.000000e+00> : vector<64xf32>
    %17 = vector.multi_reduction <add>, %14, %cst_12 [0] : vector<256x64xf32> to vector<64xf32>
    %18 = vector.shape_cast %17 : vector<64xf32> to vector<1x64xf32>
    %19 = arith.mulf %14, %14 : vector<256x64xf32>
    %cst_13 = arith.constant dense<0.000000e+00> : vector<64xf32>
    %20 = vector.multi_reduction <add>, %19, %cst_13 [0] : vector<256x64xf32> to vector<64xf32>
    %21 = vector.shape_cast %20 : vector<64xf32> to vector<1x64xf32>
    %22 = vector.shape_cast %18 : vector<1x64xf32> to vector<1x1x64xf32>
    %c0_14 = arith.constant 0 : index
    %c0_15 = arith.constant 0 : index
    %c0_16 = arith.constant 0 : index
    %23 = vector.load %arg7[%c0_14, %c0_15, %c0_16] : memref<1x2x64xf32, #tpu.memory_space<vmem>>, vector<1x1x64xf32>
    tpu.vector_store %arg7[%c0_14, %c0_15, %c0_16], %22 {strides = array<i32>} : memref<1x2x64xf32, #tpu.memory_space<vmem>>, vector<1x1x64xf32>,
    %24 = vector.shape_cast %21 : vector<1x64xf32> to vector<1x1x64xf32>
    %c0_17 = arith.constant 0 : index
    %c1 = arith.constant 1 : index
    %c0_18 = arith.constant 0 : index
    %25 = vector.load %arg7[%c0_17, %c1, %c0_18] : memref<1x2x64xf32, #tpu.memory_space<vmem>>, vector<1x1x64xf32>
    tpu.vector_store %arg7[%c0_17, %c1, %c0_18], %24 {strides = array<i32>} : memref<1x2x64xf32, #tpu.memory_space<vmem>>, vector<1x1x64xf32>,
    return
  }
  func.func @transform_0(%arg0: i32) -> (i32, i32) {
    %c0_i32 = arith.constant 0 : i32
    %c0_i32_0 = arith.constant 0 : i32
    return %arg0, %c0_i32 : i32, i32
  }
  func.func @transform_1(%arg0: i32) -> (i32, i32) {
    %c0_i32 = arith.constant 0 : i32
    %c0_i32_0 = arith.constant 0 : i32
    %c0_i32_1 = arith.constant 0 : i32
    return %c0_i32, %c0_i32_0 : i32, i32
  }
  func.func @transform_2(%arg0: i32) -> (i32, i32) {
    %c0_i32 = arith.constant 0 : i32
    %c0_i32_0 = arith.constant 0 : i32
    %c0_i32_1 = arith.constant 0 : i32
    return %c0_i32, %c0_i32_0 : i32, i32
  }
  func.func @transform_3(%arg0: i32) -> (i32, i32) {
    %c0_i32 = arith.constant 0 : i32
    %c0_i32_0 = arith.constant 0 : i32
    %c0_i32_1 = arith.constant 0 : i32
    return %c0_i32, %c0_i32_0 : i32, i32
  }
  func.func @transform_4(%arg0: i32) -> (i32, i32) {
    %c0_i32 = arith.constant 0 : i32
    %c0_i32_0 = arith.constant 0 : i32
    %c0_i32_1 = arith.constant 0 : i32
    return %c0_i32, %c0_i32_0 : i32, i32
  }
  func.func @transform_5(%arg0: i32) -> (i32, i32) {
    %c0_i32 = arith.constant 0 : i32
    %c0_i32_0 = arith.constant 0 : i32
    return %arg0, %c0_i32 : i32, i32
  }
  func.func @transform_6(%arg0: i32) -> (i32, i32, i32) {
    %c0_i32 = arith.constant 0 : i32
    %c0_i32_0 = arith.constant 0 : i32
    %c0_i32_1 = arith.constant 0 : i32
    return %arg0, %c0_i32, %c0_i32_0 : i32, i32, i32
  }
}

</mosaic_0001>

<bundles_post_ra>
// kernel: dense_block_forward.6
= control target key start
LH: loop header
LB: loop body
LE: loop exit
PB: predicated region body
PF: predicated region fallthrough
CT: control target
= control target key end

     0   :  { %s977_s21 = smov 0   ;;  %s1482_s0 = inlined_call_operand.vmem [shape: f32[512,4], index: 0, kind: input, shape index: {}]   ;;  %s1483_s1 = inlined_call_operand.vmem [shape: f32[1,4], index: 1, kind: input, shape index: {}]   ;;  %s1484_s2 = inlined_call_operand.vmem [shape: f32[1,4], index: 2, kind: input, shape index: {}]   ;;  %s1485_s3 = inlined_call_operand.vmem [shape: bf16[4,64], index: 3, kind: input, shape index: {}]   ;;  %s1486_s4 = inlined_call_operand.vmem [shape: f32[1,64], index: 4, kind: input, shape index: {}]   ;;  %s1487_s5 = inlined_call_operand.vmem [shape: bf16[512,64], index: 5, kind: output, shape index: {0}]   ;;  %s1488_s6 = inlined_call_operand.vmem [shape: f32[2,2,64], index: 6, kind: output, shape index: {1}]  }
   0x1 LB: > { %s983_s22 = sadd.s32 4294967295, %s940_s21   ;;  %p896_p0 = scmp.ge.s32.totalorder %s940_s21, 1  ;;  %s940_s21 = sphi %s977_s21, %s17_s21  }
   0x2   : > { %p216_p1 = scmp.lt.s32.totalorder %s940_s21, 3 }
   0x4   : > { %p217_p2 = pnand %p896_p0, %p216_p1 }
   0x5   : > { %s897_s25 = sshll.u32 (!%p217_p2), %s983_s22, 5  ;;  %p262_p4 = scmp.lt.s32.totalorder (!%p217_p2), %s983_s22, 1 }
   0x6   : > { %220 = sbr.rel (%p217_p2) target bundleno = 273 (0x111), region = 40  ;;  %p251_p3 = scmp.lt.s32.totalorder (!%p217_p2), %s897_s25, 63 }
   0xb   : > { %v419_v0 = vld [vmem:[%s1485_s3] sm:$0x3]  ;;  %vm473_vm0 = vcmask 1041408   ;;  %s1490_s25 = smov (!%p251_p3, %s897_s25), 63  ;;  %vm424_vm1 = vcmask 31744   ;;  %vm598_vm2 = vcmask 519168  }
   0xc   : > { %v475_v1 = vsel %vm473_vm0, %v419_v0, 0  ;;  %v996_v2 = vld [vmem:[%s1483_s1] ss:$0 sm:$0xff]  ;;  %s898_s28 = sshll.u32 %s1490_s25, 3  ;;  %s900_s12 = sshll.u32 %s1490_s25, 2  ;;  %vm631_vm3 = vcmask 523264  }
   0xd   : > { %484 = vmatpush.bf16.msra.mxu0 %v475_v1  ;;  %920 = vmatpush.bf16.msra.mxu1 %v475_v1  ;;  %s1002_s7 = scalar_lea.vmem %s1482_s0, %s898_s28  ;;  %v1007_v3 = vld [vmem:[%s1484_s2] ss:$0 sm:$0xff]  ;;  %s1133_s15 = scalar_lea.vmem %s1487_s5, %s900_s12  ;;  %vm802_vm4 = vcmask 516096  }
   0xe   : > { %921 = vmatpush.bf16.msra.mxu2 %v475_v1  ;;  %922 = vmatpush.bf16.msra.mxu3 %v475_v1  ;;  %v267_v4 = vld [vmem:[%s1002_s7] sm:$0xff]  ;;  %v268_v5 = vld [vmem:[%s1002_s7 + $0x8] sm:$0xff]  ;;  %v269_v25 = vld [vmem:[%s1002_s7 + $0x10] sm:$0xff]  ;;  %s1492_s22 = smov (!%p262_p4, %s983_s22), 1 }
   0xf   : > { %v275_v6 = vld [vmem:[%s1002_s7 + $0x40] sm:$0xff]  ;;  %v303_v7 = vmul.f32 %v996_v2, %v267_v4  ;;  %v304_v8 = vmul.f32 %v996_v2, %v268_v5  ;;  %v276_v9 = vld [vmem:[%s1002_s7 + $0x48] sm:$0xff]  ;;  %v270_v26 = vld [vmem:[%s1002_s7 + $0x18] sm:$0xff]  ;;  %v305_v35 = vmul.f32 %v996_v2, %v269_v25  ;;  %s901_s16 = sshll.u32 %s1492_s22, 1 }
  0x10   : > { %v311_v10 = vmul.f32 %v996_v2, %v275_v6  ;;  %v312_v11 = vmul.f32 %v996_v2, %v276_v9  ;;  %v283_v12 = vld [vmem:[%s1002_s7 + $0x80] sm:$0xff]  ;;  %v284_v13 = vld [vmem:[%s1002_s7 + $0x88] sm:$0xff]  ;;  %v277_v30 = vld [vmem:[%s1002_s7 + $0x50] sm:$0xff]  ;;  %v306_v36 = vmul.f32 %v996_v2, %v270_v26  ;;  %s265_s19 = scalar_lea.vmem %s1488_s6, %s901_s16 }
  0x11   : > { %v339_v14 = vadd.f32 %v1007_v3, %v303_v7  ;;  %v340_v15 = vadd.f32 %v1007_v3, %v304_v8  ;;  %v319_v17 = vmul.f32 %v996_v2, %v283_v12  ;;  %v320_v19 = vmul.f32 %v996_v2, %v284_v13  ;;  %v278_v31 = vld [vmem:[%s1002_s7 + $0x58] sm:$0xff]  ;;  %v291_v32 = vld [vmem:[%s1002_s7 + $0xc0] sm:$0xff]  ;;  %v285_v37 = vld [vmem:[%s1002_s7 + $0x90] sm:$0xff] }
  0x12   : > { %v347_v16 = vadd.f32 %v1007_v3, %v311_v10  ;;  %v348_v18 = vadd.f32 %v1007_v3, %v312_v11  ;;  %v286_v38 = vld [vmem:[%s1002_s7 + $0x98] sm:$0xff]  ;;  %v292_v39 = vld [vmem:[%s1002_s7 + $0xc8] sm:$0xff]  ;;  %v313_v41 = vmul.f32 %v996_v2, %v277_v30  ;;  %v314_v42 = vmul.f32 %v996_v2, %v278_v31  ;;  %v293_v62 = vld [vmem:[%s1002_s7 + $0xd0] sm:$0xff] }
  0x13   : > { %v371_v20 = vmax.f32 %v339_v14, 0.0  ;;  %v372_v21 = vmax.f32 %v340_v15, 0.0  ;;  %v355_v23 = vadd.f32 %v1007_v3, %v319_v17  ;;  %v356_v27 = vadd.f32 %v1007_v3, %v320_v19  ;;  %v294_v63 = vld [vmem:[%s1002_s7 + $0xd8] sm:$0xff]  ;;  %v271_v8 = vld [vmem:[%s1002_s7 + $0x20] sm:$0xff]  ;;  %v272_v9 = vld [vmem:[%s1002_s7 + $0x28] sm:$0xff] }
  0x14   : > { %v379_v22 = vmax.f32 %v347_v16, 0.0  ;;  %v380_v24 = vmax.f32 %v348_v18, 0.0  ;;  %v327_v43 = vmul.f32 %v996_v2, %v291_v32  ;;  %v321_v44 = vmul.f32 %v996_v2, %v285_v37  ;;  %v279_v10 = vld [vmem:[%s1002_s7 + $0x60] sm:$0xff]  ;;  %v280_v11 = vld [vmem:[%s1002_s7 + $0x68] sm:$0xff] }
  0x15   : > { %v403_v28 = vpack.c.bf16 %v372_v21, %v371_v20  ;;  %v387_v29 = vmax.f32 %v355_v23, 0.0  ;;  %v388_v34 = vmax.f32 %v356_v27, 0.0  ;;  %v322_v45 = vmul.f32 %v996_v2, %v286_v38  ;;  %v287_v17 = vld [vmem:[%s1002_s7 + $0xa0] sm:$0xff]  ;;  %v288_v18 = vld [vmem:[%s1002_s7 + $0xa8] sm:$0xff] }
  0x16   : > { %v407_v33 = vpack.c.bf16 %v380_v24, %v379_v22  ;;  %v328_v46 = vmul.f32 %v996_v2, %v292_v39  ;;  %v363_v47 = vadd.f32 %v1007_v3, %v327_v43  ;;  %v341_v48 = vadd.f32 %v1007_v3, %v305_v35  ;;  %v296_v35 = vld [vmem:[%s1002_s7 + $0xe8] sm:$0xff] }
  0x17   : > { %902 = vmatmul.msk.bf16.vlgmr.msra.gmra.mxu0 %vm424_vm1, %v403_v28  ;;  %v411_v40 = vpack.c.bf16 %v388_v34, %v387_v29  ;;  %v342_v49 = vadd.f32 %v1007_v3, %v306_v36  ;;  %v349_v50 = vadd.f32 %v1007_v3, %v313_v41  ;;  %v350_v51 = vadd.f32 %v1007_v3, %v314_v42  ;;  %v295_v34 = vld [vmem:[%s1002_s7 + $0xe0] sm:$0xff] }
  0x18   : > { %906 = vmatmul.msk.bf16.vlgmr.msra.gmra.mxu1 %vm424_vm1, %v407_v33  ;;  %v364_v52 = vadd.f32 %v1007_v3, %v328_v46  ;;  %v395_v53 = vmax.f32 %v363_v47, 0.0  ;;  %v357_v54 = vadd.f32 %v1007_v3, %v321_v44  ;;  %v358_v55 = vadd.f32 %v1007_v3, %v322_v45  ;;  %v273_v44 = vld [vmem:[%s1002_s7 + $0x30] sm:$0xff]  ;;  %v274_v45 = vld [vmem:[%s1002_s7 + $0x38] sm:$0xff] }
  0x19   : > { %910 = vmatmul.msk.bf16.vlgmr.msra.gmra.mxu2 %vm424_vm1, %v411_v40  ;;  %v373_v57 = vmax.f32 %v341_v48, 0.0  ;;  %v374_v58 = vmax.f32 %v342_v49, 0.0  ;;  %v381_v59 = vmax.f32 %v349_v50, 0.0  ;;  %v382_v60 = vmax.f32 %v350_v51, 0.0  ;;  %v281_v46 = vld [vmem:[%s1002_s7 + $0x70] sm:$0xff]  ;;  %v282_v47 = vld [vmem:[%s1002_s7 + $0x78] sm:$0xff] }
  0x1a   : > { %v396_v56 = vmax.f32 %v364_v52, 0.0  ;;  %v389_v0 = vmax.f32 %v357_v54, 0.0  ;;  %v390_v1 = vmax.f32 %v358_v55, 0.0  ;;  %v329_v4 = vmul.f32 %v996_v2, %v293_v62  ;;  %v290_v54 = vld [vmem:[%s1002_s7 + $0xb8] sm:$0xff] }
  0x1b   : > { %v330_v5 = vmul.f32 %v996_v2, %v294_v63  ;;  %v404_v6 = vpack.c.bf16 %v374_v58, %v373_v57  ;;  %v408_v7 = vpack.c.bf16 %v382_v60, %v381_v59  ;;  %v307_v15 = vmul.f32 %v996_v2, %v271_v8  ;;  %v297_v8 = vld [vmem:[%s1002_s7 + $0xf0] sm:$0xff] }
  0x1c   : > { %v415_v61 = vpack.c.bf16 %v396_v56, %v395_v53  ;;  %v412_v12 = vpack.c.bf16 %v390_v1, %v389_v0  ;;  %v365_v13 = vadd.f32 %v1007_v3, %v329_v4  ;;  %v308_v16 = vmul.f32 %v996_v2, %v272_v9  ;;  %v289_v53 = vld [vmem:[%s1002_s7 + $0xb0] sm:$0xff]  ;;  %v298_v9 = vld [vmem:[%s1002_s7 + $0xf8] sm:$0xff] }
  0x1d   : > { %v366_v14 = vadd.f32 %v1007_v3, %v330_v5  ;;  %v315_v19 = vmul.f32 %v996_v2, %v279_v10  ;;  %v316_v20 = vmul.f32 %v996_v2, %v280_v11  ;;  %v323_v21 = vmul.f32 %v996_v2, %v287_v17 }
  0x1e   : > { %914 = vmatmul.msk.bf16.vlgmr.msra.gmra.mxu3 %vm424_vm1, %v415_v61  ;;  %v324_v22 = vmul.f32 %v996_v2, %v288_v18  ;;  %v397_v23 = vmax.f32 %v365_v13, 0.0  ;;  %v343_v25 = vadd.f32 %v1007_v3, %v307_v15  ;;  %v344_v26 = vadd.f32 %v1007_v3, %v308_v16 }
  0x1f   : > { %v398_v24 = vmax.f32 %v366_v14, 0.0  ;;  %v351_v27 = vadd.f32 %v1007_v3, %v315_v19  ;;  %v352_v28 = vadd.f32 %v1007_v3, %v316_v20  ;;  %v359_v29 = vadd.f32 %v1007_v3, %v323_v21 }
  0x20   : > { %v360_v30 = vadd.f32 %v1007_v3, %v324_v22  ;;  %v375_v32 = vmax.f32 %v343_v25, 0.0  ;;  %v376_v33 = vmax.f32 %v344_v26, 0.0  ;;  %v331_v40 = vmul.f32 %v996_v2, %v295_v34 }
  0x21   : > { %v416_v31 = vpack.c.bf16 %v398_v24, %v397_v23  ;;  %v383_v36 = vmax.f32 %v351_v27, 0.0  ;;  %v384_v37 = vmax.f32 %v352_v28, 0.0  ;;  %v391_v38 = vmax.f32 %v359_v29, 0.0 }
  0x22   : > { %v392_v39 = vmax.f32 %v360_v30, 0.0  ;;  %v332_v41 = vmul.f32 %v996_v2, %v296_v35  ;;  %v405_v42 = vpack.c.bf16 %v376_v33, %v375_v32  ;;  %v367_v49 = vadd.f32 %v1007_v3, %v331_v40 }
  0x23   : > { %v409_v43 = vpack.c.bf16 %v384_v37, %v383_v36  ;;  %v309_v51 = vmul.f32 %v996_v2, %v273_v44  ;;  %v310_v52 = vmul.f32 %v996_v2, %v274_v45  ;;  %v317_v55 = vmul.f32 %v996_v2, %v281_v46 }
  0x24   : > { %v413_v48 = vpack.c.bf16 %v392_v39, %v391_v38  ;;  %v368_v50 = vadd.f32 %v1007_v3, %v332_v41  ;;  %v318_v56 = vmul.f32 %v996_v2, %v282_v47  ;;  %v325_v57 = vmul.f32 %v996_v2, %v289_v53 }
  0x25   : > { %v326_v58 = vmul.f32 %v996_v2, %v290_v54  ;;  %v399_v59 = vmax.f32 %v367_v49, 0.0  ;;  %v345_v61 = vadd.f32 %v1007_v3, %v309_v51  ;;  %v346_v62 = vadd.f32 %v1007_v3, %v310_v52 }
  0x26   : > { %v400_v60 = vmax.f32 %v368_v50, 0.0  ;;  %v353_v63 = vadd.f32 %v1007_v3, %v317_v55  ;;  %v354_v0 = vadd.f32 %v1007_v3, %v318_v56  ;;  %v361_v1 = vadd.f32 %v1007_v3, %v325_v57 }
  0x27   : > { %903 = vmatmul.msk.bf16.gmra.mxu0 %vm424_vm1, %v404_v6  ;;  %v362_v4 = vadd.f32 %v1007_v3, %v326_v58  ;;  %v377_v6 = vmax.f32 %v345_v61, 0.0  ;;  %v333_v14 = vmul.f32 %v996_v2, %v297_v8  ;;  %v334_v15 = vmul.f32 %v996_v2, %v298_v9  ;;  %v1124_v2 = vld [vmem:[%s1486_s4] ss:$0 sm:$0xff] }
  0x28   : > { %907 = vmatmul.msk.bf16.gmra.mxu1 %vm424_vm1, %v408_v7  ;;  %v417_v5 = vpack.c.bf16 %v400_v60, %v399_v59  ;;  %v378_v7 = vmax.f32 %v346_v62, 0.0  ;;  %v385_v10 = vmax.f32 %v353_v63, 0.0  ;;  %v386_v11 = vmax.f32 %v354_v0, 0.0 }
  0x29   : > { %911 = vmatmul.msk.bf16.gmra.mxu2 %vm424_vm1, %v412_v12  ;;  %v393_v12 = vmax.f32 %v361_v1, 0.0  ;;  %v394_v13 = vmax.f32 %v362_v4, 0.0  ;;  %v369_v19 = vadd.f32 %v1007_v3, %v333_v14  ;;  %v370_v20 = vadd.f32 %v1007_v3, %v334_v15 }
  0x2a   : > { %v406_v16 = vpack.c.bf16 %v378_v7, %v377_v6  ;;  %v410_v17 = vpack.c.bf16 %v386_v11, %v385_v10 }
  0x2b   : > { %v414_v18 = vpack.c.bf16 %v394_v13, %v393_v12  ;;  %v401_v21 = vmax.f32 %v369_v19, 0.0  ;;  %v402_v22 = vmax.f32 %v370_v20, 0.0 }
  0x2d   : > { %v418_v23 = vpack.c.bf16 %v402_v22, %v401_v21 }
  0x2e   : > { %915 = vmatmul.msk.bf16.gmra.mxu3 %vm424_vm1, %v416_v31 }
  0x37   : > { %904 = vmatmul.msk.bf16.gmra.mxu0 %vm424_vm1, %v405_v42 }
  0x38   : > { %908 = vmatmul.msk.bf16.gmra.mxu1 %vm424_vm1, %v409_v43 }
  0x39   : > { %912 = vmatmul.msk.bf16.gmra.mxu2 %vm424_vm1, %v413_v48 }
  0x3e   : > { %916 = vmatmul.msk.bf16.gmra.mxu3 %vm424_vm1, %v417_v5 }
  0x47   : > { %905 = vmatmul.msk.bf16.gmra.mxu0 %vm424_vm1, %v406_v16 }
  0x48   : > { %909 = vmatmul.msk.bf16.gmra.mxu1 %vm424_vm1, %v410_v17 }
  0x49   : > { %913 = vmatmul.msk.bf16.gmra.mxu2 %vm424_vm1, %v414_v18 }
  0x4e   : > { %917 = vmatmul.msk.bf16.gmra.mxu3 %vm424_vm1, %v418_v23 }
  0x94   : > { %v486_v24 = vpop.f32.mrf.mxu0 }
  0x95   : > { %v1128_v3 = vadd.f32 %v1124_v2, %v486_v24  ;;  %v506_v25 = vpop.f32.mrf.mxu1 }
  0x96   : > { %v1136_v26 = vadd.f32 %v1124_v2, %v506_v25 }
  0x97   : > { %v566_v27 = vpack.c.bf16 %v1128_v3, %v1128_v3  ;;  %v701_v20 = vmul.f32 %v1128_v3, %v1128_v3 }
  0x98   : > { %v574_v28 = vpack.c.bf16 %v1136_v26, %v1136_v26 }
  0x99   : > { %599 = vst.msk [vmem:[%s1133_s15] sm:$0xf] %vm598_vm2, %v566_v27 }
  0x9a   : > { %607 = vst.msk [vmem:[%s1133_s15 + $0x20] sm:$0xf] %vm598_vm2, %v574_v28 }
  0x9c   : > { %v488_v29 = vpop.f32.mrf.mxu0  ;;  %v526_v32 = vpop.f32.mrf.mxu2 }
  0x9d   : > { %v1147_v30 = vadd.f32 %v1124_v2, %v488_v29  ;;  %v508_v31 = vpop.f32.mrf.mxu1  ;;  %v1153_v34 = vadd.f32 %v1124_v2, %v526_v32  ;;  %v632_v32 = vsel %vm631_vm3, %v1128_v3, 0.0 }
  0x9e   : > { %v1150_v33 = vadd.f32 %v1124_v2, %v508_v31 }
  0x9f   : > { %v567_v35 = vpack.c.bf16 %v1147_v30, %v1147_v30  ;;  %v582_v37 = vpack.c.bf16 %v1153_v34, %v1153_v34  ;;  %v702_v13 = vmul.f32 %v1147_v30, %v1147_v30  ;;  %v633_v24 = vsel %vm631_vm3, %v1147_v30, 0.0 }
  0xa0   : > { %v575_v36 = vpack.c.bf16 %v1150_v33, %v1150_v33  ;;  %v733_v30 = vsel %vm631_vm3, %v701_v20, 0.0 }
  0xa1   : > { %600 = vst.msk [vmem:[%s1133_s15 + $0x4] sm:$0xf] %vm598_vm2, %v567_v35  ;;  %v546_v44 = vpop.f32.mrf.mxu3  ;;  %v734_v25 = vsel %vm631_vm3, %v702_v13, 0.0 }
  0xa2   : > { %608 = vst.msk [vmem:[%s1133_s15 + $0x24] sm:$0xf] %vm598_vm2, %v575_v36  ;;  %v1179_v46 = vadd.f32 %v1124_v2, %v546_v44  ;;  %v634_v36 = vadd.f32 %v633_v24, %v632_v32 }
  0xa3   : > { %615 = vst.msk [vmem:[%s1133_s15 + $0x40] sm:$0xf] %vm598_vm2, %v582_v37  ;;  %v735_v37 = vadd.f32 %v734_v25, %v733_v30 }
  0xa4   : > { %v491_v38 = vpop.f32.mrf.mxu0  ;;  %v528_v41 = vpop.f32.mrf.mxu2  ;;  %v590_v49 = vpack.c.bf16 %v1179_v46, %v1179_v46 }
  0xa5   : > { %v1168_v39 = vadd.f32 %v1124_v2, %v491_v38  ;;  %v511_v40 = vpop.f32.mrf.mxu1  ;;  %v1174_v43 = vadd.f32 %v1124_v2, %v528_v41 }
  0xa6   : > { %v1171_v42 = vadd.f32 %v1124_v2, %v511_v40  ;;  %623 = vst.msk [vmem:[%s1133_s15 + $0x60] sm:$0xf] %vm598_vm2, %v590_v49 }
  0xa7   : > { %v568_v45 = vpack.c.bf16 %v1168_v39, %v1168_v39  ;;  %v583_v48 = vpack.c.bf16 %v1174_v43, %v1174_v43  ;;  %v703_v27 = vmul.f32 %v1168_v39, %v1168_v39  ;;  %v635_v35 = vsel %vm631_vm3, %v1168_v39, 0.0 }
  0xa8   : > { %v576_v47 = vpack.c.bf16 %v1171_v42, %v1171_v42 }
  0xa9   : > { %601 = vst.msk [vmem:[%s1133_s15 + $0x8] sm:$0xf] %vm598_vm2, %v568_v45  ;;  %v548_v56 = vpop.f32.mrf.mxu3  ;;  %v736_v40 = vsel %vm631_vm3, %v703_v27, 0.0 }
  0xaa   : > { %609 = vst.msk [vmem:[%s1133_s15 + $0x28] sm:$0xf] %vm598_vm2, %v576_v47  ;;  %v1203_v58 = vadd.f32 %v1124_v2, %v548_v56 }
  0xab   : > { %616 = vst.msk [vmem:[%s1133_s15 + $0x44] sm:$0xf] %vm598_vm2, %v583_v48  ;;  %v636_v48 = vadd.f32 %v635_v35, %v634_v36 }
  0xac   : > { %v493_v50 = vpop.f32.mrf.mxu0  ;;  %v531_v53 = vpop.f32.mrf.mxu2  ;;  %v591_v61 = vpack.c.bf16 %v1203_v58, %v1203_v58 }
  0xad   : > { %v494_v51 = vadd.f32 %v1124_v2, %v493_v50  ;;  %v513_v52 = vpop.f32.mrf.mxu1  ;;  %v1200_v55 = vadd.f32 %v1124_v2, %v531_v53 }
  0xae   : > { %v1197_v54 = vadd.f32 %v1124_v2, %v513_v52  ;;  %624 = vst.msk [vmem:[%s1133_s15 + $0x64] sm:$0xf] %vm598_vm2, %v591_v61 }
  0xaf   : > { %v569_v57 = vpack.c.bf16 %v494_v51, %v494_v51  ;;  %v584_v60 = vpack.c.bf16 %v1200_v55, %v1200_v55  ;;  %v704_v29 = vmul.f32 %v494_v51, %v494_v51  ;;  %v637_v41 = vsel %vm631_vm3, %v494_v51, 0.0 }
  0xb0   : > { %v577_v59 = vpack.c.bf16 %v1197_v54, %v1197_v54 }
  0xb1   : > { %602 = vst.msk [vmem:[%s1133_s15 + $0xc] sm:$0xf] %vm598_vm2, %v569_v57  ;;  %v551_v6 = vpop.f32.mrf.mxu3  ;;  %v738_v39 = vsel %vm631_vm3, %v704_v29, 0.0 }
  0xb2   : > { %610 = vst.msk [vmem:[%s1133_s15 + $0x2c] sm:$0xf] %vm598_vm2, %v577_v59  ;;  %v1227_v8 = vadd.f32 %v1124_v2, %v551_v6  ;;  %v737_v59 = vadd.f32 %v736_v40, %v735_v37  ;;  %v710_v40 = vmul.f32 %v1150_v33, %v1150_v33 }
  0xb3   : > { %617 = vst.msk [vmem:[%s1133_s15 + $0x48] sm:$0xf] %vm598_vm2, %v584_v60  ;;  %v638_v60 = vadd.f32 %v637_v41, %v636_v48 }
  0xb4   : > { %v496_v62 = vpop.f32.mrf.mxu0  ;;  %v533_v1 = vpop.f32.mrf.mxu2  ;;  %v592_v11 = vpack.c.bf16 %v1227_v8, %v1227_v8  ;;  %v739_v6 = vadd.f32 %v738_v39, %v737_v59  ;;  %v711_v39 = vmul.f32 %v1171_v42, %v1171_v42  ;;  %v712_v59 = vmul.f32 %v1197_v54, %v1197_v54 }
  0xb5   : > { %v497_v63 = vadd.f32 %v1124_v2, %v496_v62  ;;  %v516_v0 = vpop.f32.mrf.mxu1  ;;  %v1224_v5 = vadd.f32 %v1124_v2, %v533_v1 }
  0xb6   : > { %v1221_v4 = vadd.f32 %v1124_v2, %v516_v0  ;;  %625 = vst.msk [vmem:[%s1133_s15 + $0x68] sm:$0xf] %vm598_vm2, %v592_v11 }
  0xb7   : > { %v570_v7 = vpack.c.bf16 %v497_v63, %v497_v63  ;;  %v585_v10 = vpack.c.bf16 %v1224_v5, %v1224_v5  ;;  %v705_v44 = vmul.f32 %v497_v63, %v497_v63  ;;  %v639_v53 = vsel %vm631_vm3, %v497_v63, 0.0 }
  0xb8   : > { %v578_v9 = vpack.c.bf16 %v1221_v4, %v1221_v4 }
  0xb9   : > { %603 = vst.msk [vmem:[%s1133_s15 + $0x10] sm:$0xf] %vm598_vm2, %v570_v7  ;;  %v553_v19 = vpop.f32.mrf.mxu3  ;;  %v740_v62 = vsel %vm631_vm3, %v705_v44, 0.0  ;;  %v640_v7 = vadd.f32 %v639_v53, %v638_v60 }
  0xba   : > { %611 = vst.msk [vmem:[%s1133_s15 + $0x30] sm:$0xf] %vm598_vm2, %v578_v9  ;;  %v1255_v22 = vadd.f32 %v1124_v2, %v553_v19 }
  0xbb   : > { %618 = vst.msk [vmem:[%s1133_s15 + $0x4c] sm:$0xf] %vm598_vm2, %v585_v10 }
  0xbc   : > { %v498_v12 = vpop.f32.mrf.mxu0  ;;  %v536_v16 = vpop.f32.mrf.mxu2  ;;  %v593_v31 = vpack.c.bf16 %v1255_v22, %v1255_v22 }
  0xbd   : > { %v499_v14 = vadd.f32 %v1124_v2, %v498_v12  ;;  %v518_v15 = vpop.f32.mrf.mxu1  ;;  %v1250_v18 = vadd.f32 %v1124_v2, %v536_v16  ;;  %v741_v12 = vadd.f32 %v740_v62, %v739_v6 }
  0xbe   : > { %v1247_v17 = vadd.f32 %v1124_v2, %v518_v15  ;;  %626 = vst.msk [vmem:[%s1133_s15 + $0x6c] sm:$0xf] %vm598_vm2, %v593_v31  ;;  %v709_v15 = vmul.f32 %v1136_v26, %v1136_v26 }
  0xbf   : > { %v571_v21 = vpack.c.bf16 %v499_v14, %v499_v14  ;;  %v586_v28 = vpack.c.bf16 %v1250_v18, %v1250_v18  ;;  %v706_v51 = vmul.f32 %v499_v14, %v499_v14  ;;  %v641_v0 = vsel %vm631_vm3, %v499_v14, 0.0 }
  0xc0   : > { %v579_v23 = vpack.c.bf16 %v1247_v17, %v1247_v17  ;;  %v642_v13 = vadd.f32 %v641_v0, %v640_v7  ;;  %v748_v48 = vsel %vm631_vm3, %v709_v15, 0.0 }
  0xc1   : > { %604 = vst.msk [vmem:[%s1133_s15 + $0x14] sm:$0xf] %vm598_vm2, %v571_v21  ;;  %v556_v52 = vpop.f32.mrf.mxu3  ;;  %v742_v10 = vsel %vm631_vm3, %v706_v51, 0.0  ;;  %v750_v51 = vsel %vm631_vm3, %v710_v40, 0.0 }
  0xc2   : > { %612 = vst.msk [vmem:[%s1133_s15 + $0x34] sm:$0xf] %vm598_vm2, %v579_v23  ;;  %v1293_v57 = vadd.f32 %v1124_v2, %v556_v52  ;;  %v743_v23 = vadd.f32 %v742_v10, %v741_v12  ;;  %v655_v12 = vsel %vm631_vm3, %v1221_v4, 0.0 }
  0xc3   : > { %619 = vst.msk [vmem:[%s1133_s15 + $0x50] sm:$0xf] %vm598_vm2, %v586_v28 }
  0xc4   : > { %v501_v38 = vpop.f32.mrf.mxu0  ;;  %v538_v47 = vpop.f32.mrf.mxu2  ;;  %v594_v9 = vpack.c.bf16 %v1293_v57, %v1293_v57 }
  0xc5   : > { %v502_v45 = vadd.f32 %v1124_v2, %v501_v38  ;;  %v521_v3 = vpop.f32.mrf.mxu1  ;;  %v1289_v50 = vadd.f32 %v1124_v2, %v538_v47  ;;  %v647_v38 = vsel %vm631_vm3, %v1136_v26, 0.0  ;;  %v649_v26 = vsel %vm631_vm3, %v1150_v33, 0.0 }
  0xc6   : > { %v1286_v49 = vadd.f32 %v1124_v2, %v521_v3  ;;  %627 = vst.msk [vmem:[%s1133_s15 + $0x70] sm:$0xf] %vm598_vm2, %v594_v9 }
  0xc7   : > { %v572_v56 = vpack.c.bf16 %v502_v45, %v502_v45  ;;  %v707_v1 = vmul.f32 %v502_v45, %v502_v45  ;;  %v587_v63 = vpack.c.bf16 %v1289_v50, %v1289_v50  ;;  %v643_v11 = vsel %vm631_vm3, %v502_v45, 0.0 }
  0xc8   : > { %v580_v61 = vpack.c.bf16 %v1286_v49, %v1286_v49  ;;  %v644_v24 = vadd.f32 %v643_v11, %v642_v13  ;;  %v754_v11 = vsel %vm631_vm3, %v712_v59, 0.0 }
  0xc9   : > { %605 = vst.msk [vmem:[%s1133_s15 + $0x18] sm:$0xf] %vm598_vm2, %v572_v56  ;;  %v744_v16 = vsel %vm631_vm3, %v707_v1, 0.0  ;;  %v558_v28 = vpop.f32.mrf.mxu3  ;;  %v651_v56 = vsel %vm631_vm3, %v1171_v42, 0.0  ;;  %v752_v1 = vsel %vm631_vm3, %v711_v39, 0.0  ;;  %v713_v42 = vmul.f32 %v1221_v4, %v1221_v4 }
  0xca   : > { %613 = vst.msk [vmem:[%s1133_s15 + $0x38] sm:$0xf] %vm598_vm2, %v580_v61  ;;  %v1323_v30 = vadd.f32 %v1124_v2, %v558_v28  ;;  %v745_v35 = vadd.f32 %v744_v16, %v743_v23 }
  0xcb   : > { %620 = vst.msk [vmem:[%s1133_s15 + $0x54] sm:$0xf] %vm598_vm2, %v587_v63  ;;  %v653_v63 = vsel %vm631_vm3, %v1197_v54, 0.0  ;;  %v714_v54 = vmul.f32 %v1247_v17, %v1247_v17  ;;  %v756_v16 = vsel %vm631_vm3, %v713_v42, 0.0 }
  0xcc   : > { %v503_v14 = vpop.f32.mrf.mxu0  ;;  %v541_v21 = vpop.f32.mrf.mxu2  ;;  %v595_v47 = vpack.c.bf16 %v1323_v30, %v1323_v30 }
  0xcd   : > { %v504_v19 = vadd.f32 %v1124_v2, %v503_v14  ;;  %v523_v20 = vpop.f32.mrf.mxu1  ;;  %v1319_v27 = vadd.f32 %v1124_v2, %v541_v21  ;;  %v758_v23 = vsel %vm631_vm3, %v714_v54, 0.0 }
  0xce   : > { %v524_v25 = vadd.f32 %v1124_v2, %v523_v20  ;;  %628 = vst.msk [vmem:[%s1133_s15 + $0x74] sm:$0xf] %vm598_vm2, %v595_v47  ;;  %v715_v20 = vmul.f32 %v1286_v49, %v1286_v49 }
  0xcf   : > { %v573_v29 = vpack.c.bf16 %v504_v19, %v504_v19  ;;  %v645_v31 = vsel %vm631_vm3, %v504_v19, 0.0  ;;  %v708_v32 = vmul.f32 %v504_v19, %v504_v19  ;;  %v588_v44 = vpack.c.bf16 %v1319_v27, %v1319_v27 }
  0xd0   : > { %v646_v36 = vadd.f32 %v645_v31, %v644_v24  ;;  %v581_v37 = vpack.c.bf16 %v524_v25, %v524_v25  ;;  %v657_v19 = vsel %vm631_vm3, %v1247_v17, 0.0  ;;  %v659_v24 = vsel %vm631_vm3, %v1286_v49, 0.0 }
  0xd1   : > { %606 = vst.msk [vmem:[%s1133_s15 + $0x1c] sm:$0xf] %vm598_vm2, %v573_v29  ;;  %v746_v41 = vsel %vm631_vm3, %v708_v32, 0.0  ;;  %v561_v0 = vpop.f32.mrf.mxu3  ;;  %v716_v28 = vmul.f32 %v524_v25, %v524_v25  ;;  %v717_v17 = vmul.f32 %v1153_v34, %v1153_v34  ;;  %v663_v49 = vsel %vm631_vm3, %v1153_v34, 0.0 }
  0xd2   : > { %v648_v45 = vadd.f32 %v647_v38, %v646_v36  ;;  %v747_v3 = vadd.f32 %v746_v41, %v745_v35  ;;  %614 = vst.msk [vmem:[%s1133_s15 + $0x3c] sm:$0xf] %vm598_vm2, %v581_v37  ;;  %v1361_v6 = vadd.f32 %v1124_v2, %v561_v0  ;;  %v760_v35 = vsel %vm631_vm3, %v715_v20, 0.0 }
  0xd3   : > { %621 = vst.msk [vmem:[%s1133_s15 + $0x58] sm:$0xf] %vm598_vm2, %v588_v44  ;;  %v661_v36 = vsel %vm631_vm3, %v524_v25, 0.0  ;;  %v718_v41 = vmul.f32 %v1174_v43, %v1174_v43  ;;  %v762_v44 = vsel %vm631_vm3, %v716_v28, 0.0  ;;  %v764_v25 = vsel %vm631_vm3, %v717_v17, 0.0 }
  0xd4   : > { %v650_v52 = vadd.f32 %v649_v26, %v648_v45  ;;  %v749_v53 = vadd.f32 %v748_v48, %v747_v3  ;;  %v543_v60 = vpop.f32.mrf.mxu2  ;;  %v596_v13 = vpack.c.bf16 %v1361_v6, %v1361_v6  ;;  %v719_v48 = vmul.f32 %v1200_v55, %v1200_v55 }
  0xd5   : > { %v1353_v62 = vadd.f32 %v1124_v2, %v543_v60  ;;  %v766_v39 = vsel %vm631_vm3, %v718_v41, 0.0  ;;  %v721_v60 = vmul.f32 %v1250_v18, %v1250_v18 }
  0xd6   : > { %v652_v61 = vadd.f32 %v651_v56, %v650_v52  ;;  %v751_v33 = vadd.f32 %v750_v51, %v749_v53  ;;  %629 = vst.msk [vmem:[%s1133_s15 + $0x78] sm:$0xf] %vm598_vm2, %v596_v13  ;;  %v667_v52 = vsel %vm631_vm3, %v1200_v55, 0.0  ;;  %v720_v53 = vmul.f32 %v1224_v5, %v1224_v5 }
  0xd7   : > { %v589_v10 = vpack.c.bf16 %v1353_v62, %v1353_v62  ;;  %v768_v59 = vsel %vm631_vm3, %v719_v48, 0.0  ;;  %v671_v55 = vsel %vm631_vm3, %v1250_v18, 0.0  ;;  %v675_v18 = vsel %vm631_vm3, %v1319_v27, 0.0 }
  0xd8   : > { %v753_v7 = vadd.f32 %v752_v1, %v751_v33  ;;  %v654_v9 = vadd.f32 %v653_v63, %v652_v61  ;;  %v770_v0 = vsel %vm631_vm3, %v720_v53, 0.0  ;;  %v722_v1 = vmul.f32 %v1289_v50, %v1289_v50 }
  0xd9   : > { %622 = vst.msk [vmem:[%s1133_s15 + $0x5c] sm:$0xf] %vm598_vm2, %v589_v10  ;;  %v563_v32 = vpop.f32.mrf.mxu3  ;;  %v724_v54 = vmul.f32 %v1353_v62, %v1353_v62  ;;  %v731_v48 = vmul.f32 %v1361_v6, %v1361_v6 }
  0xda   : > { %v656_v14 = vadd.f32 %v655_v12, %v654_v9  ;;  %v755_v15 = vadd.f32 %v754_v11, %v753_v7  ;;  %v1389_v37 = vadd.f32 %v1124_v2, %v563_v32  ;;  %v665_v2 = vsel %vm631_vm3, %v1174_v43, 0.0 }
  0xdb   : > { %v669_v43 = vsel %vm631_vm3, %v1224_v5, 0.0  ;;  %v772_v7 = vsel %vm631_vm3, %v721_v60, 0.0  ;;  %v673_v5 = vsel %vm631_vm3, %v1289_v50, 0.0  ;;  %v723_v9 = vmul.f32 %v1319_v27, %v1319_v27 }
  0xdc   : > { %v658_v4 = vadd.f32 %v657_v19, %v656_v14  ;;  %v757_v21 = vadd.f32 %v756_v16, %v755_v15  ;;  %v597_v45 = vpack.c.bf16 %v1389_v37, %v1389_v37  ;;  %v774_v12 = vsel %vm631_vm3, %v722_v1, 0.0 }
  0xdd   : > { %v725_v15 = vmul.f32 %v1179_v46, %v1179_v46  ;;  %v776_v50 = vsel %vm631_vm3, %v723_v9, 0.0  ;;  %v677_v16 = vsel %vm631_vm3, %v1353_v62, 0.0  ;;  %v726_v27 = vmul.f32 %v1203_v58, %v1203_v58 }
  0xde   : > { %v660_v29 = vadd.f32 %v659_v24, %v658_v4  ;;  %v759_v31 = vadd.f32 %v758_v23, %v757_v21  ;;  %630 = vst.msk [vmem:[%s1133_s15 + $0x7c] sm:$0xf] %vm598_vm2, %v597_v45  ;;  %v679_v4 = vsel %vm631_vm3, %v1179_v46, 0.0  ;;  %v778_v21 = vsel %vm631_vm3, %v724_v54, 0.0 }
  0xdf   : > { %v780_v28 = vsel %vm631_vm3, %v725_v15, 0.0  ;;  %v727_v62 = vmul.f32 %v1227_v8, %v1227_v8  ;;  %v782_v17 = vsel %vm631_vm3, %v726_v27, 0.0  ;;  %v683_v46 = vsel %vm631_vm3, %v1227_v8, 0.0 }
  0xe0   : > { %v761_v38 = vadd.f32 %v760_v35, %v759_v31  ;;  %v662_v40 = vadd.f32 %v661_v36, %v660_v29  ;;  %v681_v29 = vsel %vm631_vm3, %v1203_v58, 0.0  ;;  %v728_v35 = vmul.f32 %v1255_v22, %v1255_v22 }
  0xe1   : > { %v685_v58 = vsel %vm631_vm3, %v1255_v22, 0.0  ;;  %v687_v8 = vsel %vm631_vm3, %v1293_v57, 0.0  ;;  %v689_v22 = vsel %vm631_vm3, %v1323_v30, 0.0 }
  0xe2   : > { %v664_v3 = vadd.f32 %v663_v49, %v662_v40  ;;  %v763_v47 = vadd.f32 %v762_v44, %v761_v38  ;;  %v784_v40 = vsel %vm631_vm3, %v727_v62, 0.0  ;;  %v729_v49 = vmul.f32 %v1293_v57, %v1293_v57 }
  0xe3   : > { %v786_v45 = vsel %vm631_vm3, %v728_v35, 0.0  ;;  %v691_v57 = vsel %vm631_vm3, %v1361_v6, 0.0 }
  0xe4   : > { %v666_v34 = vadd.f32 %v665_v2, %v664_v3  ;;  %v765_v26 = vadd.f32 %v764_v25, %v763_v47  ;;  %v730_v3 = vmul.f32 %v1323_v30, %v1323_v30  ;;  %v788_v2 = vsel %vm631_vm3, %v729_v49, 0.0 }
  0xe5   : > { %v693_v30 = vsel %vm631_vm3, %v1389_v37, 0.0 }
  0xe6   : > { %v767_v51 = vadd.f32 %v766_v39, %v765_v26  ;;  %v668_v56 = vadd.f32 %v667_v52, %v666_v34  ;;  %v790_v39 = vsel %vm631_vm3, %v730_v3, 0.0  ;;  %v732_v52 = vmul.f32 %v1389_v37, %v1389_v37 }
  0xe8   : > { %v670_v61 = vadd.f32 %v669_v43, %v668_v56  ;;  %v769_v33 = vadd.f32 %v768_v59, %v767_v51  ;;  %v792_v56 = vsel %vm631_vm3, %v731_v48, 0.0  ;;  %v794_v60 = vsel %vm631_vm3, %v732_v52, 0.0 }
  0xea   : > { %v672_v63 = vadd.f32 %v671_v55, %v670_v61  ;;  %v771_v42 = vadd.f32 %v770_v0, %v769_v33 }
  0xec   : > { %v674_v10 = vadd.f32 %v673_v5, %v672_v63  ;;  %v773_v11 = vadd.f32 %v772_v7, %v771_v42 }
  0xee   : > { %v775_v13 = vadd.f32 %v774_v12, %v773_v11  ;;  %v676_v14 = vadd.f32 %v675_v18, %v674_v10 }
  0xf0   : > { %v777_v19 = vadd.f32 %v776_v50, %v775_v13  ;;  %v678_v20 = vadd.f32 %v677_v16, %v676_v14 }
  0xf2   : > { %v680_v23 = vadd.f32 %v679_v4, %v678_v20  ;;  %v779_v24 = vadd.f32 %v778_v21, %v777_v19 }
  0xf4   : > { %v682_v31 = vadd.f32 %v681_v29, %v680_v23  ;;  %v781_v32 = vadd.f32 %v780_v28, %v779_v24 }
  0xf6   : > { %v783_v36 = vadd.f32 %v782_v17, %v781_v32  ;;  %v684_v38 = vadd.f32 %v683_v46, %v682_v31 }
  0xf8   : > { %v686_v41 = vadd.f32 %v685_v58, %v684_v38  ;;  %v785_v44 = vadd.f32 %v784_v40, %v783_v36 }
  0xfa   : > { %v688_v47 = vadd.f32 %v687_v8, %v686_v41  ;;  %v787_v25 = vadd.f32 %v786_v45, %v785_v44 }
  0xfc   : > { %v690_v34 = vadd.f32 %v689_v22, %v688_v47  ;;  %v789_v26 = vadd.f32 %v788_v2, %v787_v25 }
  0xfe   : > { %v791_v53 = vadd.f32 %v790_v39, %v789_v26  ;;  %v692_v51 = vadd.f32 %v691_v57, %v690_v34 }
 0x100   : > { %v793_v59 = vadd.f32 %v792_v56, %v791_v53  ;;  %v694_v43 = vadd.f32 %v693_v30, %v692_v51 }
 0x102   : > { %v695_v61 = vrot.slane %v694_v43, 4  ;;  %v795_v33 = vadd.f32 %v794_v60, %v793_v59 }
 0x104   : > { %v696_v0 = vadd.f32 %v695_v61, %v694_v43  ;;  %v796_v6 = vrot.slane %v795_v33, 4 }
 0x106   : > { %v697_v55 = vrot.slane %v696_v0, 2  ;;  %v797_v1 = vadd.f32 %v796_v6, %v795_v33 }
 0x108   : > { %v698_v63 = vadd.f32 %v697_v55, %v696_v0  ;;  %v798_v42 = vrot.slane %v797_v1, 2 }
 0x10a   : > { %v699_v7 = vrot.slane %v698_v63, 1  ;;  %v799_v5 = vadd.f32 %v798_v42, %v797_v1 }
 0x10c   : > { %v700_v37 = vadd.f32 %v699_v7, %v698_v63  ;;  %v800_v9 = vrot.slane %v799_v5, 1 }
 0x10e   : > { %v801_v10 = vadd.f32 %v800_v9, %v799_v5  ;;  %803 = vst.msk [vmem:[%s265_s19] sm:$0x1] %vm802_vm4, %v700_v37 }
 0x110   : > { %804 = vst.msk [vmem:[%s265_s19 + $0x1] sm:$0x1] %vm802_vm4, %v801_v10 }
 0x111 PF: > { %s17_s21 = sadd.s32 1, %s940_s21  }
 0x112   : > { %p14_p5 = scmp.ge.s32.totalorder %s17_s21, 4  }
 0x114   :  { %16 = sbr.rel (!%p14_p5) target bundleno = 1 (0x1), region = 82 }

// kernel: dense_block_forward.8
= control target key start
LH: loop header
LB: loop body
LE: loop exit
PB: predicated region body
PF: predicated region fallthrough
CT: control target
= control target key end

     0   :  { %s988_s21 = smov 0   ;;  %s1496_s0 = inlined_call_operand.vmem [shape: f32[512,12], index: 0, kind: input, shape index: {}]   ;;  %s1497_s1 = inlined_call_operand.vmem [shape: f32[1,12], index: 1, kind: input, shape index: {}]   ;;  %s1498_s2 = inlined_call_operand.vmem [shape: f32[1,12], index: 2, kind: input, shape index: {}]   ;;  %s1499_s3 = inlined_call_operand.vmem [shape: bf16[12,64], index: 3, kind: input, shape index: {}]   ;;  %s1500_s4 = inlined_call_operand.vmem [shape: f32[1,64], index: 4, kind: input, shape index: {}]   ;;  %s1501_s5 = inlined_call_operand.vmem [shape: bf16[512,64], index: 5, kind: output, shape index: {0}]   ;;  %s1502_s6 = inlined_call_operand.vmem [shape: f32[2,2,64], index: 6, kind: output, shape index: {1}]  }
   0x1 LB: > { %s994_s22 = sadd.s32 4294967295, %s951_s21   ;;  %p902_p0 = scmp.ge.s32.totalorder %s951_s21, 1  ;;  %s951_s21 = sphi %s988_s21, %s17_s21  }
   0x2   : > { %p216_p1 = scmp.lt.s32.totalorder %s951_s21, 3 }
   0x4   : > { %p217_p2 = pnand %p902_p0, %p216_p1 }
   0x5   : > { %s903_s27 = sshll.u32 (!%p217_p2), %s994_s22, 5  ;;  %p262_p4 = scmp.lt.s32.totalorder (!%p217_p2), %s994_s22, 1 }
   0x6   : > { %220 = sbr.rel (%p217_p2) target bundleno = 273 (0x111), region = 40  ;;  %p251_p3 = scmp.lt.s32.totalorder (!%p217_p2), %s903_s27, 63 }
   0xb   : > { %v910_v0 = vld [vmem:[%s1499_s3] sm:$0xf]  ;;  %v930_v1 = vld [vmem:[%s1499_s3] sm:$0x30]  ;;  %vm479_vm0 = vcmask 1045504   ;;  %s1504_s27 = smov (!%p251_p3, %s903_s27), 63 }
   0xc   : > { %v911_v2 = vor.u32 %v930_v1, %v910_v0  ;;  %v1010_v4 = vld [vmem:[%s1497_s1] ss:$0 sm:$0xff]  ;;  %s904_s30 = sshll.u32 %s1504_s27, 3  ;;  %vm430_vm1 = vcmask 97280   ;;  %s906_s14 = sshll.u32 %s1504_s27, 2  ;;  %vm604_vm2 = vcmask 519168  }
   0xd   : > { %s1016_s9 = scalar_lea.vmem %s1496_s0, %s904_s30  ;;  %v1021_v5 = vld [vmem:[%s1498_s2] ss:$0 sm:$0xff]  ;;  %s1147_s17 = scalar_lea.vmem %s1501_s5, %s906_s14  ;;  %vm637_vm3 = vcmask 523264   ;;  %vm808_vm4 = vcmask 516096  }
   0xe   : > { %v481_v3 = vsel %vm479_vm0, %v911_v2, 0  ;;  %v267_v6 = vld [vmem:[%s1016_s9] sm:$0xff]  ;;  %v268_v7 = vld [vmem:[%s1016_s9 + $0x8] sm:$0xff]  ;;  %v269_v27 = vld [vmem:[%s1016_s9 + $0x10] sm:$0xff]  ;;  %s1506_s22 = smov (!%p262_p4, %s994_s22), 1 }
   0xf   : > { %490 = vmatpush.bf16.msra.mxu0 %v481_v3  ;;  %931 = vmatpush.bf16.msra.mxu1 %v481_v3  ;;  %v275_v8 = vld [vmem:[%s1016_s9 + $0x40] sm:$0xff]  ;;  %v303_v9 = vmul.f32 %v1010_v4, %v267_v6  ;;  %v304_v10 = vmul.f32 %v1010_v4, %v268_v7  ;;  %v276_v11 = vld [vmem:[%s1016_s9 + $0x48] sm:$0xff]  ;;  %v270_v28 = vld [vmem:[%s1016_s9 + $0x18] sm:$0xff]  ;;  %v305_v37 = vmul.f32 %v1010_v4, %v269_v27  ;;  %s907_s18 = sshll.u32 %s1506_s22, 1 }
  0x10   : > { %932 = vmatpush.bf16.msra.mxu2 %v481_v3  ;;  %933 = vmatpush.bf16.msra.mxu3 %v481_v3  ;;  %v311_v12 = vmul.f32 %v1010_v4, %v275_v8  ;;  %v312_v13 = vmul.f32 %v1010_v4, %v276_v11  ;;  %v283_v14 = vld [vmem:[%s1016_s9 + $0x80] sm:$0xff]  ;;  %v284_v15 = vld [vmem:[%s1016_s9 + $0x88] sm:$0xff]  ;;  %v277_v32 = vld [vmem:[%s1016_s9 + $0x50] sm:$0xff]  ;;  %v306_v38 = vmul.f32 %v1010_v4, %v270_v28  ;;  %s265_s23 = scalar_lea.vmem %s1502_s6, %s907_s18 }
  0x11   : > { %v339_v16 = vadd.f32 %v1021_v5, %v303_v9  ;;  %v340_v17 = vadd.f32 %v1021_v5, %v304_v10  ;;  %v319_v19 = vmul.f32 %v1010_v4, %v283_v14  ;;  %v320_v21 = vmul.f32 %v1010_v4, %v284_v15  ;;  %v278_v33 = vld [vmem:[%s1016_s9 + $0x58] sm:$0xff]  ;;  %v291_v34 = vld [vmem:[%s1016_s9 + $0xc0] sm:$0xff]  ;;  %v285_v39 = vld [vmem:[%s1016_s9 + $0x90] sm:$0xff] }
  0x12   : > { %v347_v18 = vadd.f32 %v1021_v5, %v311_v12  ;;  %v348_v20 = vadd.f32 %v1021_v5, %v312_v13  ;;  %v286_v40 = vld [vmem:[%s1016_s9 + $0x98] sm:$0xff]  ;;  %v292_v41 = vld [vmem:[%s1016_s9 + $0xc8] sm:$0xff]  ;;  %v313_v43 = vmul.f32 %v1010_v4, %v277_v32  ;;  %v314_v44 = vmul.f32 %v1010_v4, %v278_v33  ;;  %v293_v0 = vld [vmem:[%s1016_s9 + $0xd0] sm:$0xff] }
  0x13   : > { %v371_v22 = vmax.f32 %v339_v16, 0.0  ;;  %v372_v23 = vmax.f32 %v340_v17, 0.0  ;;  %v355_v25 = vadd.f32 %v1021_v5, %v319_v19  ;;  %v356_v29 = vadd.f32 %v1021_v5, %v320_v21  ;;  %v294_v1 = vld [vmem:[%s1016_s9 + $0xd8] sm:$0xff]  ;;  %v271_v10 = vld [vmem:[%s1016_s9 + $0x20] sm:$0xff]  ;;  %v272_v11 = vld [vmem:[%s1016_s9 + $0x28] sm:$0xff] }
  0x14   : > { %v379_v24 = vmax.f32 %v347_v18, 0.0  ;;  %v380_v26 = vmax.f32 %v348_v20, 0.0  ;;  %v327_v45 = vmul.f32 %v1010_v4, %v291_v34  ;;  %v321_v46 = vmul.f32 %v1010_v4, %v285_v39  ;;  %v279_v12 = vld [vmem:[%s1016_s9 + $0x60] sm:$0xff]  ;;  %v280_v13 = vld [vmem:[%s1016_s9 + $0x68] sm:$0xff] }
  0x15   : > { %v403_v30 = vpack.c.bf16 %v372_v23, %v371_v22  ;;  %v387_v31 = vmax.f32 %v355_v25, 0.0  ;;  %v388_v36 = vmax.f32 %v356_v29, 0.0  ;;  %v322_v47 = vmul.f32 %v1010_v4, %v286_v40  ;;  %v287_v19 = vld [vmem:[%s1016_s9 + $0xa0] sm:$0xff]  ;;  %v288_v20 = vld [vmem:[%s1016_s9 + $0xa8] sm:$0xff] }
  0x16   : > { %v407_v35 = vpack.c.bf16 %v380_v26, %v379_v24  ;;  %v328_v48 = vmul.f32 %v1010_v4, %v292_v41  ;;  %v363_v49 = vadd.f32 %v1021_v5, %v327_v45  ;;  %v341_v50 = vadd.f32 %v1021_v5, %v305_v37  ;;  %v296_v37 = vld [vmem:[%s1016_s9 + $0xe8] sm:$0xff] }
  0x17   : > { %912 = vmatmul.msk.bf16.vlgmr.msra.gmra.mxu0 %vm430_vm1, %v403_v30  ;;  %v411_v42 = vpack.c.bf16 %v388_v36, %v387_v31  ;;  %v342_v51 = vadd.f32 %v1021_v5, %v306_v38  ;;  %v349_v52 = vadd.f32 %v1021_v5, %v313_v43  ;;  %v350_v53 = vadd.f32 %v1021_v5, %v314_v44  ;;  %v295_v36 = vld [vmem:[%s1016_s9 + $0xe0] sm:$0xff] }
  0x18   : > { %916 = vmatmul.msk.bf16.vlgmr.msra.gmra.mxu1 %vm430_vm1, %v407_v35  ;;  %v364_v54 = vadd.f32 %v1021_v5, %v328_v48  ;;  %v395_v55 = vmax.f32 %v363_v49, 0.0  ;;  %v357_v56 = vadd.f32 %v1021_v5, %v321_v46  ;;  %v358_v57 = vadd.f32 %v1021_v5, %v322_v47  ;;  %v273_v46 = vld [vmem:[%s1016_s9 + $0x30] sm:$0xff]  ;;  %v274_v47 = vld [vmem:[%s1016_s9 + $0x38] sm:$0xff] }
  0x19   : > { %920 = vmatmul.msk.bf16.vlgmr.msra.gmra.mxu2 %vm430_vm1, %v411_v42  ;;  %v373_v59 = vmax.f32 %v341_v50, 0.0  ;;  %v374_v60 = vmax.f32 %v342_v51, 0.0  ;;  %v381_v61 = vmax.f32 %v349_v52, 0.0  ;;  %v382_v62 = vmax.f32 %v350_v53, 0.0  ;;  %v281_v48 = vld [vmem:[%s1016_s9 + $0x70] sm:$0xff]  ;;  %v282_v49 = vld [vmem:[%s1016_s9 + $0x78] sm:$0xff] }
  0x1a   : > { %v396_v58 = vmax.f32 %v364_v54, 0.0  ;;  %v389_v2 = vmax.f32 %v357_v56, 0.0  ;;  %v390_v3 = vmax.f32 %v358_v57, 0.0  ;;  %v329_v6 = vmul.f32 %v1010_v4, %v293_v0  ;;  %v290_v56 = vld [vmem:[%s1016_s9 + $0xb8] sm:$0xff] }
  0x1b   : > { %v330_v7 = vmul.f32 %v1010_v4, %v294_v1  ;;  %v404_v8 = vpack.c.bf16 %v374_v60, %v373_v59  ;;  %v408_v9 = vpack.c.bf16 %v382_v62, %v381_v61  ;;  %v307_v17 = vmul.f32 %v1010_v4, %v271_v10  ;;  %v297_v10 = vld [vmem:[%s1016_s9 + $0xf0] sm:$0xff] }
  0x1c   : > { %v415_v63 = vpack.c.bf16 %v396_v58, %v395_v55  ;;  %v412_v14 = vpack.c.bf16 %v390_v3, %v389_v2  ;;  %v365_v15 = vadd.f32 %v1021_v5, %v329_v6  ;;  %v308_v18 = vmul.f32 %v1010_v4, %v272_v11  ;;  %v289_v55 = vld [vmem:[%s1016_s9 + $0xb0] sm:$0xff]  ;;  %v298_v11 = vld [vmem:[%s1016_s9 + $0xf8] sm:$0xff] }
  0x1d   : > { %v366_v16 = vadd.f32 %v1021_v5, %v330_v7  ;;  %v315_v21 = vmul.f32 %v1010_v4, %v279_v12  ;;  %v316_v22 = vmul.f32 %v1010_v4, %v280_v13  ;;  %v323_v23 = vmul.f32 %v1010_v4, %v287_v19 }
  0x1e   : > { %924 = vmatmul.msk.bf16.vlgmr.msra.gmra.mxu3 %vm430_vm1, %v415_v63  ;;  %v324_v24 = vmul.f32 %v1010_v4, %v288_v20  ;;  %v397_v25 = vmax.f32 %v365_v15, 0.0  ;;  %v343_v27 = vadd.f32 %v1021_v5, %v307_v17  ;;  %v344_v28 = vadd.f32 %v1021_v5, %v308_v18 }
  0x1f   : > { %v398_v26 = vmax.f32 %v366_v16, 0.0  ;;  %v351_v29 = vadd.f32 %v1021_v5, %v315_v21  ;;  %v352_v30 = vadd.f32 %v1021_v5, %v316_v22  ;;  %v359_v31 = vadd.f32 %v1021_v5, %v323_v23 }
  0x20   : > { %v360_v32 = vadd.f32 %v1021_v5, %v324_v24  ;;  %v375_v34 = vmax.f32 %v343_v27, 0.0  ;;  %v376_v35 = vmax.f32 %v344_v28, 0.0  ;;  %v331_v42 = vmul.f32 %v1010_v4, %v295_v36 }
  0x21   : > { %v416_v33 = vpack.c.bf16 %v398_v26, %v397_v25  ;;  %v383_v38 = vmax.f32 %v351_v29, 0.0  ;;  %v384_v39 = vmax.f32 %v352_v30, 0.0  ;;  %v391_v40 = vmax.f32 %v359_v31, 0.0 }
  0x22   : > { %v392_v41 = vmax.f32 %v360_v32, 0.0  ;;  %v332_v43 = vmul.f32 %v1010_v4, %v296_v37  ;;  %v405_v44 = vpack.c.bf16 %v376_v35, %v375_v34  ;;  %v367_v51 = vadd.f32 %v1021_v5, %v331_v42 }
  0x23   : > { %v409_v45 = vpack.c.bf16 %v384_v39, %v383_v38  ;;  %v309_v53 = vmul.f32 %v1010_v4, %v273_v46  ;;  %v310_v54 = vmul.f32 %v1010_v4, %v274_v47  ;;  %v317_v57 = vmul.f32 %v1010_v4, %v281_v48 }
  0x24   : > { %v413_v50 = vpack.c.bf16 %v392_v41, %v391_v40  ;;  %v368_v52 = vadd.f32 %v1021_v5, %v332_v43  ;;  %v318_v58 = vmul.f32 %v1010_v4, %v282_v49  ;;  %v325_v59 = vmul.f32 %v1010_v4, %v289_v55 }
  0x25   : > { %v326_v60 = vmul.f32 %v1010_v4, %v290_v56  ;;  %v399_v61 = vmax.f32 %v367_v51, 0.0  ;;  %v345_v63 = vadd.f32 %v1021_v5, %v309_v53  ;;  %v346_v0 = vadd.f32 %v1021_v5, %v310_v54 }
  0x26   : > { %v400_v62 = vmax.f32 %v368_v52, 0.0  ;;  %v353_v1 = vadd.f32 %v1021_v5, %v317_v57  ;;  %v354_v2 = vadd.f32 %v1021_v5, %v318_v58  ;;  %v361_v3 = vadd.f32 %v1021_v5, %v325_v59 }
  0x27   : > { %913 = vmatmul.msk.bf16.gmra.mxu0 %vm430_vm1, %v404_v8  ;;  %v362_v6 = vadd.f32 %v1021_v5, %v326_v60  ;;  %v377_v8 = vmax.f32 %v345_v63, 0.0  ;;  %v333_v16 = vmul.f32 %v1010_v4, %v297_v10  ;;  %v334_v17 = vmul.f32 %v1010_v4, %v298_v11  ;;  %v1138_v4 = vld [vmem:[%s1500_s4] ss:$0 sm:$0xff] }
  0x28   : > { %917 = vmatmul.msk.bf16.gmra.mxu1 %vm430_vm1, %v408_v9  ;;  %v417_v7 = vpack.c.bf16 %v400_v62, %v399_v61  ;;  %v378_v9 = vmax.f32 %v346_v0, 0.0  ;;  %v385_v12 = vmax.f32 %v353_v1, 0.0  ;;  %v386_v13 = vmax.f32 %v354_v2, 0.0 }
  0x29   : > { %921 = vmatmul.msk.bf16.gmra.mxu2 %vm430_vm1, %v412_v14  ;;  %v393_v14 = vmax.f32 %v361_v3, 0.0  ;;  %v394_v15 = vmax.f32 %v362_v6, 0.0  ;;  %v369_v21 = vadd.f32 %v1021_v5, %v333_v16  ;;  %v370_v22 = vadd.f32 %v1021_v5, %v334_v17 }
  0x2a   : > { %v406_v18 = vpack.c.bf16 %v378_v9, %v377_v8  ;;  %v410_v19 = vpack.c.bf16 %v386_v13, %v385_v12 }
  0x2b   : > { %v414_v20 = vpack.c.bf16 %v394_v15, %v393_v14  ;;  %v401_v23 = vmax.f32 %v369_v21, 0.0  ;;  %v402_v24 = vmax.f32 %v370_v22, 0.0 }
  0x2d   : > { %v418_v25 = vpack.c.bf16 %v402_v24, %v401_v23 }
  0x2e   : > { %925 = vmatmul.msk.bf16.gmra.mxu3 %vm430_vm1, %v416_v33 }
  0x37   : > { %914 = vmatmul.msk.bf16.gmra.mxu0 %vm430_vm1, %v405_v44 }
  0x38   : > { %918 = vmatmul.msk.bf16.gmra.mxu1 %vm430_vm1, %v409_v45 }
  0x39   : > { %922 = vmatmul.msk.bf16.gmra.mxu2 %vm430_vm1, %v413_v50 }
  0x3e   : > { %926 = vmatmul.msk.bf16.gmra.mxu3 %vm430_vm1, %v417_v7 }
  0x47   : > { %915 = vmatmul.msk.bf16.gmra.mxu0 %vm430_vm1, %v406_v18 }
  0x48   : > { %919 = vmatmul.msk.bf16.gmra.mxu1 %vm430_vm1, %v410_v19 }
  0x49   : > { %923 = vmatmul.msk.bf16.gmra.mxu2 %vm430_vm1, %v414_v20 }
  0x4e   : > { %927 = vmatmul.msk.bf16.gmra.mxu3 %vm430_vm1, %v418_v25 }
  0x94   : > { %v492_v26 = vpop.f32.mrf.mxu0 }
  0x95   : > { %v1142_v5 = vadd.f32 %v1138_v4, %v492_v26  ;;  %v512_v27 = vpop.f32.mrf.mxu1 }
  0x96   : > { %v1150_v28 = vadd.f32 %v1138_v4, %v512_v27 }
  0x97   : > { %v572_v29 = vpack.c.bf16 %v1142_v5, %v1142_v5  ;;  %v707_v22 = vmul.f32 %v1142_v5, %v1142_v5 }
  0x98   : > { %v580_v30 = vpack.c.bf16 %v1150_v28, %v1150_v28 }
  0x99   : > { %605 = vst.msk [vmem:[%s1147_s17] sm:$0xf] %vm604_vm2, %v572_v29 }
  0x9a   : > { %613 = vst.msk [vmem:[%s1147_s17 + $0x20] sm:$0xf] %vm604_vm2, %v580_v30 }
  0x9c   : > { %v494_v31 = vpop.f32.mrf.mxu0  ;;  %v532_v34 = vpop.f32.mrf.mxu2 }
  0x9d   : > { %v1161_v32 = vadd.f32 %v1138_v4, %v494_v31  ;;  %v514_v33 = vpop.f32.mrf.mxu1  ;;  %v1167_v36 = vadd.f32 %v1138_v4, %v532_v34  ;;  %v638_v34 = vsel %vm637_vm3, %v1142_v5, 0.0 }
  0x9e   : > { %v1164_v35 = vadd.f32 %v1138_v4, %v514_v33 }
  0x9f   : > { %v573_v37 = vpack.c.bf16 %v1161_v32, %v1161_v32  ;;  %v588_v39 = vpack.c.bf16 %v1167_v36, %v1167_v36  ;;  %v708_v15 = vmul.f32 %v1161_v32, %v1161_v32  ;;  %v639_v26 = vsel %vm637_vm3, %v1161_v32, 0.0 }
  0xa0   : > { %v581_v38 = vpack.c.bf16 %v1164_v35, %v1164_v35  ;;  %v739_v32 = vsel %vm637_vm3, %v707_v22, 0.0 }
  0xa1   : > { %606 = vst.msk [vmem:[%s1147_s17 + $0x4] sm:$0xf] %vm604_vm2, %v573_v37  ;;  %v552_v46 = vpop.f32.mrf.mxu3  ;;  %v740_v27 = vsel %vm637_vm3, %v708_v15, 0.0 }
  0xa2   : > { %614 = vst.msk [vmem:[%s1147_s17 + $0x24] sm:$0xf] %vm604_vm2, %v581_v38  ;;  %v1193_v48 = vadd.f32 %v1138_v4, %v552_v46  ;;  %v640_v38 = vadd.f32 %v639_v26, %v638_v34 }
  0xa3   : > { %621 = vst.msk [vmem:[%s1147_s17 + $0x40] sm:$0xf] %vm604_vm2, %v588_v39  ;;  %v741_v39 = vadd.f32 %v740_v27, %v739_v32 }
  0xa4   : > { %v497_v40 = vpop.f32.mrf.mxu0  ;;  %v534_v43 = vpop.f32.mrf.mxu2  ;;  %v596_v51 = vpack.c.bf16 %v1193_v48, %v1193_v48 }
  0xa5   : > { %v1182_v41 = vadd.f32 %v1138_v4, %v497_v40  ;;  %v517_v42 = vpop.f32.mrf.mxu1  ;;  %v1188_v45 = vadd.f32 %v1138_v4, %v534_v43 }
  0xa6   : > { %v1185_v44 = vadd.f32 %v1138_v4, %v517_v42  ;;  %629 = vst.msk [vmem:[%s1147_s17 + $0x60] sm:$0xf] %vm604_vm2, %v596_v51 }
  0xa7   : > { %v574_v47 = vpack.c.bf16 %v1182_v41, %v1182_v41  ;;  %v589_v50 = vpack.c.bf16 %v1188_v45, %v1188_v45  ;;  %v709_v29 = vmul.f32 %v1182_v41, %v1182_v41  ;;  %v641_v37 = vsel %vm637_vm3, %v1182_v41, 0.0 }
  0xa8   : > { %v582_v49 = vpack.c.bf16 %v1185_v44, %v1185_v44 }
  0xa9   : > { %607 = vst.msk [vmem:[%s1147_s17 + $0x8] sm:$0xf] %vm604_vm2, %v574_v47  ;;  %v554_v58 = vpop.f32.mrf.mxu3  ;;  %v742_v42 = vsel %vm637_vm3, %v709_v29, 0.0 }
  0xaa   : > { %615 = vst.msk [vmem:[%s1147_s17 + $0x28] sm:$0xf] %vm604_vm2, %v582_v49  ;;  %v1217_v60 = vadd.f32 %v1138_v4, %v554_v58 }
  0xab   : > { %622 = vst.msk [vmem:[%s1147_s17 + $0x44] sm:$0xf] %vm604_vm2, %v589_v50  ;;  %v642_v50 = vadd.f32 %v641_v37, %v640_v38 }
  0xac   : > { %v499_v52 = vpop.f32.mrf.mxu0  ;;  %v537_v55 = vpop.f32.mrf.mxu2  ;;  %v597_v63 = vpack.c.bf16 %v1217_v60, %v1217_v60 }
  0xad   : > { %v500_v53 = vadd.f32 %v1138_v4, %v499_v52  ;;  %v519_v54 = vpop.f32.mrf.mxu1  ;;  %v1214_v57 = vadd.f32 %v1138_v4, %v537_v55 }
  0xae   : > { %v1211_v56 = vadd.f32 %v1138_v4, %v519_v54  ;;  %630 = vst.msk [vmem:[%s1147_s17 + $0x64] sm:$0xf] %vm604_vm2, %v597_v63 }
  0xaf   : > { %v575_v59 = vpack.c.bf16 %v500_v53, %v500_v53  ;;  %v590_v62 = vpack.c.bf16 %v1214_v57, %v1214_v57  ;;  %v710_v31 = vmul.f32 %v500_v53, %v500_v53  ;;  %v643_v43 = vsel %vm637_vm3, %v500_v53, 0.0 }
  0xb0   : > { %v583_v61 = vpack.c.bf16 %v1211_v56, %v1211_v56 }
  0xb1   : > { %608 = vst.msk [vmem:[%s1147_s17 + $0xc] sm:$0xf] %vm604_vm2, %v575_v59  ;;  %v557_v8 = vpop.f32.mrf.mxu3  ;;  %v744_v41 = vsel %vm637_vm3, %v710_v31, 0.0 }
  0xb2   : > { %616 = vst.msk [vmem:[%s1147_s17 + $0x2c] sm:$0xf] %vm604_vm2, %v583_v61  ;;  %v1241_v10 = vadd.f32 %v1138_v4, %v557_v8  ;;  %v743_v61 = vadd.f32 %v742_v42, %v741_v39  ;;  %v716_v42 = vmul.f32 %v1164_v35, %v1164_v35 }
  0xb3   : > { %623 = vst.msk [vmem:[%s1147_s17 + $0x48] sm:$0xf] %vm604_vm2, %v590_v62  ;;  %v644_v62 = vadd.f32 %v643_v43, %v642_v50 }
  0xb4   : > { %v502_v0 = vpop.f32.mrf.mxu0  ;;  %v539_v3 = vpop.f32.mrf.mxu2  ;;  %v598_v13 = vpack.c.bf16 %v1241_v10, %v1241_v10  ;;  %v745_v8 = vadd.f32 %v744_v41, %v743_v61  ;;  %v717_v41 = vmul.f32 %v1185_v44, %v1185_v44  ;;  %v718_v61 = vmul.f32 %v1211_v56, %v1211_v56 }
  0xb5   : > { %v503_v1 = vadd.f32 %v1138_v4, %v502_v0  ;;  %v522_v2 = vpop.f32.mrf.mxu1  ;;  %v1238_v7 = vadd.f32 %v1138_v4, %v539_v3 }
  0xb6   : > { %v1235_v6 = vadd.f32 %v1138_v4, %v522_v2  ;;  %631 = vst.msk [vmem:[%s1147_s17 + $0x68] sm:$0xf] %vm604_vm2, %v598_v13 }
  0xb7   : > { %v576_v9 = vpack.c.bf16 %v503_v1, %v503_v1  ;;  %v591_v12 = vpack.c.bf16 %v1238_v7, %v1238_v7  ;;  %v711_v46 = vmul.f32 %v503_v1, %v503_v1  ;;  %v645_v55 = vsel %vm637_vm3, %v503_v1, 0.0 }
  0xb8   : > { %v584_v11 = vpack.c.bf16 %v1235_v6, %v1235_v6 }
  0xb9   : > { %609 = vst.msk [vmem:[%s1147_s17 + $0x10] sm:$0xf] %vm604_vm2, %v576_v9  ;;  %v559_v21 = vpop.f32.mrf.mxu3  ;;  %v746_v0 = vsel %vm637_vm3, %v711_v46, 0.0  ;;  %v646_v9 = vadd.f32 %v645_v55, %v644_v62 }
  0xba   : > { %617 = vst.msk [vmem:[%s1147_s17 + $0x30] sm:$0xf] %vm604_vm2, %v584_v11  ;;  %v1269_v24 = vadd.f32 %v1138_v4, %v559_v21 }
  0xbb   : > { %624 = vst.msk [vmem:[%s1147_s17 + $0x4c] sm:$0xf] %vm604_vm2, %v591_v12 }
  0xbc   : > { %v504_v14 = vpop.f32.mrf.mxu0  ;;  %v542_v18 = vpop.f32.mrf.mxu2  ;;  %v599_v33 = vpack.c.bf16 %v1269_v24, %v1269_v24 }
  0xbd   : > { %v505_v16 = vadd.f32 %v1138_v4, %v504_v14  ;;  %v524_v17 = vpop.f32.mrf.mxu1  ;;  %v1264_v20 = vadd.f32 %v1138_v4, %v542_v18  ;;  %v747_v14 = vadd.f32 %v746_v0, %v745_v8 }
  0xbe   : > { %v1261_v19 = vadd.f32 %v1138_v4, %v524_v17  ;;  %632 = vst.msk [vmem:[%s1147_s17 + $0x6c] sm:$0xf] %vm604_vm2, %v599_v33  ;;  %v715_v17 = vmul.f32 %v1150_v28, %v1150_v28 }
  0xbf   : > { %v577_v23 = vpack.c.bf16 %v505_v16, %v505_v16  ;;  %v592_v30 = vpack.c.bf16 %v1264_v20, %v1264_v20  ;;  %v712_v53 = vmul.f32 %v505_v16, %v505_v16  ;;  %v647_v2 = vsel %vm637_vm3, %v505_v16, 0.0 }
  0xc0   : > { %v585_v25 = vpack.c.bf16 %v1261_v19, %v1261_v19  ;;  %v648_v15 = vadd.f32 %v647_v2, %v646_v9  ;;  %v754_v50 = vsel %vm637_vm3, %v715_v17, 0.0 }
  0xc1   : > { %610 = vst.msk [vmem:[%s1147_s17 + $0x14] sm:$0xf] %vm604_vm2, %v577_v23  ;;  %v562_v54 = vpop.f32.mrf.mxu3  ;;  %v748_v12 = vsel %vm637_vm3, %v712_v53, 0.0  ;;  %v756_v53 = vsel %vm637_vm3, %v716_v42, 0.0 }
  0xc2   : > { %618 = vst.msk [vmem:[%s1147_s17 + $0x34] sm:$0xf] %vm604_vm2, %v585_v25  ;;  %v1307_v59 = vadd.f32 %v1138_v4, %v562_v54  ;;  %v749_v25 = vadd.f32 %v748_v12, %v747_v14  ;;  %v661_v14 = vsel %vm637_vm3, %v1235_v6, 0.0 }
  0xc3   : > { %625 = vst.msk [vmem:[%s1147_s17 + $0x50] sm:$0xf] %vm604_vm2, %v592_v30 }
  0xc4   : > { %v507_v40 = vpop.f32.mrf.mxu0  ;;  %v544_v49 = vpop.f32.mrf.mxu2  ;;  %v600_v11 = vpack.c.bf16 %v1307_v59, %v1307_v59 }
  0xc5   : > { %v508_v47 = vadd.f32 %v1138_v4, %v507_v40  ;;  %v527_v5 = vpop.f32.mrf.mxu1  ;;  %v1303_v52 = vadd.f32 %v1138_v4, %v544_v49  ;;  %v653_v40 = vsel %vm637_vm3, %v1150_v28, 0.0  ;;  %v655_v28 = vsel %vm637_vm3, %v1164_v35, 0.0 }
  0xc6   : > { %v1300_v51 = vadd.f32 %v1138_v4, %v527_v5  ;;  %633 = vst.msk [vmem:[%s1147_s17 + $0x70] sm:$0xf] %vm604_vm2, %v600_v11 }
  0xc7   : > { %v578_v58 = vpack.c.bf16 %v508_v47, %v508_v47  ;;  %v713_v3 = vmul.f32 %v508_v47, %v508_v47  ;;  %v593_v1 = vpack.c.bf16 %v1303_v52, %v1303_v52  ;;  %v649_v13 = vsel %vm637_vm3, %v508_v47, 0.0 }
  0xc8   : > { %v586_v63 = vpack.c.bf16 %v1300_v51, %v1300_v51  ;;  %v650_v26 = vadd.f32 %v649_v13, %v648_v15  ;;  %v760_v13 = vsel %vm637_vm3, %v718_v61, 0.0 }
  0xc9   : > { %611 = vst.msk [vmem:[%s1147_s17 + $0x18] sm:$0xf] %vm604_vm2, %v578_v58  ;;  %v750_v18 = vsel %vm637_vm3, %v713_v3, 0.0  ;;  %v564_v30 = vpop.f32.mrf.mxu3  ;;  %v657_v58 = vsel %vm637_vm3, %v1185_v44, 0.0  ;;  %v758_v3 = vsel %vm637_vm3, %v717_v41, 0.0  ;;  %v719_v44 = vmul.f32 %v1235_v6, %v1235_v6 }
  0xca   : > { %619 = vst.msk [vmem:[%s1147_s17 + $0x38] sm:$0xf] %vm604_vm2, %v586_v63  ;;  %v1337_v32 = vadd.f32 %v1138_v4, %v564_v30  ;;  %v751_v37 = vadd.f32 %v750_v18, %v749_v25 }
  0xcb   : > { %626 = vst.msk [vmem:[%s1147_s17 + $0x54] sm:$0xf] %vm604_vm2, %v593_v1  ;;  %v659_v1 = vsel %vm637_vm3, %v1211_v56, 0.0  ;;  %v720_v56 = vmul.f32 %v1261_v19, %v1261_v19  ;;  %v762_v18 = vsel %vm637_vm3, %v719_v44, 0.0 }
  0xcc   : > { %v509_v16 = vpop.f32.mrf.mxu0  ;;  %v547_v23 = vpop.f32.mrf.mxu2  ;;  %v601_v49 = vpack.c.bf16 %v1337_v32, %v1337_v32 }
  0xcd   : > { %v510_v21 = vadd.f32 %v1138_v4, %v509_v16  ;;  %v529_v22 = vpop.f32.mrf.mxu1  ;;  %v1333_v29 = vadd.f32 %v1138_v4, %v547_v23  ;;  %v764_v25 = vsel %vm637_vm3, %v720_v56, 0.0 }
  0xce   : > { %v530_v27 = vadd.f32 %v1138_v4, %v529_v22  ;;  %634 = vst.msk [vmem:[%s1147_s17 + $0x74] sm:$0xf] %vm604_vm2, %v601_v49  ;;  %v721_v22 = vmul.f32 %v1300_v51, %v1300_v51 }
  0xcf   : > { %v579_v31 = vpack.c.bf16 %v510_v21, %v510_v21  ;;  %v651_v33 = vsel %vm637_vm3, %v510_v21, 0.0  ;;  %v714_v34 = vmul.f32 %v510_v21, %v510_v21  ;;  %v594_v46 = vpack.c.bf16 %v1333_v29, %v1333_v29 }
  0xd0   : > { %v652_v38 = vadd.f32 %v651_v33, %v650_v26  ;;  %v587_v39 = vpack.c.bf16 %v530_v27, %v530_v27  ;;  %v663_v21 = vsel %vm637_vm3, %v1261_v19, 0.0  ;;  %v665_v26 = vsel %vm637_vm3, %v1300_v51, 0.0 }
  0xd1   : > { %612 = vst.msk [vmem:[%s1147_s17 + $0x1c] sm:$0xf] %vm604_vm2, %v579_v31  ;;  %v752_v43 = vsel %vm637_vm3, %v714_v34, 0.0  ;;  %v567_v2 = vpop.f32.mrf.mxu3  ;;  %v722_v30 = vmul.f32 %v530_v27, %v530_v27  ;;  %v723_v19 = vmul.f32 %v1167_v36, %v1167_v36  ;;  %v669_v51 = vsel %vm637_vm3, %v1167_v36, 0.0 }
  0xd2   : > { %v654_v47 = vadd.f32 %v653_v40, %v652_v38  ;;  %v753_v5 = vadd.f32 %v752_v43, %v751_v37  ;;  %620 = vst.msk [vmem:[%s1147_s17 + $0x3c] sm:$0xf] %vm604_vm2, %v587_v39  ;;  %v1375_v8 = vadd.f32 %v1138_v4, %v567_v2  ;;  %v766_v37 = vsel %vm637_vm3, %v721_v22, 0.0 }
  0xd3   : > { %627 = vst.msk [vmem:[%s1147_s17 + $0x58] sm:$0xf] %vm604_vm2, %v594_v46  ;;  %v667_v38 = vsel %vm637_vm3, %v530_v27, 0.0  ;;  %v724_v43 = vmul.f32 %v1188_v45, %v1188_v45  ;;  %v768_v46 = vsel %vm637_vm3, %v722_v30, 0.0  ;;  %v770_v27 = vsel %vm637_vm3, %v723_v19, 0.0 }
  0xd4   : > { %v656_v54 = vadd.f32 %v655_v28, %v654_v47  ;;  %v755_v55 = vadd.f32 %v754_v50, %v753_v5  ;;  %v549_v62 = vpop.f32.mrf.mxu2  ;;  %v602_v15 = vpack.c.bf16 %v1375_v8, %v1375_v8  ;;  %v725_v50 = vmul.f32 %v1214_v57, %v1214_v57 }
  0xd5   : > { %v1367_v0 = vadd.f32 %v1138_v4, %v549_v62  ;;  %v772_v41 = vsel %vm637_vm3, %v724_v43, 0.0  ;;  %v727_v62 = vmul.f32 %v1264_v20, %v1264_v20 }
  0xd6   : > { %v658_v63 = vadd.f32 %v657_v58, %v656_v54  ;;  %v757_v35 = vadd.f32 %v756_v53, %v755_v55  ;;  %635 = vst.msk [vmem:[%s1147_s17 + $0x78] sm:$0xf] %vm604_vm2, %v602_v15  ;;  %v673_v54 = vsel %vm637_vm3, %v1214_v57, 0.0  ;;  %v726_v55 = vmul.f32 %v1238_v7, %v1238_v7 }
  0xd7   : > { %v595_v12 = vpack.c.bf16 %v1367_v0, %v1367_v0  ;;  %v774_v61 = vsel %vm637_vm3, %v725_v50, 0.0  ;;  %v677_v57 = vsel %vm637_vm3, %v1264_v20, 0.0  ;;  %v681_v20 = vsel %vm637_vm3, %v1333_v29, 0.0 }
  0xd8   : > { %v759_v9 = vadd.f32 %v758_v3, %v757_v35  ;;  %v660_v11 = vadd.f32 %v659_v1, %v658_v63  ;;  %v776_v2 = vsel %vm637_vm3, %v726_v55, 0.0  ;;  %v728_v3 = vmul.f32 %v1303_v52, %v1303_v52 }
  0xd9   : > { %628 = vst.msk [vmem:[%s1147_s17 + $0x5c] sm:$0xf] %vm604_vm2, %v595_v12  ;;  %v569_v34 = vpop.f32.mrf.mxu3  ;;  %v730_v56 = vmul.f32 %v1367_v0, %v1367_v0  ;;  %v737_v50 = vmul.f32 %v1375_v8, %v1375_v8 }
  0xda   : > { %v662_v16 = vadd.f32 %v661_v14, %v660_v11  ;;  %v761_v17 = vadd.f32 %v760_v13, %v759_v9  ;;  %v1403_v39 = vadd.f32 %v1138_v4, %v569_v34  ;;  %v671_v4 = vsel %vm637_vm3, %v1188_v45, 0.0 }
  0xdb   : > { %v675_v45 = vsel %vm637_vm3, %v1238_v7, 0.0  ;;  %v778_v9 = vsel %vm637_vm3, %v727_v62, 0.0  ;;  %v679_v7 = vsel %vm637_vm3, %v1303_v52, 0.0  ;;  %v729_v11 = vmul.f32 %v1333_v29, %v1333_v29 }
  0xdc   : > { %v664_v6 = vadd.f32 %v663_v21, %v662_v16  ;;  %v763_v23 = vadd.f32 %v762_v18, %v761_v17  ;;  %v603_v47 = vpack.c.bf16 %v1403_v39, %v1403_v39  ;;  %v780_v14 = vsel %vm637_vm3, %v728_v3, 0.0 }
  0xdd   : > { %v731_v17 = vmul.f32 %v1193_v48, %v1193_v48  ;;  %v782_v52 = vsel %vm637_vm3, %v729_v11, 0.0  ;;  %v683_v18 = vsel %vm637_vm3, %v1367_v0, 0.0  ;;  %v732_v29 = vmul.f32 %v1217_v60, %v1217_v60 }
  0xde   : > { %v666_v31 = vadd.f32 %v665_v26, %v664_v6  ;;  %v765_v33 = vadd.f32 %v764_v25, %v763_v23  ;;  %636 = vst.msk [vmem:[%s1147_s17 + $0x7c] sm:$0xf] %vm604_vm2, %v603_v47  ;;  %v685_v6 = vsel %vm637_vm3, %v1193_v48, 0.0  ;;  %v784_v23 = vsel %vm637_vm3, %v730_v56, 0.0 }
  0xdf   : > { %v786_v30 = vsel %vm637_vm3, %v731_v17, 0.0  ;;  %v733_v0 = vmul.f32 %v1241_v10, %v1241_v10  ;;  %v788_v19 = vsel %vm637_vm3, %v732_v29, 0.0  ;;  %v689_v48 = vsel %vm637_vm3, %v1241_v10, 0.0 }
  0xe0   : > { %v767_v40 = vadd.f32 %v766_v37, %v765_v33  ;;  %v668_v42 = vadd.f32 %v667_v38, %v666_v31  ;;  %v687_v31 = vsel %vm637_vm3, %v1217_v60, 0.0  ;;  %v734_v37 = vmul.f32 %v1269_v24, %v1269_v24 }
  0xe1   : > { %v691_v60 = vsel %vm637_vm3, %v1269_v24, 0.0  ;;  %v693_v10 = vsel %vm637_vm3, %v1307_v59, 0.0  ;;  %v695_v24 = vsel %vm637_vm3, %v1337_v32, 0.0 }
  0xe2   : > { %v670_v5 = vadd.f32 %v669_v51, %v668_v42  ;;  %v769_v49 = vadd.f32 %v768_v46, %v767_v40  ;;  %v790_v42 = vsel %vm637_vm3, %v733_v0, 0.0  ;;  %v735_v51 = vmul.f32 %v1307_v59, %v1307_v59 }
  0xe3   : > { %v792_v47 = vsel %vm637_vm3, %v734_v37, 0.0  ;;  %v697_v59 = vsel %vm637_vm3, %v1375_v8, 0.0 }
  0xe4   : > { %v672_v36 = vadd.f32 %v671_v4, %v670_v5  ;;  %v771_v28 = vadd.f32 %v770_v27, %v769_v49  ;;  %v736_v5 = vmul.f32 %v1337_v32, %v1337_v32  ;;  %v794_v4 = vsel %vm637_vm3, %v735_v51, 0.0 }
  0xe5   : > { %v699_v32 = vsel %vm637_vm3, %v1403_v39, 0.0 }
  0xe6   : > { %v773_v53 = vadd.f32 %v772_v41, %v771_v28  ;;  %v674_v58 = vadd.f32 %v673_v54, %v672_v36  ;;  %v796_v41 = vsel %vm637_vm3, %v736_v5, 0.0  ;;  %v738_v54 = vmul.f32 %v1403_v39, %v1403_v39 }
  0xe8   : > { %v676_v63 = vadd.f32 %v675_v45, %v674_v58  ;;  %v775_v35 = vadd.f32 %v774_v61, %v773_v53  ;;  %v798_v58 = vsel %vm637_vm3, %v737_v50, 0.0  ;;  %v800_v62 = vsel %vm637_vm3, %v738_v54, 0.0 }
  0xea   : > { %v678_v1 = vadd.f32 %v677_v57, %v676_v63  ;;  %v777_v44 = vadd.f32 %v776_v2, %v775_v35 }
  0xec   : > { %v680_v12 = vadd.f32 %v679_v7, %v678_v1  ;;  %v779_v13 = vadd.f32 %v778_v9, %v777_v44 }
  0xee   : > { %v781_v15 = vadd.f32 %v780_v14, %v779_v13  ;;  %v682_v16 = vadd.f32 %v681_v20, %v680_v12 }
  0xf0   : > { %v783_v21 = vadd.f32 %v782_v52, %v781_v15  ;;  %v684_v22 = vadd.f32 %v683_v18, %v682_v16 }
  0xf2   : > { %v686_v25 = vadd.f32 %v685_v6, %v684_v22  ;;  %v785_v26 = vadd.f32 %v784_v23, %v783_v21 }
  0xf4   : > { %v688_v33 = vadd.f32 %v687_v31, %v686_v25  ;;  %v787_v34 = vadd.f32 %v786_v30, %v785_v26 }
  0xf6   : > { %v789_v38 = vadd.f32 %v788_v19, %v787_v34  ;;  %v690_v40 = vadd.f32 %v689_v48, %v688_v33 }
  0xf8   : > { %v692_v43 = vadd.f32 %v691_v60, %v690_v40  ;;  %v791_v46 = vadd.f32 %v790_v42, %v789_v38 }
  0xfa   : > { %v694_v49 = vadd.f32 %v693_v10, %v692_v43  ;;  %v793_v27 = vadd.f32 %v792_v47, %v791_v46 }
  0xfc   : > { %v696_v36 = vadd.f32 %v695_v24, %v694_v49  ;;  %v795_v28 = vadd.f32 %v794_v4, %v793_v27 }
  0xfe   : > { %v797_v55 = vadd.f32 %v796_v41, %v795_v28  ;;  %v698_v53 = vadd.f32 %v697_v59, %v696_v36 }
 0x100   : > { %v799_v61 = vadd.f32 %v798_v58, %v797_v55  ;;  %v700_v45 = vadd.f32 %v699_v32, %v698_v53 }
 0x102   : > { %v701_v63 = vrot.slane %v700_v45, 4  ;;  %v801_v35 = vadd.f32 %v800_v62, %v799_v61 }
 0x104   : > { %v702_v2 = vadd.f32 %v701_v63, %v700_v45  ;;  %v802_v8 = vrot.slane %v801_v35, 4 }
 0x106   : > { %v703_v57 = vrot.slane %v702_v2, 2  ;;  %v803_v3 = vadd.f32 %v802_v8, %v801_v35 }
 0x108   : > { %v704_v1 = vadd.f32 %v703_v57, %v702_v2  ;;  %v804_v44 = vrot.slane %v803_v3, 2 }
 0x10a   : > { %v705_v9 = vrot.slane %v704_v1, 1  ;;  %v805_v7 = vadd.f32 %v804_v44, %v803_v3 }
 0x10c   : > { %v706_v39 = vadd.f32 %v705_v9, %v704_v1  ;;  %v806_v11 = vrot.slane %v805_v7, 1 }
 0x10e   : > { %v807_v12 = vadd.f32 %v806_v11, %v805_v7  ;;  %809 = vst.msk [vmem:[%s265_s23] sm:$0x1] %vm808_vm4, %v706_v39 }
 0x110   : > { %810 = vst.msk [vmem:[%s265_s23 + $0x1] sm:$0x1] %vm808_vm4, %v807_v12 }
 0x111 PF: > { %s17_s21 = sadd.s32 1, %s951_s21  }
 0x112   : > { %p14_p5 = scmp.ge.s32.totalorder %s17_s21, 4  }
 0x114   :  { %16 = sbr.rel (!%p14_p5) target bundleno = 1 (0x1), region = 82 }

// kernel: dense_block_forward.7
= control target key start
LH: loop header
LB: loop body
LE: loop exit
PB: predicated region body
PF: predicated region fallthrough
CT: control target
= control target key end

     0   :  { %s3338_s18 = smov 0   ;;  %s4344_s0 = inlined_call_operand.vmem [shape: bf16[2,16,16,64], index: 0, kind: input, shape index: {}]   ;;  %s4345_s1 = inlined_call_operand.vmem [shape: f32[1,64], index: 1, kind: input, shape index: {}]   ;;  %s4346_s2 = inlined_call_operand.vmem [shape: f32[1,64], index: 2, kind: input, shape index: {}]   ;;  %s4347_s3 = inlined_call_operand.vmem [shape: bf16[9,64,8], index: 3, kind: input, shape index: {}]   ;;  %s4348_s4 = inlined_call_operand.vmem [shape: f32[1,8], index: 4, kind: input, shape index: {}]   ;;  %s4349_s5 = inlined_call_operand.vmem [shape: f32[2,16,16,8], index: 5, kind: output, shape index: {}]  }
   0x1 LB: > { %s2793_s19 = sadd.s32 4294967295, %s3305_s18   ;;  %p2797_p0 = scmp.ge.s32.totalorder %s3305_s18, 1  ;;  %s3305_s18 = sphi %s3338_s18, %s15_s18  }
   0x2   : > { %p187_p1 = scmp.lt.s32.totalorder %s3305_s18, 3 }
   0x4   : > { %p188_p2 = pnand %p2797_p0, %p187_p1 }
   0x6   : > { %191 = sbr.rel (%p188_p2) target bundleno = 786 (0x312), region = 40 }
   0xb   : > { %v3161_v0 = vld [vmem:[%s4347_s3 + $0x18] sm:$0xff]  ;;  %p215_p3 = scmp.lt.s32.totalorder %s2793_s19, 1  ;;  %vm362_vm0 = vcmask 523264   ;;  %vm365_vm1 = vcmask 517120   ;;  %v3160_v1 = vld [vmem:[%s4347_s3 + $0x10] sm:$0xff]  ;;  %v3307_v2 = vmov 0.0  }
   0xc   : > { %3273 = vmatpush.bf16.msra.mxu1 %v3161_v0  ;;  %3274 = vmatpush.bf16.msra.mxu2 %v3161_v0  ;;  %376 = vst.msk [vmem:[#allocation2 + $0x60] sm:$0xff] %vm362_vm0, %v3307_v2  ;;  %v3369_v3 = vld [vmem:[%s4345_s1] ss:$0 sm:$0xff]  ;;  %v3159_v4 = vld [vmem:[%s4347_s3 + $0x8] sm:$0xff]  ;;  %v3169_v19 = vld [vmem:[%s4347_s3 + $0x58] sm:$0xff]  ;;  %vm2705_vm2 = vcmask 64512  }
   0xd   : > { %s4397_s19 = smov (!%p215_p3, %s2793_s19), 1  ;;  %3275 = vmatpush.bf16.msra.mxu3 %v3161_v0  ;;  %587 = vmatpush.bf16.msra.mxu0 %v3161_v0  ;;  %377 = vst.msk [vmem:[#allocation2 + $0x68] sm:$0xff] %vm362_vm0, %v3307_v2  ;;  %v3382_v8 = vld [vmem:[%s4346_s2] ss:$0 sm:$0xff]  ;;  %v3173_v21 = vld [vmem:[%s4347_s3 + $0x78] sm:$0xff]  ;;  %v3168_v49 = vld [vmem:[%s4347_s3 + $0x50] sm:$0xff] }
   0xe   : > { %s3156_s24 = sshll.u32 %s4397_s19, 7  ;;  %378 = vst.msk [vmem:[#allocation2 + $0x70] sm:$0x3] %vm365_vm1, %v3307_v2  ;;  %v3158_v11 = vld [vmem:[%s4347_s3] sm:$0xff]  ;;  %v3165_v22 = vld [vmem:[%s4347_s3 + $0x38] sm:$0xff]  ;;  %v3172_v50 = vld [vmem:[%s4347_s3 + $0x70] sm:$0xff] }
   0xf   : > { %s3364_s27 = scalar_lea.vmem %s4344_s0, %s3156_s24  ;;  %363 = vst.msk [vmem:[#allocation2] sm:$0xff] %vm362_vm0, %v3307_v2  ;;  %v3177_v23 = vld [vmem:[%s4347_s3 + $0x98] sm:$0xff]  ;;  %v3164_v51 = vld [vmem:[%s4347_s3 + $0x30] sm:$0xff]  ;;  %s3157_s14 = sshll.u32 %s4397_s19, 8 }
  0x10   : > { %3276 = vmatpush.bf16.msra.mxu1 %v3160_v1  ;;  %3277 = vmatpush.bf16.msra.mxu2 %v3160_v1  ;;  %v3260_v5 = vld [vmem:[%s3364_s27 + $0x18] sm:$0xff]   ;;  %364 = vst.msk [vmem:[#allocation2 + $0x8] sm:$0xff] %vm362_vm0, %v3307_v2  ;;  %v3261_v28 = vld [vmem:[%s3364_s27 + $0x20] sm:$0xff]   ;;  %v3262_v45 = vld [vmem:[%s3364_s27 + $0x28] sm:$0xff]   ;;  %s4197_s17 = scalar_lea.vmem %s4349_s5, %s3157_s14 }
  0x11   : > { %3278 = vmatpush.bf16.msra.mxu3 %v3160_v1  ;;  %588 = vmatpush.bf16.msra.mxu0 %v3160_v1  ;;  %v3208_v6 = vunpack.c.l.bf16 %v3260_v5  ;;  %v3209_v7 = vunpack.c.h.bf16 %v3260_v5  ;;  %366 = vst.msk [vmem:[#allocation2 + $0x10] sm:$0x3] %vm365_vm1, %v3307_v2  ;;  %v3264_v24 = vld [vmem:[%s3364_s27 + $0x38] sm:$0xff]   ;;  %v3265_v31 = vld [vmem:[%s3364_s27 + $0x40] sm:$0xff]   ;;  %v3212_v33 = vunpack.c.l.bf16 %v3261_v28  ;;  %v3213_v35 = vunpack.c.h.bf16 %v3261_v28  ;;  %v3176_v55 = vld [vmem:[%s4347_s3 + $0x90] sm:$0xff] }
  0x12   : > { %367 = vst.msk [vmem:[#allocation2 + $0x18] sm:$0xff] %vm362_vm0, %v3307_v2  ;;  %v3268_v25 = vld [vmem:[%s3364_s27 + $0x58] sm:$0xff]   ;;  %v3224_v26 = vunpack.c.l.bf16 %v3264_v24  ;;  %v3225_v27 = vunpack.c.h.bf16 %v3264_v24  ;;  %v3269_v36 = vld [vmem:[%s3364_s27 + $0x60] sm:$0xff]   ;;  %v3228_v38 = vunpack.c.l.bf16 %v3265_v31  ;;  %v3229_v40 = vunpack.c.h.bf16 %v3265_v31  ;;  %v3266_v59 = vld [vmem:[%s3364_s27 + $0x48] sm:$0xff]  }
  0x13   : > { %v301_v9 = vmul.f32 %v3369_v3, %v3208_v6  ;;  %v302_v10 = vmul.f32 %v3369_v3, %v3209_v7  ;;  %368 = vst.msk [vmem:[#allocation2 + $0x20] sm:$0xff] %vm362_vm0, %v3307_v2  ;;  %v3240_v29 = vunpack.c.l.bf16 %v3268_v25  ;;  %v3241_v30 = vunpack.c.h.bf16 %v3268_v25  ;;  %v3195_v41 = vld [vmem:[%s3364_s27] sm:$0xff]  }
  0x14   : > { %3279 = vmatpush.bf16.msra.mxu1 %v3159_v4  ;;  %3280 = vmatpush.bf16.msra.mxu2 %v3159_v4  ;;  %369 = vst.msk [vmem:[#allocation2 + $0x28] sm:$0x3] %vm365_vm1, %v3307_v2  ;;  %v309_v32 = vmul.f32 %v3369_v3, %v3224_v26  ;;  %v310_v34 = vmul.f32 %v3369_v3, %v3225_v27  ;;  %v3244_v44 = vunpack.c.l.bf16 %v3269_v36  ;;  %v3245_v48 = vunpack.c.h.bf16 %v3269_v36 }
  0x15   : > { %3281 = vmatpush.bf16.msra.mxu3 %v3159_v4  ;;  %589 = vmatpush.bf16.msra.mxu0 %v3159_v4  ;;  %v336_v12 = vadd.f32 %v3382_v8, %v301_v9  ;;  %v337_v13 = vadd.f32 %v3382_v8, %v302_v10  ;;  %370 = vst.msk [vmem:[#allocation2 + $0x30] sm:$0xff] %vm362_vm0, %v3307_v2  ;;  %v3196_v54 = vunpack.c.l.bf16 %v3195_v41  ;;  %v3197_v58 = vunpack.c.h.bf16 %v3195_v41 }
  0x16   : > { %371 = vst.msk [vmem:[#allocation2 + $0x38] sm:$0xff] %vm362_vm0, %v3307_v2  ;;  %v455_v17 = vld [vmem:[#allocation2] sm:$0xff]  ;;  %v317_v37 = vmul.f32 %v3369_v3, %v3240_v29  ;;  %v318_v39 = vmul.f32 %v3369_v3, %v3241_v30  ;;  %v344_v42 = vadd.f32 %v3382_v8, %v309_v32  ;;  %v303_v43 = vmul.f32 %v3369_v3, %v3212_v33 }
  0x17   : > { %425 = vst.msk [vmem:[#allocation2 + $0x61] sm:$0xff] %vm362_vm0, %v336_v12  ;;  %v456_v18 = vld [vmem:[#allocation2 + $0x8] sm:$0xff]  ;;  %v345_v46 = vadd.f32 %v3382_v8, %v310_v34  ;;  %v304_v47 = vmul.f32 %v3369_v3, %v3213_v35  ;;  %v311_v53 = vmul.f32 %v3369_v3, %v3228_v38  ;;  %v312_v57 = vmul.f32 %v3369_v3, %v3229_v40 }
  0x18   : > { %3282 = vmatpush.bf16.msra.mxu1 %v3158_v11  ;;  %3283 = vmatpush.bf16.msra.mxu2 %v3158_v11  ;;  %426 = vst.msk [vmem:[#allocation2 + $0x69] sm:$0xff] %vm362_vm0, %v337_v13  ;;  %v487_v20 = vpack.c.bf16 %v456_v18, %v455_v17  ;;  %v352_v52 = vadd.f32 %v3382_v8, %v317_v37  ;;  %v3216_v62 = vunpack.c.l.bf16 %v3262_v45  ;;  %v3217_v1 = vunpack.c.h.bf16 %v3262_v45 }
  0x19   : > { %3284 = vmatpush.bf16.msra.mxu3 %v3158_v11  ;;  %590 = vmatpush.bf16.msra.mxu0 %v3158_v11  ;;  %372 = vst.msk [vmem:[#allocation2 + $0x40] sm:$0x3] %vm365_vm1, %v3307_v2  ;;  %v353_v56 = vadd.f32 %v3382_v8, %v318_v39  ;;  %v338_v60 = vadd.f32 %v3382_v8, %v303_v43  ;;  %v3232_v6 = vunpack.c.l.bf16 %v3266_v59  ;;  %v3233_v10 = vunpack.c.h.bf16 %v3266_v59  ;;  %v3258_v11 = vld [vmem:[%s3364_s27 + $0x8] sm:$0xff]   ;;  %v3263_v43 = vld [vmem:[%s3364_s27 + $0x30] sm:$0xff]  }
  0x1a   : > { %373 = vst.msk [vmem:[#allocation2 + $0x48] sm:$0xff] %vm362_vm0, %v3307_v2  ;;  %v319_v61 = vmul.f32 %v3369_v3, %v3244_v44  ;;  %v339_v63 = vadd.f32 %v3382_v8, %v304_v47  ;;  %v320_v0 = vmul.f32 %v3369_v3, %v3245_v48  ;;  %v346_v4 = vadd.f32 %v3382_v8, %v311_v53  ;;  %v3267_v44 = vld [vmem:[%s3364_s27 + $0x50] sm:$0xff]   ;;  %v3171_v47 = vld [vmem:[%s4347_s3 + $0x68] sm:$0xff] }
  0x1b   : > { %374 = vst.msk [vmem:[#allocation2 + $0x50] sm:$0xff] %vm362_vm0, %v3307_v2  ;;  %v295_v5 = vmul.f32 %v3369_v3, %v3196_v54  ;;  %v347_v7 = vadd.f32 %v3382_v8, %v312_v57  ;;  %v296_v9 = vmul.f32 %v3369_v3, %v3197_v58  ;;  %v305_v13 = vmul.f32 %v3369_v3, %v3216_v62  ;;  %v3175_v53 = vld [vmem:[%s4347_s3 + $0x88] sm:$0xff]  ;;  %v3271_v58 = vld [vmem:[%s3364_s27 + $0x70] sm:$0xff]  }
  0x1c   : > { %375 = vst.msk [vmem:[#allocation2 + $0x58] sm:$0x3] %vm365_vm1, %v3307_v2  ;;  %1087 = vmatpush.bf16.msrb.mxu2 %v3169_v19  ;;  %2818 = vmatmul.msk.bf16.vlgmr.msra.gmra.mxu0 %vm362_vm0, %v487_v20  ;;  %v354_v12 = vadd.f32 %v3382_v8, %v319_v61  ;;  %v355_v17 = vadd.f32 %v3382_v8, %v320_v0  ;;  %v3201_v25 = vunpack.c.h.bf16 %v3258_v11  ;;  %v3220_v48 = vunpack.c.l.bf16 %v3263_v43  ;;  %v3259_v59 = vld [vmem:[%s3364_s27 + $0x10] sm:$0xff]  }
  0x1d   : > { %379 = vst.msk [vmem:[#allocation2 + $0x78] sm:$0xff] %vm362_vm0, %v3307_v2  ;;  %1337 = vmatpush.bf16.msrb.mxu3 %v3173_v21  ;;  %837 = vmatpush.bf16.msrb.mxu1 %v3165_v22  ;;  %v306_v18 = vmul.f32 %v3369_v3, %v3217_v1  ;;  %v330_v19 = vadd.f32 %v3382_v8, %v295_v5  ;;  %v3200_v21 = vunpack.c.l.bf16 %v3258_v11  ;;  %v3237_v54 = vunpack.c.h.bf16 %v3267_v44 }
  0x1e   : > { %v463_v14 = vld [vmem:[#allocation2 + $0x60] sm:$0xff]  ;;  %380 = vst.msk [vmem:[#allocation2 + $0x80] sm:$0xff] %vm362_vm0, %v3307_v2  ;;  %1587 = vmatpush.bf16.msrb.mxu0 %v3177_v23  ;;  %v313_v20 = vmul.f32 %v3369_v3, %v3232_v6  ;;  %v331_v23 = vadd.f32 %v3382_v8, %v296_v9  ;;  %v314_v24 = vmul.f32 %v3369_v3, %v3233_v10  ;;  %v3252_v62 = vunpack.c.l.bf16 %v3271_v58 }
  0x1f   : > { %v464_v15 = vld [vmem:[#allocation2 + $0x68] sm:$0xff]  ;;  %381 = vst.msk [vmem:[#allocation2 + $0x88] sm:$0x3] %vm365_vm1, %v3307_v2  ;;  %v340_v27 = vadd.f32 %v3382_v8, %v305_v13  ;;  %v341_v32 = vadd.f32 %v3382_v8, %v306_v18  ;;  %v297_v35 = vmul.f32 %v3369_v3, %v3200_v21  ;;  %v298_v39 = vmul.f32 %v3369_v3, %v3201_v25 }
  0x20   : > { %v3419_v16 = vpack.c.bf16 %v464_v15, %v463_v14  ;;  %382 = vst.msk [vmem:[#allocation2 + $0x90] sm:$0xff] %vm362_vm0, %v3307_v2  ;;  %1088 = vmatpush.bf16.msrb.mxu2 %v3168_v49  ;;  %v348_v34 = vadd.f32 %v3382_v8, %v313_v20  ;;  %v349_v38 = vadd.f32 %v3382_v8, %v314_v24  ;;  %v3221_v49 = vunpack.c.h.bf16 %v3263_v43 }
  0x21   : > { %383 = vst.msk [vmem:[#allocation2 + $0x98] sm:$0xff] %vm362_vm0, %v3307_v2  ;;  %1338 = vmatpush.bf16.msrb.mxu3 %v3172_v50  ;;  %838 = vmatpush.bf16.msrb.mxu1 %v3164_v51  ;;  %v3236_v50 = vunpack.c.l.bf16 %v3267_v44  ;;  %v332_v51 = vadd.f32 %v3382_v8, %v297_v35  ;;  %v316_v61 = vmul.f32 %v3369_v3, %v3237_v54  ;;  %v3185_v44 = vld [vmem:[%s4347_s3 + $0xd8] sm:$0xff] }
  0x22   : > { %2822 = vmatmul.msk.bf16.vlgmr.msra.gmra.mxu1 %vm362_vm0, %v3419_v16  ;;  %384 = vst.msk [vmem:[#allocation2 + $0xa0] sm:$0x3] %vm365_vm1, %v3307_v2  ;;  %1588 = vmatpush.bf16.msrb.mxu0 %v3176_v55  ;;  %v333_v55 = vadd.f32 %v3382_v8, %v298_v39  ;;  %v308_v57 = vmul.f32 %v3369_v3, %v3221_v49 }
  0x23   : > { %385 = vst.msk [vmem:[#allocation2 + $0xa8] sm:$0xff] %vm362_vm0, %v3307_v2  ;;  %v351_v11 = vadd.f32 %v3382_v8, %v316_v61 }
  0x24   : > { %386 = vst.msk [vmem:[#allocation2 + $0xb0] sm:$0xff] %vm362_vm0, %v3307_v2 }
  0x25   : > { %387 = vst.msk [vmem:[#allocation2 + $0xb8] sm:$0x3] %vm365_vm1, %v3307_v2  ;;  %1339 = vmatpush.bf16.msrb.mxu3 %v3171_v47  ;;  %v3181_v47 = vld [vmem:[%s4347_s3 + $0xb8] sm:$0xff] }
  0x26   : > { %388 = vst.msk [vmem:[#allocation2 + $0xc0] sm:$0xff] %vm362_vm0, %v3307_v2  ;;  %1589 = vmatpush.bf16.msrb.mxu0 %v3175_v53 }
  0x27   : > { %389 = vst.msk [vmem:[#allocation2 + $0xc8] sm:$0xff] %vm362_vm0, %v3307_v2 }
  0x28   : > { %390 = vst.msk [vmem:[#allocation2 + $0xd0] sm:$0x3] %vm365_vm1, %v3307_v2 }
  0x29   : > { %391 = vst.msk [vmem:[#allocation2 + $0xd8] sm:$0xff] %vm362_vm0, %v3307_v2 }
  0x2a   : > { %392 = vst.msk [vmem:[#allocation2 + $0xe0] sm:$0xff] %vm362_vm0, %v3307_v2 }
  0x2b   : > { %393 = vst.msk [vmem:[#allocation2 + $0xe8] sm:$0x3] %vm365_vm1, %v3307_v2 }
  0x2c   : > { %394 = vst.msk [vmem:[#allocation2 + $0xf0] sm:$0xff] %vm362_vm0, %v3307_v2 }
  0x2d   : > { %395 = vst.msk [vmem:[#allocation2 + $0xf8] sm:$0xff] %vm362_vm0, %v3307_v2 }
  0x2e   : > { %396 = vst.msk [vmem:[#allocation2 + $0x100] sm:$0x3] %vm365_vm1, %v3307_v2 }
  0x2f   : > { %397 = vst.msk [vmem:[#allocation2 + $0x108] sm:$0xff] %vm362_vm0, %v3307_v2 }
  0x30   : > { %398 = vst.msk [vmem:[#allocation2 + $0x110] sm:$0xff] %vm362_vm0, %v3307_v2 }
  0x31   : > { %399 = vst.msk [vmem:[#allocation2 + $0x118] sm:$0x3] %vm365_vm1, %v3307_v2 }
  0x32   : > { %400 = vst.msk [vmem:[#allocation2 + $0x120] sm:$0xff] %vm362_vm0, %v3307_v2 }
  0x33   : > { %401 = vst.msk [vmem:[#allocation2 + $0x128] sm:$0xff] %vm362_vm0, %v3307_v2 }
  0x34   : > { %402 = vst.msk [vmem:[#allocation2 + $0x130] sm:$0x3] %vm365_vm1, %v3307_v2 }
  0x35   : > { %403 = vst.msk [vmem:[#allocation2 + $0x138] sm:$0xff] %vm362_vm0, %v3307_v2 }
  0x36   : > { %404 = vst.msk [vmem:[#allocation2 + $0x140] sm:$0xff] %vm362_vm0, %v3307_v2 }
  0x37   : > { %405 = vst.msk [vmem:[#allocation2 + $0x148] sm:$0x3] %vm365_vm1, %v3307_v2 }
  0x38   : > { %406 = vst.msk [vmem:[#allocation2 + $0x150] sm:$0xff] %vm362_vm0, %v3307_v2 }
  0x39   : > { %407 = vst.msk [vmem:[#allocation2 + $0x158] sm:$0xff] %vm362_vm0, %v3307_v2 }
  0x3a   : > { %408 = vst.msk [vmem:[#allocation2 + $0x160] sm:$0x3] %vm365_vm1, %v3307_v2 }
  0x3b   : > { %409 = vst.msk [vmem:[#allocation2 + $0x168] sm:$0xff] %vm362_vm0, %v3307_v2 }
  0x3c   : > { %410 = vst.msk [vmem:[#allocation2 + $0x170] sm:$0xff] %vm362_vm0, %v3307_v2 }
  0x3d   : > { %411 = vst.msk [vmem:[#allocation2 + $0x178] sm:$0x3] %vm365_vm1, %v3307_v2 }
  0x3e   : > { %412 = vst.msk [vmem:[#allocation2 + $0x180] sm:$0xff] %vm362_vm0, %v3307_v2 }
  0x3f   : > { %413 = vst.msk [vmem:[#allocation2 + $0x188] sm:$0xff] %vm362_vm0, %v3307_v2 }
  0x40   : > { %414 = vst.msk [vmem:[#allocation2 + $0x190] sm:$0x3] %vm365_vm1, %v3307_v2 }
  0x41   : > { %415 = vst.msk [vmem:[#allocation2 + $0x198] sm:$0xff] %vm362_vm0, %v3307_v2 }
  0x42   : > { %416 = vst.msk [vmem:[#allocation2 + $0x1a0] sm:$0xff] %vm362_vm0, %v3307_v2 }
  0x43   : > { %417 = vst.msk [vmem:[#allocation2 + $0x1a8] sm:$0x3] %vm365_vm1, %v3307_v2  ;;  %v3270_v2 = vld [vmem:[%s3364_s27 + $0x68] sm:$0xff]  }
  0x44   : > { %433 = vst.msk [vmem:[#allocation2 + $0xc1] sm:$0xff] %vm362_vm0, %v344_v42  ;;  %v3248_v14 = vunpack.c.l.bf16 %v3270_v2  ;;  %v3249_v15 = vunpack.c.h.bf16 %v3270_v2  ;;  %v343_v2 = vadd.f32 %v3382_v8, %v308_v57  ;;  %v704_v57 = vld [vmem:[#allocation2 + $0x1] sm:$0xff] }
  0x45   : > { %434 = vst.msk [vmem:[#allocation2 + $0xc9] sm:$0xff] %vm362_vm0, %v345_v46  ;;  %v3167_v46 = vld [vmem:[%s4347_s3 + $0x48] sm:$0xff] }
  0x46   : > { %441 = vst.msk [vmem:[#allocation2 + $0x121] sm:$0xff] %vm362_vm0, %v352_v52  ;;  %v321_v28 = vmul.f32 %v3369_v3, %v3248_v14  ;;  %v322_v29 = vmul.f32 %v3369_v3, %v3249_v15  ;;  %v3163_v52 = vld [vmem:[%s4347_s3 + $0x28] sm:$0xff]  ;;  %1089 = vmatpush.bf16.msrb.mxu2 %v3167_v46  ;;  %v3189_v46 = vld [vmem:[%s4347_s3 + $0xf8] sm:$0xff] }
  0x47   : > { %442 = vst.msk [vmem:[#allocation2 + $0x129] sm:$0xff] %vm362_vm0, %v353_v56  ;;  %v307_v56 = vmul.f32 %v3369_v3, %v3220_v48  ;;  %839 = vmatpush.bf16.msrb.mxu1 %v3163_v52 }
  0x48   : > { %427 = vst.msk [vmem:[#allocation2 + $0x79] sm:$0xff] %vm362_vm0, %v338_v60  ;;  %v356_v41 = vadd.f32 %v3382_v8, %v321_v28  ;;  %v357_v42 = vadd.f32 %v3382_v8, %v322_v29  ;;  %v315_v60 = vmul.f32 %v3369_v3, %v3236_v50  ;;  %v3170_v29 = vld [vmem:[%s4347_s3 + $0x60] sm:$0xff]  ;;  %v3193_v50 = vld [vmem:[%s4347_s3 + $0x118] sm:$0xff] }
  0x49   : > { %428 = vst.msk [vmem:[#allocation2 + $0x81] sm:$0xff] %vm362_vm0, %v339_v63  ;;  %v3253_v63 = vunpack.c.h.bf16 %v3271_v58  ;;  %v342_v1 = vadd.f32 %v3382_v8, %v307_v56  ;;  %1340 = vmatpush.bf16.msrb.mxu3 %v3170_v29  ;;  %v705_v58 = vld [vmem:[#allocation2 + $0x9] sm:$0xff] }
  0x4a   : > { %435 = vst.msk [vmem:[#allocation2 + $0xd9] sm:$0xff] %vm362_vm0, %v346_v4  ;;  %v3204_v4 = vunpack.c.l.bf16 %v3259_v59  ;;  %v350_v6 = vadd.f32 %v3382_v8, %v315_v60  ;;  %v736_v60 = vpack.c.bf16 %v705_v58, %v704_v57 }
  0x4b   : > { %v471_v22 = vld [vmem:[#allocation2 + $0xc0] sm:$0xff]  ;;  %436 = vst.msk [vmem:[#allocation2 + $0xe1] sm:$0xff] %vm362_vm0, %v347_v7  ;;  %v323_v7 = vmul.f32 %v3369_v3, %v3252_v62  ;;  %v324_v9 = vmul.f32 %v3369_v3, %v3253_v63 }
  0x4c   : > { %v472_v26 = vld [vmem:[#allocation2 + $0xc8] sm:$0xff]  ;;  %443 = vst.msk [vmem:[#allocation2 + $0x139] sm:$0xff] %vm362_vm0, %v354_v12  ;;  %v3205_v12 = vunpack.c.h.bf16 %v3259_v59  ;;  %v299_v13 = vmul.f32 %v3369_v3, %v3204_v4 }
  0x4d   : > { %v3570_v30 = vpack.c.bf16 %v472_v26, %v471_v22  ;;  %v479_v31 = vld [vmem:[#allocation2 + $0x120] sm:$0xff]  ;;  %444 = vst.msk [vmem:[#allocation2 + $0x141] sm:$0xff] %vm362_vm0, %v355_v17  ;;  %v358_v17 = vadd.f32 %v3382_v8, %v323_v7  ;;  %v359_v18 = vadd.f32 %v3382_v8, %v324_v9 }
  0x4e   : > { %v480_v33 = vld [vmem:[#allocation2 + $0x128] sm:$0xff]  ;;  %419 = vst.msk [vmem:[#allocation2 + $0x19] sm:$0xff] %vm362_vm0, %v330_v19  ;;  %v300_v19 = vmul.f32 %v3369_v3, %v3205_v12  ;;  %v334_v22 = vadd.f32 %v3382_v8, %v299_v13 }
  0x4f   : > { %2826 = vmatmul.msk.bf16.vlgmr.msra.gmra.mxu2 %vm362_vm0, %v3570_v30  ;;  %v499_v36 = vpack.c.bf16 %v480_v33, %v479_v31  ;;  %v465_v37 = vld [vmem:[#allocation2 + $0x78] sm:$0xff]  ;;  %420 = vst.msk [vmem:[#allocation2 + $0x21] sm:$0xff] %vm362_vm0, %v331_v23  ;;  %v3174_v33 = vld [vmem:[%s4347_s3 + $0x80] sm:$0xff] }
  0x50   : > { %v466_v40 = vld [vmem:[#allocation2 + $0x80] sm:$0xff]  ;;  %429 = vst.msk [vmem:[#allocation2 + $0x91] sm:$0xff] %vm362_vm0, %v340_v27  ;;  %v335_v24 = vadd.f32 %v3382_v8, %v300_v19  ;;  %1590 = vmatpush.bf16.msrb.mxu0 %v3174_v33  ;;  %v3188_v19 = vld [vmem:[%s4347_s3 + $0xf0] sm:$0xff] }
  0x51   : > { %2830 = vmatmul.msk.bf16.vlgmr.msra.gmra.mxu3 %vm362_vm0, %v499_v36  ;;  %v3588_v45 = vpack.c.bf16 %v466_v40, %v465_v37  ;;  %430 = vst.msk [vmem:[#allocation2 + $0x99] sm:$0xff] %vm362_vm0, %v341_v32  ;;  %v473_v14 = vld [vmem:[#allocation2 + $0xd8] sm:$0xff]  ;;  %v3166_v8 = vld [vmem:[%s4347_s3 + $0x40] sm:$0xff] }
  0x52   : > { %437 = vst.msk [vmem:[#allocation2 + $0xf1] sm:$0xff] %vm362_vm0, %v348_v34  ;;  %v474_v15 = vld [vmem:[#allocation2 + $0xe0] sm:$0xff]  ;;  %1090 = vmatpush.bf16.msrb.mxu2 %v3166_v8  ;;  %2338 = vmatpush.bf16.msra.mxu3 %v3189_v46 }
  0x53   : > { %2823 = vmatmul.msk.bf16.gmra.mxu1 %vm362_vm0, %v3588_v45  ;;  %438 = vst.msk [vmem:[#allocation2 + $0xf9] sm:$0xff] %vm362_vm0, %v349_v38  ;;  %v481_v20 = vld [vmem:[#allocation2 + $0x138] sm:$0xff]  ;;  %v3637_v23 = vpack.c.bf16 %v474_v15, %v473_v14  ;;  %v3162_v32 = vld [vmem:[%s4347_s3 + $0x20] sm:$0xff] }
  0x54   : > { %445 = vst.msk [vmem:[#allocation2 + $0x151] sm:$0xff] %vm362_vm0, %v356_v41  ;;  %v482_v21 = vld [vmem:[#allocation2 + $0x140] sm:$0xff]  ;;  %840 = vmatpush.bf16.msrb.mxu1 %v3162_v32  ;;  %2588 = vmatpush.bf16.msra.mxu0 %v3193_v50 }
  0x55   : > { %v457_v0 = vld [vmem:[#allocation2 + $0x18] sm:$0xff]  ;;  %446 = vst.msk [vmem:[#allocation2 + $0x159] sm:$0xff] %vm362_vm0, %v357_v42  ;;  %v500_v27 = vpack.c.bf16 %v482_v21, %v481_v20  ;;  %v1460_v20 = vld [vmem:[#allocation2 + $0x61] sm:$0xff]  ;;  %v1461_v21 = vld [vmem:[#allocation2 + $0x69] sm:$0xff] }
  0x56   : > { %v458_v5 = vld [vmem:[#allocation2 + $0x20] sm:$0xff]  ;;  %421 = vst.msk [vmem:[#allocation2 + $0x31] sm:$0xff] %vm362_vm0, %v332_v51  ;;  %2088 = vmatpush.bf16.msra.mxu2 %v3185_v44  ;;  %2339 = vmatpush.bf16.msra.mxu3 %v3188_v19  ;;  %v3179_v19 = vld [vmem:[%s4347_s3 + $0xa8] sm:$0xff] }
  0x57   : > { %v3623_v10 = vpack.c.bf16 %v458_v5, %v457_v0  ;;  %422 = vst.msk [vmem:[#allocation2 + $0x39] sm:$0xff] %vm362_vm0, %v333_v55  ;;  %v467_v25 = vld [vmem:[#allocation2 + $0x90] sm:$0xff]  ;;  %v1454_v61 = vld [vmem:[#allocation2 + $0x19] sm:$0xff]  ;;  %v1455_v62 = vld [vmem:[#allocation2 + $0x21] sm:$0xff] }
  0x58   : > { %431 = vst.msk [vmem:[#allocation2 + $0xa9] sm:$0xff] %vm362_vm0, %v342_v1  ;;  %v468_v26 = vld [vmem:[#allocation2 + $0x98] sm:$0xff]  ;;  %1837 = vmatpush.bf16.msra.mxu1 %v3181_v47  ;;  %v1486_v63 = vpack.c.bf16 %v1455_v62, %v1454_v61  ;;  %v954_v0 = vld [vmem:[#allocation2 + $0x2] sm:$0xff]  ;;  %v955_v1 = vld [vmem:[#allocation2 + $0xa] sm:$0xff] }
  0x59   : > { %2819 = vmatmul.msk.bf16.gmra.mxu0 %vm362_vm0, %v3623_v10  ;;  %432 = vst.msk [vmem:[#allocation2 + $0xb1] sm:$0xff] %vm362_vm0, %v343_v2  ;;  %v3646_v3 = vpack.c.bf16 %v468_v26, %v467_v25  ;;  %v475_v35 = vld [vmem:[#allocation2 + $0xf0] sm:$0xff]  ;;  %v986_v2 = vpack.c.bf16 %v955_v1, %v954_v0  ;;  %v956_v7 = vld [vmem:[#allocation2 + $0x1a] sm:$0xff]  ;;  %v957_v9 = vld [vmem:[#allocation2 + $0x22] sm:$0xff] }
  0x5a   : > { %439 = vst.msk [vmem:[#allocation2 + $0x109] sm:$0xff] %vm362_vm0, %v350_v6  ;;  %v476_v36 = vld [vmem:[#allocation2 + $0xf8] sm:$0xff]  ;;  %v3192_v25 = vld [vmem:[%s4347_s3 + $0x110] sm:$0xff]  ;;  %v1463_v32 = vld [vmem:[#allocation2 + $0x81] sm:$0xff] }
  0x5b   : > { %440 = vst.msk [vmem:[#allocation2 + $0x111] sm:$0xff] %vm362_vm0, %v351_v11  ;;  %v483_v37 = vld [vmem:[#allocation2 + $0x150] sm:$0xff]  ;;  %v3665_v39 = vpack.c.bf16 %v476_v36, %v475_v35  ;;  %v3705_v11 = vpack.c.bf16 %v957_v9, %v956_v7  ;;  %2589 = vmatpush.bf16.msra.mxu0 %v3192_v25  ;;  %v962_v35 = vld [vmem:[#allocation2 + $0x62] sm:$0xff]  ;;  %v967_v0 = vld [vmem:[#allocation2 + $0x9a] sm:$0xff] }
  0x5c   : > { %447 = vst.msk [vmem:[#allocation2 + $0x169] sm:$0xff] %vm362_vm0, %v358_v17  ;;  %v484_v38 = vld [vmem:[#allocation2 + $0x158] sm:$0xff]  ;;  %v963_v36 = vld [vmem:[#allocation2 + $0x6a] sm:$0xff] }
  0x5d   : > { %448 = vst.msk [vmem:[#allocation2 + $0x171] sm:$0xff] %vm362_vm0, %v359_v18  ;;  %v459_v28 = vld [vmem:[#allocation2 + $0x30] sm:$0xff]  ;;  %v501_v42 = vpack.c.bf16 %v484_v38, %v483_v37  ;;  %v3757_v37 = vpack.c.bf16 %v963_v36, %v962_v35  ;;  %v3183_v9 = vld [vmem:[%s4347_s3 + $0xc8] sm:$0xff]  ;;  %v3858_v35 = vld [vmem:[%s4348_s4] ss:$0 sm:$0xff] }
  0x5e   : > { %423 = vst.msk [vmem:[#allocation2 + $0x49] sm:$0xff] %vm362_vm0, %v334_v22  ;;  %v460_v31 = vld [vmem:[#allocation2 + $0x38] sm:$0xff]  ;;  %v3184_v18 = vld [vmem:[%s4347_s3 + $0xd0] sm:$0xff]  ;;  %v3729_v22 = vpack.c.bf16 %v1461_v21, %v1460_v20  ;;  %v3191_v20 = vld [vmem:[%s4347_s3 + $0x108] sm:$0xff] }
  0x5f   : > { %2827 = vmatmul.msk.bf16.gmra.mxu2 %vm362_vm0, %v3637_v23  ;;  %424 = vst.msk [vmem:[#allocation2 + $0x51] sm:$0xff] %vm362_vm0, %v335_v24  ;;  %v489_v34 = vpack.c.bf16 %v460_v31, %v459_v28  ;;  %v469_v40 = vld [vmem:[#allocation2 + $0xa8] sm:$0xff]  ;;  %v1456_v4 = vld [vmem:[#allocation2 + $0x31] sm:$0xff]  ;;  %v1457_v5 = vld [vmem:[#allocation2 + $0x39] sm:$0xff]  ;;  %2590 = vmatpush.bf16.msra.mxu0 %v3191_v20 }
  0x60   : > { %v470_v41 = vld [vmem:[#allocation2 + $0xb0] sm:$0xff]  ;;  %v3701_v6 = vpack.c.bf16 %v1457_v5, %v1456_v4  ;;  %v959_v15 = vld [vmem:[#allocation2 + $0x3a] sm:$0xff]  ;;  %2089 = vmatpush.bf16.msra.mxu2 %v3184_v18 }
  0x61   : > { %2831 = vmatmul.msk.bf16.gmra.mxu3 %vm362_vm0, %v500_v27  ;;  %v3669_v43 = vpack.c.bf16 %v470_v41, %v469_v40  ;;  %v477_v52 = vld [vmem:[#allocation2 + $0x108] sm:$0xff]  ;;  %v958_v14 = vld [vmem:[#allocation2 + $0x32] sm:$0xff] }
  0x62   : > { %v478_v53 = vld [vmem:[#allocation2 + $0x110] sm:$0xff]  ;;  %v3716_v17 = vpack.c.bf16 %v959_v15, %v958_v14  ;;  %v1462_v31 = vld [vmem:[#allocation2 + $0x79] sm:$0xff]  ;;  %v1468_v14 = vld [vmem:[#allocation2 + $0xc1] sm:$0xff] }
  0x63   : > { %2824 = vmatmul.msk.bf16.gmra.mxu1 %vm362_vm0, %v3646_v3  ;;  %v485_v54 = vld [vmem:[#allocation2 + $0x168] sm:$0xff]  ;;  %v3687_v56 = vpack.c.bf16 %v478_v53, %v477_v52  ;;  %v3180_v24 = vld [vmem:[%s4347_s3 + $0xb0] sm:$0xff]  ;;  %v3751_v33 = vpack.c.bf16 %v1463_v32, %v1462_v31 }
  0x64   : > { %v486_v55 = vld [vmem:[#allocation2 + $0x170] sm:$0xff]  ;;  %1838 = vmatpush.bf16.msra.mxu1 %v3180_v24  ;;  %2090 = vmatpush.bf16.msra.mxu2 %v3183_v9  ;;  %v970_v9 = vld [vmem:[#allocation2 + $0xc2] sm:$0xff] }
  0x65   : > { %v461_v48 = vld [vmem:[#allocation2 + $0x48] sm:$0xff]  ;;  %v3689_v59 = vpack.c.bf16 %v486_v55, %v485_v54  ;;  %v1464_v41 = vld [vmem:[#allocation2 + $0x91] sm:$0xff] }
  0x66   : > { %v462_v49 = vld [vmem:[#allocation2 + $0x50] sm:$0xff] }
  0x67   : > { %v490_v51 = vpack.c.bf16 %v462_v49, %v461_v48  ;;  %v1458_v12 = vld [vmem:[#allocation2 + $0x49] sm:$0xff]  ;;  %v961_v27 = vld [vmem:[#allocation2 + $0x52] sm:$0xff]  ;;  %v964_v48 = vld [vmem:[#allocation2 + $0x7a] sm:$0xff] }
  0x68   : > { %v960_v26 = vld [vmem:[#allocation2 + $0x4a] sm:$0xff]  ;;  %v965_v49 = vld [vmem:[#allocation2 + $0x82] sm:$0xff]  ;;  %1839 = vmatpush.bf16.msra.mxu1 %v3179_v19  ;;  %v969_v25 = vld [vmem:[#allocation2 + $0xb2] sm:$0xff] }
  0x69   : > { %2820 = vmatmul.msk.bf16.gmra.mxu0 %vm362_vm0, %v489_v34  ;;  %v3739_v28 = vpack.c.bf16 %v961_v27, %v960_v26  ;;  %v1466_v57 = vld [vmem:[#allocation2 + $0xa9] sm:$0xff]  ;;  %v1467_v58 = vld [vmem:[#allocation2 + $0xb1] sm:$0xff] }
  0x6a   : > { %v3801_v61 = vpack.c.bf16 %v1467_v58, %v1466_v57  ;;  %v1469_v15 = vld [vmem:[#allocation2 + $0xc9] sm:$0xff]  ;;  %v1470_v57 = vld [vmem:[#allocation2 + $0xd9] sm:$0xff]  ;;  %v1471_v58 = vld [vmem:[#allocation2 + $0xe1] sm:$0xff] }
  0x6b   : > { %v968_v24 = vld [vmem:[#allocation2 + $0xaa] sm:$0xff] }
  0x6c   : > { %v3851_v31 = vpack.c.bf16 %v969_v25, %v968_v24 }
  0x6f   : > { %2828 = vmatmul.msk.bf16.gmra.mxu2 %vm362_vm0, %v3665_v39 }
  0x71   : > { %2832 = vmatmul.msk.bf16.gmra.mxu3 %vm362_vm0, %v501_v42  ;;  %v1465_v42 = vld [vmem:[#allocation2 + $0x99] sm:$0xff] }
  0x72   : > { %v3773_v46 = vpack.c.bf16 %v1465_v42, %v1464_v41 }
  0x73   : > { %2825 = vmatmul.msk.bf16.gmra.mxu1 %vm362_vm0, %v3669_v43 }
  0x79   : > { %2821 = vmatmul.msk.bf16.gmra.mxu0 %vm362_vm0, %v490_v51 }
  0x7f   : > { %2829 = vmatmul.msk.bf16.gmra.mxu2 %vm362_vm0, %v3687_v56 }
  0x81   : > { %2833 = vmatmul.msk.bf16.gmra.mxu3 %vm362_vm0, %v3689_v59 }
  0x83   : > { %2858 = vmatmul.msk.bf16.vlgmr.msrb.gmra.mxu1 %vm362_vm0, %v736_v60 }
  0x89   : > { %2978 = vmatmul.msk.bf16.vlgmr.msrb.gmra.mxu0 %vm362_vm0, %v1486_v63 }
  0x8f   : > { %2898 = vmatmul.msk.bf16.vlgmr.msrb.gmra.mxu2 %vm362_vm0, %v986_v2 }
  0x91   : > { %2938 = vmatmul.msk.bf16.vlgmr.msrb.gmra.mxu3 %vm362_vm0, %v3623_v10  ;;  %v1459_v10 = vld [vmem:[#allocation2 + $0x51] sm:$0xff] }
  0x92   : > { %v3712_v13 = vpack.c.bf16 %v1459_v10, %v1458_v12  ;;  %v3187_v12 = vld [vmem:[%s4347_s3 + $0xe8] sm:$0xff] }
  0x93   : > { %2859 = vmatmul.msk.bf16.gmra.mxu1 %vm362_vm0, %v1486_v63  ;;  %v966_v63 = vld [vmem:[#allocation2 + $0x92] sm:$0xff]  ;;  %2340 = vmatpush.bf16.msra.mxu3 %v3187_v12  ;;  %v971_v12 = vld [vmem:[#allocation2 + $0xca] sm:$0xff] }
  0x94   : > { %v3811_v2 = vpack.c.bf16 %v967_v0, %v966_v63  ;;  %v3874_v0 = vpack.c.bf16 %v1471_v58, %v1470_v57  ;;  %v1472_v57 = vld [vmem:[#allocation2 + $0xf1] sm:$0xff]  ;;  %v1473_v58 = vld [vmem:[#allocation2 + $0xf9] sm:$0xff] }
  0x96   : > { %4361 = vst [vmem:[#allocation6_spill] sm:$0xff] %v3874_v0 }
  0x99   : > { %2979 = vmatmul.msk.bf16.gmra.mxu0 %vm362_vm0, %v3701_v6  ;;  %v3747_v29 = vpop.f32.mrf.mxu0 }
  0x9a   : > { %v672_v41 = vadd.f32 %v3858_v35, %v3747_v29 }
  0x9f   : > { %2899 = vmatmul.msk.bf16.gmra.mxu2 %vm362_vm0, %v3705_v11  ;;  %v3741_v8 = vpop.f32.mrf.mxu1 }
  0xa1   : > { %2939 = vmatmul.msk.bf16.gmra.mxu3 %vm362_vm0, %v489_v34  ;;  %v3759_v38 = vpop.f32.mrf.mxu0 }
  0xa3   : > { %2860 = vmatmul.msk.bf16.gmra.mxu1 %vm362_vm0, %v3701_v6 }
  0xa7   : > { %v3753_v34 = vpop.f32.mrf.mxu1 }
  0xa9   : > { %2980 = vmatmul.msk.bf16.gmra.mxu0 %vm362_vm0, %v3712_v13 }
  0xaf   : > { %2900 = vmatmul.msk.bf16.gmra.mxu2 %vm362_vm0, %v3716_v17 }
  0xb1   : > { %2940 = vmatmul.msk.bf16.gmra.mxu3 %vm362_vm0, %v490_v51  ;;  %v3783_v51 = vpack.c.bf16 %v965_v49, %v964_v48 }
  0xb3   : > { %2861 = vmatmul.msk.bf16.gmra.mxu1 %vm362_vm0, %v3712_v13 }
  0xb9   : > { %2981 = vmatmul.msk.bf16.gmra.mxu0 %vm362_vm0, %v3729_v22 }
  0xbf   : > { %2901 = vmatmul.msk.bf16.gmra.mxu2 %vm362_vm0, %v3739_v28 }
  0xc1   : > { %2941 = vmatmul.msk.bf16.gmra.mxu3 %vm362_vm0, %v3419_v16 }
  0xc3   : > { %2862 = vmatmul.msk.bf16.gmra.mxu1 %vm362_vm0, %v3729_v22 }
  0xc9   : > { %2982 = vmatmul.msk.bf16.gmra.mxu0 %vm362_vm0, %v3751_v33 }
  0xcf   : > { %2902 = vmatmul.msk.bf16.gmra.mxu2 %vm362_vm0, %v3757_v37 }
  0xd0   : > { %v3763_v16 = vpop.f32.mrf.mxu1 }
  0xd1   : > { %2942 = vmatmul.msk.bf16.gmra.mxu3 %vm362_vm0, %v3588_v45 }
  0xd2   : > { %v3767_v40 = vpop.f32.mrf.mxu2 }
  0xd3   : > { %2863 = vmatmul.msk.bf16.gmra.mxu1 %vm362_vm0, %v3751_v33 }
  0xd4   : > { %v3771_v44 = vpop.f32.mrf.mxu3 }
  0xd6   : > { %v3775_v47 = vpop.f32.mrf.mxu0 }
  0xd7   : > { %v674_v24 = vadd.f32 %v3858_v35, %v3775_v47 }
  0xd8   : > { %v3777_v50 = vpop.f32.mrf.mxu1 }
  0xd9   : > { %2983 = vmatmul.msk.bf16.gmra.mxu0 %vm362_vm0, %v3773_v46 }
  0xda   : > { %v3781_v45 = vpop.f32.mrf.mxu2 }
  0xdc   : > { %v3785_v52 = vpop.f32.mrf.mxu3 }
  0xde   : > { %v3787_v53 = vpop.f32.mrf.mxu0 }
  0xdf   : > { %2903 = vmatmul.msk.bf16.gmra.mxu2 %vm362_vm0, %v3783_v51 }
  0xe0   : > { %v3791_v54 = vpop.f32.mrf.mxu1 }
  0xe1   : > { %2943 = vmatmul.msk.bf16.gmra.mxu3 %vm362_vm0, %v3646_v3 }
  0xe2   : > { %v3795_v55 = vpop.f32.mrf.mxu2 }
  0xe3   : > { %2864 = vmatmul.msk.bf16.gmra.mxu1 %vm362_vm0, %v3773_v46 }
  0xe4   : > { %v3799_v60 = vpop.f32.mrf.mxu3 }
  0xe6   : > { %v3803_v62 = vpop.f32.mrf.mxu0 }
  0xe8   : > { %v3805_v1 = vpop.f32.mrf.mxu1 }
  0xe9   : > { %2984 = vmatmul.msk.bf16.gmra.mxu0 %vm362_vm0, %v3801_v61 }
  0xea   : > { %v3809_v3 = vpop.f32.mrf.mxu2 }
  0xec   : > { %v3813_v4 = vpop.f32.mrf.mxu3 }
  0xee   : > { %v3815_v5 = vpop.f32.mrf.mxu0 }
  0xef   : > { %2904 = vmatmul.msk.bf16.gmra.mxu2 %vm362_vm0, %v3811_v2 }
  0xf0   : > { %v3819_v7 = vpop.f32.mrf.mxu1 }
  0xf1   : > { %2944 = vmatmul.msk.bf16.gmra.mxu3 %vm362_vm0, %v3669_v43  ;;  %v3835_v43 = vpack.c.bf16 %v1469_v15, %v1468_v14  ;;  %v3880_v15 = vpack.c.bf16 %v971_v12, %v970_v9 }
  0xf2   : > { %v3829_v10 = vpop.f32.mrf.mxu2 }
  0xf3   : > { %2865 = vmatmul.msk.bf16.gmra.mxu1 %vm362_vm0, %v3801_v61  ;;  %4358 = vst [vmem:[#allocation3_spill] sm:$0xff] %v3835_v43 }
  0xf4   : > { %v3833_v18 = vpop.f32.mrf.mxu3  ;;  %4362 = vst [vmem:[#allocation7_spill] sm:$0xff] %v3880_v15 }
  0xf6   : > { %v3843_v21 = vpop.f32.mrf.mxu0 }
  0xf8   : > { %v3845_v26 = vpop.f32.mrf.mxu1 }
  0xf9   : > { %2985 = vmatmul.msk.bf16.gmra.mxu0 %vm362_vm0, %v3835_v43 }
  0xfa   : > { %v3849_v27 = vpop.f32.mrf.mxu2 }
  0xfc   : > { %v3853_v32 = vpop.f32.mrf.mxu3 }
  0xfd   : > { %4359 = vst [vmem:[#allocation4_spill] sm:$0xff] %v3853_v32 }
  0xfe   : > { %v3860_v36 = vpop.f32.mrf.mxu0 }
  0xff   : > { %2905 = vmatmul.msk.bf16.gmra.mxu2 %vm362_vm0, %v3851_v31 }
 0x100   : > { %v842_v42 = vpop.f32.mrf.mxu1 }
 0x101   : > { %2945 = vmatmul.msk.bf16.gmra.mxu3 %vm362_vm0, %v3570_v30  ;;  %v922_v48 = vadd.f32 %v842_v42, %v672_v41 }
 0x102   : > { %v3868_v49 = vpop.f32.mrf.mxu2 }
 0x103   : > { %2866 = vmatmul.msk.bf16.gmra.mxu1 %vm362_vm0, %v3835_v43 }
 0x104   : > { %v3872_v63 = vpop.f32.mrf.mxu3 }
 0x105   : > { %4360 = vst [vmem:[#allocation5_spill] sm:$0xff] %v3872_v63  ;;  %v673_v63 = vadd.f32 %v3858_v35, %v3759_v38 }
 0x106   : > { %v1592_v29 = vpop.f32.mrf.mxu0 }
 0x108   : > { %v844_v14 = vpop.f32.mrf.mxu1 }
 0x109   : > { %2986 = vmatmul.msk.bf16.gmra.mxu0 %vm362_vm0, %v3874_v0 }
 0x10a   : > { %v3878_v30 = vpop.f32.mrf.mxu2 }
 0x10c   : > { %v3882_v19 = vpop.f32.mrf.mxu3 }
 0x10d   : > { %4363 = vst [vmem:[#allocation8_spill] sm:$0xff] %v3882_v19  ;;  %v3892_v19 = vpack.c.bf16 %v1473_v58, %v1472_v57 }
 0x10e   : > { %v1594_v20 = vpop.f32.mrf.mxu0 }
 0x10f   : > { %2906 = vmatmul.msk.bf16.gmra.mxu2 %vm362_vm0, %v3880_v15  ;;  %v675_v15 = vadd.f32 %v3858_v35, %v3787_v53  ;;  %v676_v53 = vadd.f32 %v3858_v35, %v3803_v62 }
 0x110   : > { %v847_v25 = vpop.f32.mrf.mxu1 }
 0x111   : > { %2946 = vmatmul.msk.bf16.gmra.mxu3 %vm362_vm0, %v3637_v23  ;;  %v924_v41 = vadd.f32 %v847_v25, %v674_v24  ;;  %v972_v24 = vld [vmem:[#allocation2 + $0xda] sm:$0xff]  ;;  %v973_v25 = vld [vmem:[#allocation2 + $0xe2] sm:$0xff] }
 0x112   : > { %v1092_v42 = vpop.f32.mrf.mxu2  ;;  %v3902_v58 = vpack.c.bf16 %v973_v25, %v972_v24 }
 0x113   : > { %v1172_v43 = vadd.f32 %v1092_v42, %v922_v48  ;;  %2867 = vmatmul.msk.bf16.gmra.mxu1 %vm362_vm0, %v3874_v0  ;;  %v923_v48 = vadd.f32 %v844_v14, %v673_v63 }
 0x114   : > { %v1342_v9 = vpop.f32.mrf.mxu3 }
 0x115   : > { %v1422_v12 = vadd.f32 %v1342_v9, %v1172_v43 }
 0x116   : > { %v1597_v47 = vpop.f32.mrf.mxu0 }
 0x117   : > { %v3898_v23 = vadd.f32 %v1592_v29, %v1422_v12  ;;  %v1475_v12 = vld [vmem:[#allocation2 + $0x111] sm:$0xff] }
 0x118   : > { %v849_v32 = vpop.f32.mrf.mxu1 }
 0x119   : > { %2987 = vmatmul.msk.bf16.gmra.mxu0 %vm362_vm0, %v3892_v19  ;;  %v925_v42 = vadd.f32 %v849_v32, %v675_v15  ;;  %v1474_v15 = vld [vmem:[#allocation2 + $0x109] sm:$0xff] }
 0x11a   : > { %v1094_v43 = vpop.f32.mrf.mxu2  ;;  %v3914_v62 = vpack.c.bf16 %v1475_v12, %v1474_v15 }
 0x11b   : > { %v1173_v57 = vadd.f32 %v1094_v43, %v923_v48 }
 0x11c   : > { %v1344_v9 = vpop.f32.mrf.mxu3  ;;  %4364 = vst [vmem:[#allocation9_spill] sm:$0xff] %v3914_v62 }
 0x11d   : > { %v1423_v0 = vadd.f32 %v1344_v9, %v1173_v57  ;;  %v974_v57 = vld [vmem:[#allocation2 + $0xf2] sm:$0xff] }
 0x11e   : > { %v1599_v38 = vpop.f32.mrf.mxu0 }
 0x11f   : > { %2907 = vmatmul.msk.bf16.gmra.mxu2 %vm362_vm0, %v3902_v58  ;;  %v3908_v29 = vadd.f32 %v1594_v20, %v1423_v0  ;;  %v677_v0 = vadd.f32 %v3858_v35, %v3815_v5 }
 0x120   : > { %v852_v63 = vpop.f32.mrf.mxu1 }
 0x121   : > { %2947 = vmatmul.msk.bf16.gmra.mxu3 %vm362_vm0, %v3665_v39  ;;  %v926_v32 = vadd.f32 %v852_v63, %v676_v53  ;;  %v975_v39 = vld [vmem:[#allocation2 + $0xfa] sm:$0xff] }
 0x122   : > { %v1097_v14 = vpop.f32.mrf.mxu2 }
 0x123   : > { %v1174_v24 = vadd.f32 %v1097_v14, %v924_v41  ;;  %2868 = vmatmul.msk.bf16.gmra.mxu1 %vm362_vm0, %v3892_v19  ;;  %v3922_v14 = vpack.c.bf16 %v975_v39, %v974_v57  ;;  %v1477_v39 = vld [vmem:[#allocation2 + $0x129] sm:$0xff] }
 0x124   : > { %v1347_v25 = vpop.f32.mrf.mxu3 }
 0x125   : > { %v1424_v48 = vadd.f32 %v1347_v25, %v1174_v24  ;;  %v678_v25 = vadd.f32 %v3858_v35, %v3843_v21  ;;  %v1476_v21 = vld [vmem:[#allocation2 + $0x121] sm:$0xff] }
 0x126   : > { %v1602_v43 = vpop.f32.mrf.mxu0 }
 0x127   : > { %v3918_v20 = vadd.f32 %v1597_v47, %v1424_v48 }
 0x128   : > { %v854_v9 = vpop.f32.mrf.mxu1 }
 0x129   : > { %4365 = vst [vmem:[#allocation10_spill] sm:$0xff] %v3918_v20  ;;  %2988 = vmatmul.msk.bf16.gmra.mxu0 %vm362_vm0, %v3914_v62  ;;  %v927_v41 = vadd.f32 %v854_v9, %v677_v0  ;;  %v3186_v0 = vld [vmem:[%s4347_s3 + $0xe0] sm:$0xff] }
 0x12a   : > { %v1099_v53 = vpop.f32.mrf.mxu2  ;;  %2341 = vmatpush.bf16.msra.mxu3 %v3186_v0 }
 0x12b   : > { %v1175_v63 = vadd.f32 %v1099_v53, %v925_v42  ;;  %v3182_v42 = vld [vmem:[%s4347_s3 + $0xc0] sm:$0xff]  ;;  %v3940_v53 = vpack.c.bf16 %v1477_v39, %v1476_v21 }
 0x12c   : > { %v1349_v24 = vpop.f32.mrf.mxu3  ;;  %2091 = vmatpush.bf16.msra.mxu2 %v3182_v42  ;;  %v977_v42 = vld [vmem:[#allocation2 + $0x112] sm:$0xff]  ;;  %v1226_v39 = vld [vmem:[#allocation2 + $0x120] sm:$0xff] }
 0x12d   : > { %v1425_v15 = vadd.f32 %v1349_v24, %v1175_v63  ;;  %4367 = vst [vmem:[#allocation12_spill] sm:$0xff] %v3940_v53  ;;  %v3178_v63 = vld [vmem:[%s4347_s3 + $0xa0] sm:$0xff] }
 0x12e   : > { %v1604_v12 = vpop.f32.mrf.mxu0  ;;  %v3190_v24 = vld [vmem:[%s4347_s3 + $0x100] sm:$0xff]  ;;  %1840 = vmatpush.bf16.msra.mxu1 %v3178_v63 }
 0x12f   : > { %2908 = vmatmul.msk.bf16.gmra.mxu2 %vm362_vm0, %v3922_v14  ;;  %v3928_v5 = vadd.f32 %v1599_v38, %v1425_v15  ;;  %2591 = vmatpush.bf16.msra.mxu0 %v3190_v24 }
 0x130   : > { %v857_v47 = vpop.f32.mrf.mxu1 }
 0x131   : > { %4366 = vst [vmem:[#allocation11_spill] sm:$0xff] %v3928_v5  ;;  %2948 = vmatmul.msk.bf16.gmra.mxu3 %vm362_vm0, %v3687_v56  ;;  %v928_v48 = vadd.f32 %v857_v47, %v678_v25  ;;  %v976_v47 = vld [vmem:[#allocation2 + $0x10a] sm:$0xff] }
 0x132   : > { %v1102_v57 = vpop.f32.mrf.mxu2  ;;  %v3954_v5 = vpack.c.bf16 %v977_v42, %v976_v47  ;;  %v1478_v47 = vld [vmem:[#allocation2 + $0x139] sm:$0xff]  ;;  %v1479_v42 = vld [vmem:[#allocation2 + $0x141] sm:$0xff] }
 0x133   : > { %v1176_v9 = vadd.f32 %v1102_v57, %v926_v32  ;;  %2869 = vmatmul.msk.bf16.gmra.mxu1 %vm362_vm0, %v3914_v62  ;;  %v679_v32 = vadd.f32 %v3858_v35, %v3860_v36 }
 0x134   : > { %v1352_v38 = vpop.f32.mrf.mxu3 }
 0x135   : > { %v1426_v56 = vadd.f32 %v1352_v38, %v1176_v9  ;;  %v1227_v9 = vld [vmem:[#allocation2 + $0x128] sm:$0xff] }
 0x136   : > { %v1607_v15 = vpop.f32.mrf.mxu0  ;;  %v3956_v36 = vpack.c.bf16 %v1227_v9, %v1226_v39 }
 0x137   : > { %v3950_v25 = vadd.f32 %v1602_v43, %v1426_v56  ;;  %v680_v43 = vadd.f32 %v3858_v35, %v3741_v8  ;;  %v3968_v8 = vpack.c.bf16 %v1479_v42, %v1478_v47 }
 0x138   : > { %v859_v0 = vpop.f32.mrf.mxu1 }
 0x139   : > { %4368 = vst [vmem:[#allocation13_spill] sm:$0xff] %v3950_v25  ;;  %2989 = vmatmul.msk.bf16.gmra.mxu0 %vm362_vm0, %v3940_v53  ;;  %v929_v57 = vadd.f32 %v859_v0, %v679_v32 }
 0x13a   : > { %v1104_v21 = vpop.f32.mrf.mxu2  ;;  %4370 = vst [vmem:[#allocation15_spill] sm:$0xff] %v3968_v8 }
 0x13b   : > { %v1177_v38 = vadd.f32 %v1104_v21, %v927_v41 }
 0x13c   : > { %v1354_v62 = vpop.f32.mrf.mxu3 }
 0x13d   : > { %v1427_v20 = vadd.f32 %v1354_v62, %v1177_v38 }
 0x13e   : > { %v1609_v63 = vpop.f32.mrf.mxu0 }
 0x13f   : > { %2909 = vmatmul.msk.bf16.gmra.mxu2 %vm362_vm0, %v3954_v5  ;;  %v3962_v56 = vadd.f32 %v1604_v12, %v1427_v20  ;;  %v978_v20 = vld [vmem:[#allocation2 + $0x122] sm:$0xff]  ;;  %v979_v12 = vld [vmem:[#allocation2 + $0x12a] sm:$0xff] }
 0x140   : > { %v862_v24 = vpop.f32.mrf.mxu1 }
 0x141   : > { %4369 = vst [vmem:[#allocation14_spill] sm:$0xff] %v3962_v56  ;;  %2949 = vmatmul.msk.bf16.gmra.mxu3 %vm362_vm0, %v3956_v36  ;;  %v930_v41 = vadd.f32 %v862_v24, %v680_v43  ;;  %v1228_v24 = vld [vmem:[#allocation2 + $0x138] sm:$0xff]  ;;  %v3974_v56 = vpack.c.bf16 %v979_v12, %v978_v20 }
 0x142   : > { %v1107_v32 = vpop.f32.mrf.mxu2 }
 0x143   : > { %v1178_v62 = vadd.f32 %v1107_v32, %v928_v48  ;;  %2870 = vmatmul.msk.bf16.gmra.mxu1 %vm362_vm0, %v3940_v53  ;;  %v1229_v48 = vld [vmem:[#allocation2 + $0x140] sm:$0xff] }
 0x144   : > { %v1357_v0 = vpop.f32.mrf.mxu3  ;;  %v3976_v47 = vpack.c.bf16 %v1229_v48, %v1228_v24  ;;  %v1481_v24 = vld [vmem:[#allocation2 + $0x159] sm:$0xff] }
 0x145   : > { %v1428_v21 = vadd.f32 %v1357_v0, %v1178_v62 }
 0x146   : > { %v1612_v39 = vpop.f32.mrf.mxu0 }
 0x147   : > { %v3970_v9 = vadd.f32 %v1607_v15, %v1428_v21  ;;  %v682_v15 = vadd.f32 %v3858_v35, %v3763_v16  ;;  %v3297_v16 = vld [vmem:[%s4345_s1] ss:$0 sm:$0xff] }
 0x148   : > { %v864_v38 = vpop.f32.mrf.mxu1 }
 0x149   : > { %4371 = vst [vmem:[#allocation16_spill] sm:$0xff] %v3970_v9  ;;  %2990 = vmatmul.msk.bf16.gmra.mxu0 %vm362_vm0, %v3968_v8  ;;  %v3272_v9 = vld [vmem:[%s3364_s27 + $0x78] sm:$0xff]  }
 0x14a   : > { %v1109_v43 = vpop.f32.mrf.mxu2  ;;  %v3256_v20 = vunpack.c.l.bf16 %v3272_v9  ;;  %v3257_v12 = vunpack.c.h.bf16 %v3272_v9  ;;  %v3298_v9 = vld [vmem:[%s4346_s2] ss:$0 sm:$0xff] }
 0x14b   : > { %v1179_v32 = vadd.f32 %v1109_v43, %v929_v57  ;;  %v1480_v43 = vld [vmem:[#allocation2 + $0x151] sm:$0xff] }
 0x14c   : > { %v1359_v53 = vpop.f32.mrf.mxu3  ;;  %v3992_v25 = vpack.c.bf16 %v1481_v24, %v1480_v43  ;;  %v981_v43 = vld [vmem:[#allocation2 + $0x142] sm:$0xff] }
 0x14d   : > { %v1429_v62 = vadd.f32 %v1359_v53, %v1179_v32  ;;  %v326_v32 = vmul.f32 %v3297_v16, %v3257_v12  ;;  %v980_v12 = vld [vmem:[#allocation2 + $0x13a] sm:$0xff] }
 0x14e   : > { %v1614_v42 = vpop.f32.mrf.mxu0 }
 0x14f   : > { %2910 = vmatmul.msk.bf16.gmra.mxu2 %vm362_vm0, %v3974_v56  ;;  %v3982_v0 = vadd.f32 %v1609_v63, %v1429_v62  ;;  %v325_v63 = vmul.f32 %v3297_v16, %v3256_v20 }
 0x150   : > { %v867_v21 = vpop.f32.mrf.mxu1 }
 0x151   : > { %4372 = vst [vmem:[#allocation17_spill] sm:$0xff] %v3982_v0  ;;  %2950 = vmatmul.msk.bf16.gmra.mxu3 %vm362_vm0, %v3976_v47  ;;  %v932_v57 = vadd.f32 %v867_v21, %v682_v15  ;;  %v360_v15 = vadd.f32 %v3298_v9, %v325_v63  ;;  %v361_v21 = vadd.f32 %v3298_v9, %v326_v32  ;;  %v1230_v32 = vld [vmem:[#allocation2 + $0x150] sm:$0xff] }
 0x152   : > { %v1112_v53 = vpop.f32.mrf.mxu2  ;;  %v4007_v9 = vpack.c.bf16 %v981_v43, %v980_v12  ;;  %v1482_v12 = vld [vmem:[#allocation2 + $0x169] sm:$0xff]  ;;  %v1483_v43 = vld [vmem:[#allocation2 + $0x171] sm:$0xff] }
 0x153   : > { %v1180_v48 = vadd.f32 %v1112_v53, %v930_v41  ;;  %2871 = vmatmul.msk.bf16.gmra.mxu1 %vm362_vm0, %v3968_v8  ;;  %v681_v53 = vadd.f32 %v3858_v35, %v3753_v34  ;;  %v683_v8 = vadd.f32 %v3858_v35, %v3777_v50  ;;  %449 = vst.msk [vmem:[#allocation2 + $0x181] sm:$0xff] %vm362_vm0, %v360_v15  ;;  %v1231_v34 = vld [vmem:[#allocation2 + $0x158] sm:$0xff] }
 0x154   : > { %v1362_v62 = vpop.f32.mrf.mxu3  ;;  %450 = vst.msk [vmem:[#allocation2 + $0x189] sm:$0xff] %vm362_vm0, %v361_v21 }
 0x155   : > { %v1430_v0 = vadd.f32 %v1362_v62, %v1180_v48  ;;  %v931_v48 = vadd.f32 %v864_v38, %v681_v53 }
 0x156   : > { %v1617_v41 = vpop.f32.mrf.mxu0 }
 0x157   : > { %v4002_v20 = vadd.f32 %v1612_v39, %v1430_v0  ;;  %v4009_v39 = vpack.c.bf16 %v1231_v34, %v1230_v32 }
 0x158   : > { %v869_v24 = vpop.f32.mrf.mxu1 }
 0x159   : > { %4373 = vst [vmem:[#allocation18_spill] sm:$0xff] %v4002_v20  ;;  %2991 = vmatmul.msk.bf16.gmra.mxu0 %vm362_vm0, %v3992_v25  ;;  %v933_v16 = vadd.f32 %v869_v24, %v683_v8  ;;  %v684_v20 = vadd.f32 %v3858_v35, %v3791_v54  ;;  %v4021_v54 = vpack.c.bf16 %v1483_v43, %v1482_v12 }
 0x15a   : > { %v1114_v63 = vpop.f32.mrf.mxu2 }
 0x15b   : > { %v1181_v62 = vadd.f32 %v1114_v63, %v931_v48  ;;  %4374 = vst [vmem:[#allocation19_spill] sm:$0xff] %v4021_v54 }
 0x15c   : > { %v1364_v50 = vpop.f32.mrf.mxu3 }
 0x15d   : > { %v1431_v15 = vadd.f32 %v1364_v50, %v1181_v62  ;;  %v982_v62 = vld [vmem:[#allocation2 + $0x152] sm:$0xff]  ;;  %v983_v50 = vld [vmem:[#allocation2 + $0x15a] sm:$0xff] }
 0x15e   : > { %v1619_v0 = vpop.f32.mrf.mxu0 }
 0x15f   : > { %2911 = vmatmul.msk.bf16.gmra.mxu2 %vm362_vm0, %v4007_v9  ;;  %v4015_v38 = vadd.f32 %v1614_v42, %v1431_v15  ;;  %v685_v42 = vadd.f32 %v3858_v35, %v3805_v1 }
 0x160   : > { %v872_v8 = vpop.f32.mrf.mxu1 }
 0x161   : > { %2951 = vmatmul.msk.bf16.gmra.mxu3 %vm362_vm0, %v4009_v39  ;;  %v934_v21 = vadd.f32 %v872_v8, %v684_v20 }
 0x162   : > { %v1117_v53 = vpop.f32.mrf.mxu2 }
 0x163   : > { %v1182_v24 = vadd.f32 %v1117_v53, %v932_v57  ;;  %2872 = vmatmul.msk.bf16.gmra.mxu1 %vm362_vm0, %v3992_v25  ;;  %v4029_v53 = vpack.c.bf16 %v983_v50, %v982_v62  ;;  %v1485_v62 = vld [vmem:[#allocation2 + $0x189] sm:$0xff] }
 0x164   : > { %v1367_v48 = vpop.f32.mrf.mxu3 }
 0x165   : > { %v1432_v63 = vadd.f32 %v1367_v48, %v1182_v24  ;;  %v686_v48 = vadd.f32 %v3858_v35, %v3819_v7 }
 0x166   : > { %v1622_v32 = vpop.f32.mrf.mxu0 }
 0x167   : > { %v4025_v34 = vadd.f32 %v1617_v41, %v1432_v63 }
 0x168   : > { %v874_v20 = vpop.f32.mrf.mxu1 }
 0x169   : > { %2992 = vmatmul.msk.bf16.gmra.mxu0 %vm362_vm0, %v4021_v54  ;;  %v935_v57 = vadd.f32 %v874_v20, %v685_v42 }
 0x16a   : > { %v1119_v15 = vpop.f32.mrf.mxu2 }
 0x16b   : > { %v1183_v8 = vadd.f32 %v1119_v15, %v933_v16  ;;  %v1484_v16 = vld [vmem:[#allocation2 + $0x181] sm:$0xff] }
 0x16c   : > { %v1369_v24 = vpop.f32.mrf.mxu3  ;;  %v4041_v7 = vpack.c.bf16 %v1485_v62, %v1484_v16 }
 0x16d   : > { %v1433_v12 = vadd.f32 %v1369_v24, %v1183_v8 }
 0x16e   : > { %v1624_v43 = vpop.f32.mrf.mxu0 }
 0x16f   : > { %2912 = vmatmul.msk.bf16.gmra.mxu2 %vm362_vm0, %v4029_v53  ;;  %v4035_v1 = vadd.f32 %v1619_v0, %v1433_v12  ;;  %v687_v0 = vadd.f32 %v3858_v35, %v3845_v26  ;;  %v984_v12 = vld [vmem:[#allocation2 + $0x16a] sm:$0xff] }
 0x170   : > { %v877_v41 = vpop.f32.mrf.mxu1 }
 0x171   : > { %4375 = vst [vmem:[#allocation20_spill] sm:$0xff] %v4035_v1  ;;  %2952 = vmatmul.msk.bf16.gmra.mxu3 %vm362_vm0, %v3689_v59  ;;  %v936_v63 = vadd.f32 %v877_v41, %v686_v48  ;;  %v985_v59 = vld [vmem:[#allocation2 + $0x172] sm:$0xff]  ;;  %v1235_v1 = vld [vmem:[#allocation2 + $0x188] sm:$0xff] }
 0x172   : > { %v1122_v42 = vpop.f32.mrf.mxu2 }
 0x173   : > { %v1184_v50 = vadd.f32 %v1122_v42, %v934_v21  ;;  %2873 = vmatmul.msk.bf16.gmra.mxu1 %vm362_vm0, %v4021_v54  ;;  %v1234_v42 = vld [vmem:[#allocation2 + $0x180] sm:$0xff] }
 0x174   : > { %v1372_v20 = vpop.f32.mrf.mxu3 }
 0x175   : > { %v1434_v15 = vadd.f32 %v1372_v20, %v1184_v50  ;;  %v4049_v50 = vpack.c.bf16 %v985_v59, %v984_v12  ;;  %v4051_v20 = vpack.c.bf16 %v1235_v1, %v1234_v42  ;;  %v1956_v42 = vld [vmem:[#allocation2 + $0x38] sm:$0xff] }
 0x176   : > { %v1627_v8 = vpop.f32.mrf.mxu0 }
 0x177   : > { %v4045_v24 = vadd.f32 %v1622_v32, %v1434_v15  ;;  %v688_v32 = vadd.f32 %v3858_v35, %v3767_v40  ;;  %v689_v40 = vadd.f32 %v3858_v35, %v3781_v45 }
 0x178   : > { %v879_v48 = vpop.f32.mrf.mxu1 }
 0x179   : > { %2993 = vmatmul.msk.bf16.gmra.mxu0 %vm362_vm0, %v4041_v7  ;;  %v937_v21 = vadd.f32 %v879_v48, %v687_v0 }
 0x17a   : > { %v1124_v41 = vpop.f32.mrf.mxu2 }
 0x17b   : > { %v1185_v54 = vadd.f32 %v1124_v41, %v935_v57 }
 0x17c   : > { %v1374_v16 = vpop.f32.mrf.mxu3 }
 0x17d   : > { %v1435_v62 = vadd.f32 %v1374_v16, %v1185_v54 }
 0x17e   : > { %v1629_v26 = vpop.f32.mrf.mxu0 }
 0x17f   : > { %2913 = vmatmul.msk.bf16.gmra.mxu2 %vm362_vm0, %v4049_v50  ;;  %v4057_v15 = vadd.f32 %v1624_v43, %v1435_v62  ;;  %v1955_v43 = vld [vmem:[#allocation2 + $0x30] sm:$0xff] }
 0x180   : > { %v882_v0 = vpop.f32.mrf.mxu1 }
 0x181   : > { %4376 = vst [vmem:[#allocation21_spill] sm:$0xff] %v4057_v15  ;;  %2953 = vmatmul.msk.bf16.gmra.mxu3 %vm362_vm0, %v4051_v20  ;;  %v938_v57 = vadd.f32 %v882_v0, %v688_v32  ;;  %v1987_v0 = vpack.c.bf16 %v1956_v42, %v1955_v43 }
 0x182   : > { %v1127_v12 = vpop.f32.mrf.mxu2 }
 0x183   : > { %v1186_v59 = vadd.f32 %v1127_v12, %v936_v63  ;;  %3018 = vmatmul.msk.bf16.vlgmr.msra.gmra.mxu1 %vm362_vm0, %v3705_v11 }
 0x184   : > { %v1377_v54 = vpop.f32.mrf.mxu3 }
 0x185   : > { %v1436_v1 = vadd.f32 %v1377_v54, %v1186_v59  ;;  %v690_v59 = vadd.f32 %v3858_v35, %v3795_v55  ;;  %v691_v55 = vadd.f32 %v3858_v35, %v3809_v3 }
 0x186   : > { %v1632_v48 = vpop.f32.mrf.mxu0 }
 0x187   : > { %v4065_v41 = vadd.f32 %v1627_v8, %v1436_v1 }
 0x188   : > { %v884_v16 = vpop.f32.mrf.mxu1 }
 0x189   : > { %3138 = vmatmul.msk.bf16.vlgmr.msra.gmra.mxu0 %vm362_vm0, %v3716_v17  ;;  %v939_v62 = vadd.f32 %v884_v16, %v689_v40 }
 0x18a   : > { %v1129_v32 = vpop.f32.mrf.mxu2 }
 0x18b   : > { %v1187_v63 = vadd.f32 %v1129_v32, %v937_v21  ;;  %v1958_v32 = vld [vmem:[#allocation2 + $0x50] sm:$0xff] }
 0x18c   : > { %v1379_v12 = vpop.f32.mrf.mxu3 }
 0x18d   : > { %v1437_v11 = vadd.f32 %v1379_v12, %v1187_v63 }
 0x18e   : > { %v1634_v15 = vpop.f32.mrf.mxu0 }
 0x18f   : > { %3058 = vmatmul.msk.bf16.vlgmr.msra.gmra.mxu2 %vm362_vm0, %v1987_v0  ;;  %v4072_v45 = vadd.f32 %v1629_v26, %v1437_v11  ;;  %v1957_v26 = vld [vmem:[#allocation2 + $0x48] sm:$0xff] }
 0x190   : > { %v887_v8 = vpop.f32.mrf.mxu1  ;;  %v1988_v12 = vpack.c.bf16 %v1958_v32, %v1957_v26  ;;  %v1960_v32 = vld [vmem:[#allocation2 + $0x68] sm:$0xff] }
 0x191   : > { %3098 = vmatmul.msk.bf16.vlgmr.msra.gmra.mxu3 %vm362_vm0, %v3701_v6  ;;  %v940_v54 = vadd.f32 %v887_v8, %v690_v59  ;;  %v692_v8 = vadd.f32 %v3858_v35, %v3829_v10  ;;  %v693_v10 = vadd.f32 %v3858_v35, %v3849_v27 }
 0x192   : > { %v1132_v1 = vpop.f32.mrf.mxu2 }
 0x193   : > { %v1188_v40 = vadd.f32 %v1132_v1, %v938_v57  ;;  %3019 = vmatmul.msk.bf16.gmra.mxu1 %vm362_vm0, %v3716_v17 }
 0x194   : > { %v1382_v21 = vpop.f32.mrf.mxu3 }
 0x195   : > { %v1438_v43 = vadd.f32 %v1382_v21, %v1188_v40 }
 0x196   : > { %v1637_v42 = vpop.f32.mrf.mxu0 }
 0x197   : > { %v4080_v16 = vadd.f32 %v1632_v48, %v1438_v43 }
 0x198   : > { %v889_v63 = vpop.f32.mrf.mxu1 }
 0x199   : > { %3139 = vmatmul.msk.bf16.gmra.mxu0 %vm362_vm0, %v3739_v28  ;;  %v941_v6 = vadd.f32 %v889_v63, %v691_v55 }
 0x19a   : > { %v1134_v0 = vpop.f32.mrf.mxu2 }
 0x19b   : > { %v1189_v57 = vadd.f32 %v1134_v0, %v939_v62 }
 0x19c   : > { %v1384_v11 = vpop.f32.mrf.mxu3 }
 0x19d   : > { %v1439_v17 = vadd.f32 %v1384_v11, %v1189_v57 }
 0x19e   : > { %v1639_v59 = vpop.f32.mrf.mxu0 }
 0x19f   : > { %3059 = vmatmul.msk.bf16.gmra.mxu2 %vm362_vm0, %v1988_v12  ;;  %v4087_v3 = vadd.f32 %v1634_v15, %v1439_v17  ;;  %v1959_v15 = vld [vmem:[#allocation2 + $0x60] sm:$0xff]  ;;  %v694_v17 = vadd.f32 %v3858_v35, %v3868_v49  ;;  %v695_v49 = vadd.f32 %v3858_v35, %v3878_v30 }
 0x1a0   : > { %v892_v48 = vpop.f32.mrf.mxu1  ;;  %v1989_v57 = vpack.c.bf16 %v1960_v32, %v1959_v15 }
 0x1a1   : > { %3099 = vmatmul.msk.bf16.gmra.mxu3 %vm362_vm0, %v3712_v13  ;;  %v942_v1 = vadd.f32 %v892_v48, %v692_v8 }
 0x1a2   : > { %v1137_v40 = vpop.f32.mrf.mxu2 }
 0x1a3   : > { %v1190_v21 = vadd.f32 %v1137_v40, %v940_v54  ;;  %3020 = vmatmul.msk.bf16.gmra.mxu1 %vm362_vm0, %v3739_v28 }
 0x1a4   : > { %v1387_v62 = vpop.f32.mrf.mxu3 }
 0x1a5   : > { %v1440_v43 = vadd.f32 %v1387_v62, %v1190_v21 }
 0x1a6   : > { %v1642_v55 = vpop.f32.mrf.mxu0 }
 0x1a7   : > { %v4095_v26 = vadd.f32 %v1637_v42, %v1440_v43 }
 0x1a8   : > { %v894_v63 = vpop.f32.mrf.mxu1 }
 0x1a9   : > { %3140 = vmatmul.msk.bf16.gmra.mxu0 %vm362_vm0, %v3757_v37  ;;  %v943_v13 = vadd.f32 %v894_v63, %v693_v10  ;;  %v1962_v10 = vld [vmem:[#allocation2 + $0x80] sm:$0xff] }
 0x1aa   : > { %v1139_v0 = vpop.f32.mrf.mxu2 }
 0x1ab   : > { %v1191_v54 = vadd.f32 %v1139_v0, %v941_v6 }
 0x1ac   : > { %v1389_v12 = vpop.f32.mrf.mxu3 }
 0x1ad   : > { %v1441_v28 = vadd.f32 %v1389_v12, %v1191_v54 }
 0x1ae   : > { %v1644_v11 = vpop.f32.mrf.mxu0 }
 0x1af   : > { %3060 = vmatmul.msk.bf16.gmra.mxu2 %vm362_vm0, %v1989_v57  ;;  %v4102_v27 = vadd.f32 %v1639_v59, %v1441_v28  ;;  %v1961_v59 = vld [vmem:[#allocation2 + $0x78] sm:$0xff]  ;;  %v696_v57 = vadd.f32 %v3858_v35, %v3771_v44  ;;  %v697_v44 = vadd.f32 %v3858_v35, %v3785_v52 }
 0x1b0   : > { %v897_v42 = vpop.f32.mrf.mxu1  ;;  %v1990_v63 = vpack.c.bf16 %v1962_v10, %v1961_v59 }
 0x1b1   : > { %3100 = vmatmul.msk.bf16.gmra.mxu3 %vm362_vm0, %v3729_v22  ;;  %v944_v8 = vadd.f32 %v897_v42, %v694_v17 }
 0x1b2   : > { %v1142_v48 = vpop.f32.mrf.mxu2 }
 0x1b3   : > { %v1192_v40 = vadd.f32 %v1142_v48, %v942_v1  ;;  %3021 = vmatmul.msk.bf16.gmra.mxu1 %vm362_vm0, %v3757_v37 }
 0x1b4   : > { %v1392_v6 = vpop.f32.mrf.mxu3 }
 0x1b5   : > { %v1442_v21 = vadd.f32 %v1392_v6, %v1192_v40  ;;  %v1964_v6 = vld [vmem:[#allocation2 + $0x98] sm:$0xff] }
 0x1b6   : > { %v1647_v62 = vpop.f32.mrf.mxu0 }
 0x1b7   : > { %v4110_v43 = vadd.f32 %v1642_v55, %v1442_v21 }
 0x1b8   : > { %v899_v15 = vpop.f32.mrf.mxu1 }
 0x1b9   : > { %3141 = vmatmul.msk.bf16.gmra.mxu0 %vm362_vm0, %v3783_v51  ;;  %v945_v22 = vadd.f32 %v899_v15, %v695_v49 }
 0x1ba   : > { %v1144_v32 = vpop.f32.mrf.mxu2 }
 0x1bb   : > { %v1193_v1 = vadd.f32 %v1144_v32, %v943_v13  ;;  %v698_v32 = vadd.f32 %v3858_v35, %v3799_v60  ;;  %v699_v60 = vadd.f32 %v3858_v35, %v3813_v4 }
 0x1bc   : > { %v1394_v0 = vpop.f32.mrf.mxu3 }
 0x1bd   : > { %v1443_v37 = vadd.f32 %v1394_v0, %v1193_v1 }
 0x1be   : > { %v1649_v54 = vpop.f32.mrf.mxu0 }
 0x1bf   : > { %3061 = vmatmul.msk.bf16.gmra.mxu2 %vm362_vm0, %v1990_v63  ;;  %v4117_v30 = vadd.f32 %v1644_v11, %v1443_v37  ;;  %v1963_v11 = vld [vmem:[#allocation2 + $0x90] sm:$0xff] }
 0x1c0   : > { %v902_v55 = vpop.f32.mrf.mxu1  ;;  %v1991_v59 = vpack.c.bf16 %v1964_v6, %v1963_v11  ;;  %v700_v6 = vadd.f32 %v3858_v35, %v3833_v18 }
 0x1c1   : > { %3101 = vmatmul.msk.bf16.gmra.mxu3 %vm362_vm0, %v3751_v33  ;;  %v946_v12 = vadd.f32 %v902_v55, %v696_v57 }
 0x1c2   : > { %v1147_v28 = vpop.f32.mrf.mxu2 }
 0x1c3   : > { %v1194_v17 = vadd.f32 %v1147_v28, %v944_v8  ;;  %3022 = vmatmul.msk.bf16.gmra.mxu1 %vm362_vm0, %v3783_v51  ;;  %v1966_v28 = vld [vmem:[#allocation2 + $0xb0] sm:$0xff] }
 0x1c4   : > { %v1397_v13 = vpop.f32.mrf.mxu3 }
 0x1c5   : > { %v1444_v42 = vadd.f32 %v1397_v13, %v1194_v17 }
 0x1c6   : > { %v1652_v48 = vpop.f32.mrf.mxu0 }
 0x1c7   : > { %v4125_v40 = vadd.f32 %v1647_v62, %v1444_v42 }
 0x1c8   : > { %v904_v21 = vpop.f32.mrf.mxu1 }
 0x1c9   : > { %3142 = vmatmul.msk.bf16.gmra.mxu0 %vm362_vm0, %v3811_v2  ;;  %v947_v33 = vadd.f32 %v904_v21, %v697_v44 }
 0x1ca   : > { %v1149_v49 = vpop.f32.mrf.mxu2 }
 0x1cb   : > { %v1195_v8 = vadd.f32 %v1149_v49, %v945_v22 }
 0x1cc   : > { %v1399_v10 = vpop.f32.mrf.mxu3 }
 0x1cd   : > { %v1445_v51 = vadd.f32 %v1399_v10, %v1195_v8 }
 0x1ce   : > { %v1654_v15 = vpop.f32.mrf.mxu0 }
 0x1cf   : > { %3062 = vmatmul.msk.bf16.gmra.mxu2 %vm362_vm0, %v1991_v59  ;;  %v4132_v52 = vadd.f32 %v1649_v54, %v1445_v51  ;;  %v1965_v54 = vld [vmem:[#allocation2 + $0xa8] sm:$0xff]  ;;  %v4377_v51 = vld [vmem:[#allocation4_spill] sm:$0xff] }
 0x1d0   : > { %v907_v62 = vpop.f32.mrf.mxu1  ;;  %v1992_v42 = vpack.c.bf16 %v1966_v28, %v1965_v54  ;;  %v701_v18 = vadd.f32 %v3858_v35, %v4377_v51  ;;  %v4379_v28 = vld [vmem:[#allocation5_spill] sm:$0xff] }
 0x1d1   : > { %3102 = vmatmul.msk.bf16.gmra.mxu3 %vm362_vm0, %v3773_v46  ;;  %v948_v1 = vadd.f32 %v907_v62, %v698_v32  ;;  %v1968_v62 = vld [vmem:[#allocation2 + $0xc8] sm:$0xff] }
 0x1d2   : > { %v1152_v63 = vpop.f32.mrf.mxu2 }
 0x1d3   : > { %v1196_v0 = vadd.f32 %v1152_v63, %v946_v12  ;;  %3023 = vmatmul.msk.bf16.gmra.mxu1 %vm362_vm0, %v3811_v2 }
 0x1d4   : > { %v1402_v22 = vpop.f32.mrf.mxu3 }
 0x1d5   : > { %v1446_v37 = vadd.f32 %v1402_v22, %v1196_v0  ;;  %v4378_v0 = vld [vmem:[#allocation7_spill] sm:$0xff] }
 0x1d6   : > { %v1657_v57 = vpop.f32.mrf.mxu0 }
 0x1d7   : > { %v4140_v55 = vadd.f32 %v1652_v48, %v1446_v37 }
 0x1d8   : > { %v909_v17 = vpop.f32.mrf.mxu1 }
 0x1d9   : > { %3143 = vmatmul.msk.bf16.gmra.mxu0 %vm362_vm0, %v3851_v31  ;;  %v949_v46 = vadd.f32 %v909_v17, %v699_v60  ;;  %v702_v17 = vadd.f32 %v3858_v35, %v4379_v28 }
 0x1da   : > { %v1154_v13 = vpop.f32.mrf.mxu2 }
 0x1db   : > { %v1197_v12 = vadd.f32 %v1154_v13, %v947_v33 }
 0x1dc   : > { %v1404_v44 = vpop.f32.mrf.mxu3 }
 0x1dd   : > { %v1447_v2 = vadd.f32 %v1404_v44, %v1197_v12  ;;  %v4380_v12 = vld [vmem:[#allocation3_spill] sm:$0xff] }
 0x1de   : > { %v1659_v11 = vpop.f32.mrf.mxu0 }
 0x1df   : > { %3063 = vmatmul.msk.bf16.gmra.mxu2 %vm362_vm0, %v1992_v42  ;;  %v4147_v4 = vadd.f32 %v1654_v15, %v1447_v2  ;;  %v1967_v15 = vld [vmem:[#allocation2 + $0xc0] sm:$0xff] }
 0x1e0   : > { %v912_v48 = vpop.f32.mrf.mxu1  ;;  %v1993_v37 = vpack.c.bf16 %v1968_v62, %v1967_v15 }
 0x1e1   : > { %3103 = vmatmul.msk.bf16.gmra.mxu3 %vm362_vm0, %v3801_v61  ;;  %v950_v21 = vadd.f32 %v912_v48, %v700_v6 }
 0x1e2   : > { %v1157_v49 = vpop.f32.mrf.mxu2 }
 0x1e3   : > { %v1198_v8 = vadd.f32 %v1157_v49, %v948_v1  ;;  %3024 = vmatmul.msk.bf16.gmra.mxu1 %vm362_vm0, %v3851_v31  ;;  %v4381_v49 = vld [vmem:[#allocation8_spill] sm:$0xff] }
 0x1e4   : > { %v1407_v33 = vpop.f32.mrf.mxu3 }
 0x1e5   : > { %v1448_v59 = vadd.f32 %v1407_v33, %v1198_v8  ;;  %v703_v8 = vadd.f32 %v3858_v35, %v4381_v49 }
 0x1e6   : > { %v1662_v10 = vpop.f32.mrf.mxu0 }
 0x1e7   : > { %v4155_v32 = vadd.f32 %v1657_v57, %v1448_v59  ;;  %v1970_v59 = vld [vmem:[#allocation2 + $0xe0] sm:$0xff] }
 0x1e8   : > { %v914_v63 = vpop.f32.mrf.mxu1 }
 0x1e9   : > { %3144 = vmatmul.msk.bf16.gmra.mxu0 %vm362_vm0, %v4378_v0  ;;  %v951_v61 = vadd.f32 %v914_v63, %v701_v18 }
 0x1ea   : > { %v1159_v22 = vpop.f32.mrf.mxu2 }
 0x1eb   : > { %v1199_v1 = vadd.f32 %v1159_v22, %v949_v46 }
 0x1ec   : > { %v1409_v60 = vpop.f32.mrf.mxu3 }
 0x1ed   : > { %v1449_v31 = vadd.f32 %v1409_v60, %v1199_v1 }
 0x1ee   : > { %v1664_v54 = vpop.f32.mrf.mxu0 }
 0x1ef   : > { %3064 = vmatmul.msk.bf16.gmra.mxu2 %vm362_vm0, %v1993_v37  ;;  %v4162_v57 = vadd.f32 %v1659_v11, %v1449_v31  ;;  %v1969_v11 = vld [vmem:[#allocation2 + $0xd8] sm:$0xff] }
 0x1f0   : > { %v917_v13 = vpop.f32.mrf.mxu1  ;;  %v1994_v62 = vpack.c.bf16 %v1970_v59, %v1969_v11 }
 0x1f1   : > { %3104 = vmatmul.msk.bf16.gmra.mxu3 %vm362_vm0, %v4380_v12  ;;  %v952_v42 = vadd.f32 %v917_v13, %v702_v17  ;;  %v1971_v13 = vld [vmem:[#allocation2 + $0xf0] sm:$0xff]  ;;  %v1972_v12 = vld [vmem:[#allocation2 + $0xf8] sm:$0xff] }
 0x1f2   : > { %v1162_v44 = vpop.f32.mrf.mxu2 }
 0x1f3   : > { %v1200_v2 = vadd.f32 %v1162_v44, %v950_v21  ;;  %3025 = vmatmul.msk.bf16.gmra.mxu1 %vm362_vm0, %v4378_v0 }
 0x1f4   : > { %v1412_v46 = vpop.f32.mrf.mxu3 }
 0x1f5   : > { %v1450_v6 = vadd.f32 %v1412_v46, %v1200_v2  ;;  %v1995_v46 = vpack.c.bf16 %v1972_v12, %v1971_v13  ;;  %v4384_v13 = vld [vmem:[#allocation9_spill] sm:$0xff] }
 0x1f6   : > { %v1667_v48 = vpop.f32.mrf.mxu0 }
 0x1f7   : > { %v4170_v33 = vadd.f32 %v1662_v10, %v1450_v6  ;;  %v4382_v10 = vld [vmem:[#allocation6_spill] sm:$0xff] }
 0x1f8   : > { %v919_v51 = vpop.f32.mrf.mxu1 }
 0x1f9   : > { %3145 = vmatmul.msk.bf16.gmra.mxu0 %vm362_vm0, %v3902_v58  ;;  %v953_v18 = vadd.f32 %v919_v51, %v703_v8 }
 0x1fa   : > { %v1164_v15 = vpop.f32.mrf.mxu2 }
 0x1fb   : > { %v1201_v21 = vadd.f32 %v1164_v15, %v951_v61 }
 0x1fc   : > { %v1414_v63 = vpop.f32.mrf.mxu3 }
 0x1fd   : > { %v1451_v0 = vadd.f32 %v1414_v63, %v1201_v21  ;;  %v1973_v21 = vld [vmem:[#allocation2 + $0x108] sm:$0xff] }
 0x1fe   : > { %v1669_v22 = vpop.f32.mrf.mxu0 }
 0x1ff   : > { %3065 = vmatmul.msk.bf16.gmra.mxu2 %vm362_vm0, %v1994_v62  ;;  %v4175_v1 = vadd.f32 %v1664_v54, %v1451_v0 }
 0x200   : > { %v1842_v35 = vpop.f32.mrf.mxu1 }
 0x201   : > { %3105 = vmatmul.msk.bf16.gmra.mxu3 %vm362_vm0, %v4382_v10 }
 0x202   : > { %v1167_v37 = vpop.f32.mrf.mxu2 }
 0x203   : > { %v1202_v60 = vadd.f32 %v1167_v37, %v952_v42  ;;  %3026 = vmatmul.msk.bf16.gmra.mxu1 %vm362_vm0, %v3902_v58 }
 0x204   : > { %v1417_v31 = vpop.f32.mrf.mxu3 }
 0x205   : > { %v1452_v28 = vadd.f32 %v1417_v31, %v1202_v60 }
 0x206   : > { %v2593_v61 = vpop.f32.mrf.mxu0 }
 0x207   : > { %v4181_v17 = vadd.f32 %v1667_v48, %v1452_v28  ;;  %v1922_v48 = vadd.f32 %v1842_v35, %v3898_v23  ;;  %v4383_v28 = vld [vmem:[#allocation10_spill] sm:$0xff] }
 0x208   : > { %v1844_v44 = vpop.f32.mrf.mxu1 }
 0x209   : > { %3146 = vmatmul.msk.bf16.gmra.mxu0 %vm362_vm0, %v3922_v14  ;;  %v1923_v63 = vadd.f32 %v1844_v44, %v3908_v29 }
 0x20a   : > { %v1169_v54 = vpop.f32.mrf.mxu2 }
 0x20b   : > { %v1203_v2 = vadd.f32 %v1169_v54, %v953_v18 }
 0x20c   : > { %v1419_v6 = vpop.f32.mrf.mxu3 }
 0x20d   : > { %v1453_v42 = vadd.f32 %v1419_v6, %v1203_v2 }
 0x20e   : > { %v2595_v49 = vpop.f32.mrf.mxu0 }
 0x20f   : > { %3066 = vmatmul.msk.bf16.gmra.mxu2 %vm362_vm0, %v1995_v46  ;;  %v4186_v58 = vadd.f32 %v1669_v22, %v1453_v42  ;;  %v4385_v42 = vld [vmem:[#allocation11_spill] sm:$0xff] }
 0x210   : > { %v1847_v8 = vpop.f32.mrf.mxu1 }
 0x211   : > { %3106 = vmatmul.msk.bf16.gmra.mxu3 %vm362_vm0, %v3892_v19  ;;  %v1974_v19 = vld [vmem:[#allocation2 + $0x110] sm:$0xff] }
 0x212   : > { %v2093_v11 = vpop.f32.mrf.mxu2  ;;  %v1996_v22 = vpack.c.bf16 %v1974_v19, %v1973_v21  ;;  %v4387_v21 = vld [vmem:[#allocation12_spill] sm:$0xff] }
 0x213   : > { %v2173_v59 = vadd.f32 %v2093_v11, %v1922_v48  ;;  %3027 = vmatmul.msk.bf16.gmra.mxu1 %vm362_vm0, %v3922_v14 }
 0x214   : > { %v2343_v51 = vpop.f32.mrf.mxu3 }
 0x215   : > { %v2423_v18 = vadd.f32 %v2343_v51, %v2173_v59 }
 0x216   : > { %v2598_v15 = vpop.f32.mrf.mxu0 }
 0x217   : > { %v2673_v23 = vadd.f32 %v2593_v61, %v2423_v18  ;;  %v1924_v61 = vadd.f32 %v1847_v8, %v4383_v28 }
 0x218   : > { %v1849_v62 = vpop.f32.mrf.mxu1 }
 0x219   : > { %2706 = vst.msk [vmem:[%s4197_s17] sm:$0xff] %vm2705_vm2, %v2673_v23  ;;  %3147 = vmatmul.msk.bf16.gmra.mxu0 %vm362_vm0, %v3954_v5 }
 0x21a   : > { %v2095_v14 = vpop.f32.mrf.mxu2 }
 0x21b   : > { %v2174_v0 = vadd.f32 %v2095_v14, %v1923_v63 }
 0x21c   : > { %v2345_v35 = vpop.f32.mrf.mxu3 }
 0x21d   : > { %v2424_v10 = vadd.f32 %v2345_v35, %v2174_v0 }
 0x21e   : > { %v2600_v37 = vpop.f32.mrf.mxu0 }
 0x21f   : > { %v2674_v60 = vadd.f32 %v2595_v49, %v2424_v10  ;;  %3067 = vmatmul.msk.bf16.gmra.mxu2 %vm362_vm0, %v1996_v22  ;;  %v1925_v49 = vadd.f32 %v1849_v62, %v4385_v42 }
 0x220   : > { %v1852_v31 = vpop.f32.mrf.mxu1 }
 0x221   : > { %2707 = vst.msk [vmem:[%s4197_s17 + $0x8] sm:$0xff] %vm2705_vm2, %v2674_v60  ;;  %3107 = vmatmul.msk.bf16.gmra.mxu3 %vm362_vm0, %v4384_v13 }
 0x222   : > { %v2098_v29 = vpop.f32.mrf.mxu2 }
 0x223   : > { %v2175_v12 = vadd.f32 %v2098_v29, %v1924_v61  ;;  %3028 = vmatmul.msk.bf16.gmra.mxu1 %vm362_vm0, %v3954_v5  ;;  %v4389_v29 = vld [vmem:[#allocation16_spill] sm:$0xff] }
 0x224   : > { %v2348_v44 = vpop.f32.mrf.mxu3 }
 0x225   : > { %v2425_v54 = vadd.f32 %v2348_v44, %v2175_v12  ;;  %v4390_v44 = vld [vmem:[#allocation15_spill] sm:$0xff] }
 0x226   : > { %v2603_v2 = vpop.f32.mrf.mxu0 }
 0x227   : > { %v2675_v46 = vadd.f32 %v2598_v15, %v2425_v54  ;;  %v4386_v15 = vld [vmem:[#allocation13_spill] sm:$0xff] }
 0x228   : > { %v1854_v6 = vpop.f32.mrf.mxu1  ;;  %v1926_v23 = vadd.f32 %v1852_v31, %v4386_v15 }
 0x229   : > { %2708 = vst.msk [vmem:[%s4197_s17 + $0x10] sm:$0xff] %vm2705_vm2, %v2675_v46  ;;  %3148 = vmatmul.msk.bf16.gmra.mxu0 %vm362_vm0, %v3974_v56 }
 0x22a   : > { %v2100_v8 = vpop.f32.mrf.mxu2 }
 0x22b   : > { %v2176_v48 = vadd.f32 %v2100_v8, %v1925_v49 }
 0x22c   : > { %v2350_v11 = vpop.f32.mrf.mxu3 }
 0x22d   : > { %v2426_v59 = vadd.f32 %v2350_v11, %v2176_v48 }
 0x22e   : > { %v2605_v51 = vpop.f32.mrf.mxu0 }
 0x22f   : > { %v2676_v5 = vadd.f32 %v2600_v37, %v2426_v59  ;;  %3068 = vmatmul.msk.bf16.gmra.mxu2 %vm362_vm0, %v3956_v36  ;;  %v4388_v36 = vld [vmem:[#allocation14_spill] sm:$0xff] }
 0x230   : > { %v1857_v18 = vpop.f32.mrf.mxu1  ;;  %v1927_v10 = vadd.f32 %v1854_v6, %v4388_v36 }
 0x231   : > { %2709 = vst.msk [vmem:[%s4197_s17 + $0x18] sm:$0xff] %vm2705_vm2, %v2676_v5  ;;  %3108 = vmatmul.msk.bf16.gmra.mxu3 %vm362_vm0, %v4387_v21  ;;  %v1928_v12 = vadd.f32 %v1857_v18, %v4389_v29  ;;  %v4393_v29 = vld [vmem:[#allocation19_spill] sm:$0xff] }
 0x232   : > { %v2103_v19 = vpop.f32.mrf.mxu2 }
 0x233   : > { %v2177_v62 = vadd.f32 %v2103_v19, %v1926_v23  ;;  %3029 = vmatmul.msk.bf16.gmra.mxu1 %vm362_vm0, %v3974_v56  ;;  %v4392_v23 = vld [vmem:[#allocation18_spill] sm:$0xff] }
 0x234   : > { %v2353_v63 = vpop.f32.mrf.mxu3 }
 0x235   : > { %v2427_v14 = vadd.f32 %v2353_v63, %v2177_v62 }
 0x236   : > { %v2608_v0 = vpop.f32.mrf.mxu0 }
 0x237   : > { %v2677_v22 = vadd.f32 %v2603_v2, %v2427_v14 }
 0x238   : > { %v1859_v35 = vpop.f32.mrf.mxu1 }
 0x239   : > { %2710 = vst.msk [vmem:[%s4197_s17 + $0x20] sm:$0xff] %vm2705_vm2, %v2677_v22  ;;  %3149 = vmatmul.msk.bf16.gmra.mxu0 %vm362_vm0, %v4007_v9 }
 0x23a   : > { %v2105_v37 = vpop.f32.mrf.mxu2 }
 0x23b   : > { %v2178_v60 = vadd.f32 %v2105_v37, %v1927_v10 }
 0x23c   : > { %v2355_v31 = vpop.f32.mrf.mxu3 }
 0x23d   : > { %v2428_v28 = vadd.f32 %v2355_v31, %v2178_v60 }
 0x23e   : > { %v2610_v61 = vpop.f32.mrf.mxu0 }
 0x23f   : > { %v2678_v56 = vadd.f32 %v2605_v51, %v2428_v28  ;;  %3069 = vmatmul.msk.bf16.gmra.mxu2 %vm362_vm0, %v3976_v47  ;;  %v4391_v47 = vld [vmem:[#allocation17_spill] sm:$0xff] }
 0x240   : > { %v1862_v13 = vpop.f32.mrf.mxu1  ;;  %v1929_v48 = vadd.f32 %v1859_v35, %v4391_v47  ;;  %v1981_v35 = vld [vmem:[#allocation2 + $0x168] sm:$0xff] }
 0x241   : > { %2711 = vst.msk [vmem:[%s4197_s17 + $0x28] sm:$0xff] %vm2705_vm2, %v2678_v56  ;;  %3109 = vmatmul.msk.bf16.gmra.mxu3 %vm362_vm0, %v4390_v44  ;;  %v1930_v21 = vadd.f32 %v1862_v13, %v4392_v23  ;;  %v2484_v44 = vld [vmem:[#allocation2 + $0x18a] sm:$0xff]  ;;  %v2485_v23 = vld [vmem:[#allocation2 + $0x19a] sm:$0xff] }
 0x242   : > { %v2108_v54 = vpop.f32.mrf.mxu2 }
 0x243   : > { %v2179_v2 = vadd.f32 %v2108_v54, %v1928_v12  ;;  %3030 = vmatmul.msk.bf16.gmra.mxu1 %vm362_vm0, %v4007_v9  ;;  %v2483_v12 = vld [vmem:[#allocation2 + $0x182] sm:$0xff] }
 0x244   : > { %v2358_v46 = vpop.f32.mrf.mxu3 }
 0x245   : > { %v2429_v6 = vadd.f32 %v2358_v46, %v2179_v2 }
 0x246   : > { %v2613_v42 = vpop.f32.mrf.mxu0 }
 0x247   : > { %v2679_v49 = vadd.f32 %v2608_v0, %v2429_v6  ;;  %v2501_v6 = vpack.c.bf16 %v2484_v44, %v2483_v12 }
 0x248   : > { %v1864_v8 = vpop.f32.mrf.mxu1 }
 0x249   : > { %2712 = vst.msk [vmem:[%s4197_s17 + $0x30] sm:$0xff] %vm2705_vm2, %v2679_v49  ;;  %3150 = vmatmul.msk.bf16.gmra.mxu0 %vm362_vm0, %v4029_v53  ;;  %v1931_v10 = vadd.f32 %v1864_v8, %v4015_v38 }
 0x24a   : > { %v2110_v11 = vpop.f32.mrf.mxu2 }
 0x24b   : > { %v2180_v59 = vadd.f32 %v2110_v11, %v1929_v48 }
 0x24c   : > { %v2360_v51 = vpop.f32.mrf.mxu3 }
 0x24d   : > { %v2430_v5 = vadd.f32 %v2360_v51, %v2180_v59 }
 0x24e   : > { %v2615_v18 = vpop.f32.mrf.mxu0 }
 0x24f   : > { %v2680_v15 = vadd.f32 %v2610_v61, %v2430_v5  ;;  %3070 = vmatmul.msk.bf16.gmra.mxu2 %vm362_vm0, %v4009_v39  ;;  %v1982_v39 = vld [vmem:[#allocation2 + $0x170] sm:$0xff] }
 0x250   : > { %v1867_v9 = vpop.f32.mrf.mxu1  ;;  %v2000_v60 = vpack.c.bf16 %v1982_v39, %v1981_v35  ;;  %v1986_v35 = vld [vmem:[#allocation2 + $0x1a0] sm:$0xff] }
 0x251   : > { %2713 = vst.msk [vmem:[%s4197_s17 + $0x38] sm:$0xff] %vm2705_vm2, %v2680_v15  ;;  %3110 = vmatmul.msk.bf16.gmra.mxu3 %vm362_vm0, %v3992_v25  ;;  %v1932_v13 = vadd.f32 %v1867_v9, %v4025_v34  ;;  %v4394_v34 = vld [vmem:[#allocation20_spill] sm:$0xff] }
 0x252   : > { %v2113_v19 = vpop.f32.mrf.mxu2 }
 0x253   : > { %v2181_v62 = vadd.f32 %v2113_v19, %v1930_v21  ;;  %3031 = vmatmul.msk.bf16.gmra.mxu1 %vm362_vm0, %v4029_v53  ;;  %v2486_v21 = vld [vmem:[#allocation2 + $0x1a2] sm:$0xff] }
 0x254   : > { %v2363_v63 = vpop.f32.mrf.mxu3 }
 0x255   : > { %v2431_v14 = vadd.f32 %v2363_v63, %v2181_v62 }
 0x256   : > { %v2618_v0 = vpop.f32.mrf.mxu0 }
 0x257   : > { %v2681_v22 = vadd.f32 %v2613_v42, %v2431_v14  ;;  %v2502_v14 = vpack.c.bf16 %v2486_v21, %v2485_v23 }
 0x258   : > { %v1869_v36 = vpop.f32.mrf.mxu1 }
 0x259   : > { %2714 = vst.msk [vmem:[%s4197_s17 + $0x40] sm:$0xff] %vm2705_vm2, %v2681_v22  ;;  %3151 = vmatmul.msk.bf16.gmra.mxu0 %vm362_vm0, %v4049_v50  ;;  %v1933_v47 = vadd.f32 %v1869_v36, %v4394_v34  ;;  %v1985_v22 = vld [vmem:[#allocation2 + $0x198] sm:$0xff] }
 0x25a   : > { %v2115_v25 = vpop.f32.mrf.mxu2 }
 0x25b   : > { %v2182_v37 = vadd.f32 %v2115_v25, %v1931_v10  ;;  %v2235_v10 = vld [vmem:[#allocation2 + $0x199] sm:$0xff]  ;;  %v2236_v25 = vld [vmem:[#allocation2 + $0x1a1] sm:$0xff] }
 0x25c   : > { %v2365_v31 = vpop.f32.mrf.mxu3 }
 0x25d   : > { %v2432_v53 = vadd.f32 %v2365_v31, %v2182_v37 }
 0x25e   : > { %v2620_v28 = vpop.f32.mrf.mxu0 }
 0x25f   : > { %v2682_v61 = vadd.f32 %v2615_v18, %v2432_v53  ;;  %3071 = vmatmul.msk.bf16.gmra.mxu2 %vm362_vm0, %v2000_v60  ;;  %v2002_v60 = vpack.c.bf16 %v1986_v35, %v1985_v22 }
 0x260   : > { %v1872_v56 = vpop.f32.mrf.mxu1 }
 0x261   : > { %2715 = vst.msk [vmem:[%s4197_s17 + $0x48] sm:$0xff] %vm2705_vm2, %v2682_v61  ;;  %3111 = vmatmul.msk.bf16.gmra.mxu3 %vm362_vm0, %v4393_v29  ;;  %v1934_v15 = vadd.f32 %v1872_v56, %v4045_v24  ;;  %v4395_v24 = vld [vmem:[#allocation21_spill] sm:$0xff] }
 0x262   : > { %v2118_v38 = vpop.f32.mrf.mxu2 }
 0x263   : > { %v2183_v54 = vadd.f32 %v2118_v38, %v1932_v13  ;;  %3032 = vmatmul.msk.bf16.gmra.mxu1 %vm362_vm0, %v4049_v50 }
 0x264   : > { %v2368_v2 = vpop.f32.mrf.mxu3 }
 0x265   : > { %v2433_v46 = vadd.f32 %v2368_v2, %v2183_v54 }
 0x266   : > { %v2623_v42 = vpop.f32.mrf.mxu0 }
 0x267   : > { %v2683_v49 = vadd.f32 %v2618_v0, %v2433_v46 }
 0x268   : > { %v1874_v8 = vpop.f32.mrf.mxu1 }
 0x269   : > { %2716 = vst.msk [vmem:[%s4197_s17 + $0x50] sm:$0xff] %vm2705_vm2, %v2683_v49  ;;  %3152 = vmatmul.msk.bf16.gmra.mxu0 %vm362_vm0, %v2501_v6  ;;  %v1935_v36 = vadd.f32 %v1874_v8, %v4395_v24 }
 0x26a   : > { %v2120_v48 = vpop.f32.mrf.mxu2 }
 0x26b   : > { %v2184_v11 = vadd.f32 %v2120_v48, %v1933_v47 }
 0x26c   : > { %v2370_v59 = vpop.f32.mrf.mxu3 }
 0x26d   : > { %v2434_v51 = vadd.f32 %v2370_v59, %v2184_v11 }
 0x26e   : > { %v2625_v5 = vpop.f32.mrf.mxu0 }
 0x26f   : > { %v2684_v18 = vadd.f32 %v2620_v28, %v2434_v51  ;;  %3072 = vmatmul.msk.bf16.gmra.mxu2 %vm362_vm0, %v4051_v20  ;;  %v2252_v28 = vpack.c.bf16 %v2236_v25, %v2235_v10 }
 0x270   : > { %v1877_v50 = vpop.f32.mrf.mxu1 }
 0x271   : > { %2717 = vst.msk [vmem:[%s4197_s17 + $0x58] sm:$0xff] %vm2705_vm2, %v2684_v18  ;;  %3112 = vmatmul.msk.bf16.gmra.mxu3 %vm362_vm0, %v4041_v7  ;;  %v1936_v29 = vadd.f32 %v1877_v50, %v4065_v41 }
 0x272   : > { %v2123_v9 = vpop.f32.mrf.mxu2 }
 0x273   : > { %v2185_v19 = vadd.f32 %v2123_v9, %v1934_v15  ;;  %3033 = vmatmul.msk.bf16.gmra.mxu1 %vm362_vm0, %v2501_v6 }
 0x274   : > { %v2373_v62 = vpop.f32.mrf.mxu3 }
 0x275   : > { %v2435_v63 = vadd.f32 %v2373_v62, %v2185_v19 }
 0x276   : > { %v2628_v0 = vpop.f32.mrf.mxu0 }
 0x277   : > { %v2685_v20 = vadd.f32 %v2623_v42, %v2435_v63 }
 0x278   : > { %v1879_v39 = vpop.f32.mrf.mxu1 }
 0x279   : > { %2718 = vst.msk [vmem:[%s4197_s17 + $0x60] sm:$0xff] %vm2705_vm2, %v2685_v20  ;;  %3153 = vmatmul.msk.bf16.gmra.mxu0 %vm362_vm0, %v2502_v14  ;;  %v1937_v42 = vadd.f32 %v1879_v39, %v4072_v45 }
 0x27a   : > { %v2125_v7 = vpop.f32.mrf.mxu2 }
 0x27b   : > { %v2186_v37 = vadd.f32 %v2125_v7, %v1935_v36 }
 0x27c   : > { %v2375_v31 = vpop.f32.mrf.mxu3 }
 0x27d   : > { %v2436_v53 = vadd.f32 %v2375_v31, %v2186_v37 }
 0x27e   : > { %v2630_v61 = vpop.f32.mrf.mxu0 }
 0x27f   : > { %v2686_v56 = vadd.f32 %v2625_v5, %v2436_v53  ;;  %3073 = vmatmul.msk.bf16.gmra.mxu2 %vm362_vm0, %v2002_v60 }
 0x280   : > { %v1882_v13 = vpop.f32.mrf.mxu1 }
 0x281   : > { %2719 = vst.msk [vmem:[%s4197_s17 + $0x68] sm:$0xff] %vm2705_vm2, %v2686_v56  ;;  %3113 = vmatmul.msk.bf16.gmra.mxu3 %vm362_vm0, %v2252_v28  ;;  %v1938_v59 = vadd.f32 %v1882_v13, %v4080_v16 }
 0x282   : > { %v2128_v38 = vpop.f32.mrf.mxu2 }
 0x283   : > { %v2187_v12 = vadd.f32 %v2128_v38, %v1936_v29 }
 0x284   : > { %v2378_v44 = vpop.f32.mrf.mxu3 }
 0x285   : > { %v2437_v54 = vadd.f32 %v2378_v44, %v2187_v12 }
 0x286   : > { %v2633_v2 = vpop.f32.mrf.mxu0 }
 0x287   : > { %v2687_v46 = vadd.f32 %v2628_v0, %v2437_v54 }
 0x288   : > { %v1884_v6 = vpop.f32.mrf.mxu1 }
 0x289   : > { %2720 = vst.msk [vmem:[%s4197_s17 + $0x70] sm:$0xff] %vm2705_vm2, %v2687_v46  ;;  %v1939_v23 = vadd.f32 %v1884_v6, %v4087_v3 }
 0x28a   : > { %v2130_v49 = vpop.f32.mrf.mxu2 }
 0x28b   : > { %v2188_v8 = vadd.f32 %v2130_v49, %v1937_v42 }
 0x28c   : > { %v2380_v34 = vpop.f32.mrf.mxu3 }
 0x28d   : > { %v2438_v47 = vadd.f32 %v2380_v34, %v2188_v8 }
 0x28e   : > { %v2635_v41 = vpop.f32.mrf.mxu0 }
 0x28f   : > { %v2688_v48 = vadd.f32 %v2630_v61, %v2438_v47 }
 0x290   : > { %v1887_v11 = vpop.f32.mrf.mxu1 }
 0x291   : > { %2721 = vst.msk [vmem:[%s4197_s17 + $0x78] sm:$0xff] %vm2705_vm2, %v2688_v48  ;;  %v1940_v20 = vadd.f32 %v1887_v11, %v4095_v26 }
 0x292   : > { %v2133_v51 = vpop.f32.mrf.mxu2 }
 0x293   : > { %v2189_v5 = vadd.f32 %v2133_v51, %v1938_v59 }
 0x294   : > { %v2383_v18 = vpop.f32.mrf.mxu3 }
 0x295   : > { %v2439_v50 = vadd.f32 %v2383_v18, %v2189_v5 }
 0x296   : > { %v2638_v15 = vpop.f32.mrf.mxu0 }
 0x297   : > { %v2689_v9 = vadd.f32 %v2633_v2, %v2439_v50 }
 0x298   : > { %v1889_v45 = vpop.f32.mrf.mxu1 }
 0x299   : > { %2722 = vst.msk [vmem:[%s4197_s17 + $0x80] sm:$0xff] %vm2705_vm2, %v2689_v9  ;;  %v1941_v10 = vadd.f32 %v1889_v45, %v4102_v27 }
 0x29a   : > { %v2135_v21 = vpop.f32.mrf.mxu2 }
 0x29b   : > { %v2190_v19 = vadd.f32 %v2135_v21, %v1939_v23 }
 0x29c   : > { %v2385_v62 = vpop.f32.mrf.mxu3 }
 0x29d   : > { %v2440_v63 = vadd.f32 %v2385_v62, %v2190_v19 }
 0x29e   : > { %v2640_v14 = vpop.f32.mrf.mxu0 }
 0x29f   : > { %v2690_v0 = vadd.f32 %v2635_v41, %v2440_v63 }
 0x2a0   : > { %v1892_v16 = vpop.f32.mrf.mxu1 }
 0x2a1   : > { %2723 = vst.msk [vmem:[%s4197_s17 + $0x88] sm:$0xff] %vm2705_vm2, %v2690_v0  ;;  %v1942_v61 = vadd.f32 %v1892_v16, %v4110_v43 }
 0x2a2   : > { %v2138_v22 = vpop.f32.mrf.mxu2 }
 0x2a3   : > { %v2191_v35 = vadd.f32 %v2138_v22, %v1940_v20 }
 0x2a4   : > { %v2388_v39 = vpop.f32.mrf.mxu3 }
 0x2a5   : > { %v2441_v24 = vadd.f32 %v2388_v39, %v2191_v35 }
 0x2a6   : > { %v2643_v36 = vpop.f32.mrf.mxu0 }
 0x2a7   : > { %v2691_v7 = vadd.f32 %v2638_v15, %v2441_v24 }
 0x2a8   : > { %v1894_v3 = vpop.f32.mrf.mxu1 }
 0x2a9   : > { %2724 = vst.msk [vmem:[%s4197_s17 + $0x90] sm:$0xff] %vm2705_vm2, %v2691_v7  ;;  %v1943_v54 = vadd.f32 %v1894_v3, %v4117_v30 }
 0x2aa   : > { %v2140_v25 = vpop.f32.mrf.mxu2 }
 0x2ab   : > { %v2192_v37 = vadd.f32 %v2140_v25, %v1941_v10 }
 0x2ac   : > { %v2390_v60 = vpop.f32.mrf.mxu3 }
 0x2ad   : > { %v2442_v31 = vadd.f32 %v2390_v60, %v2192_v37 }
 0x2ae   : > { %v2645_v53 = vpop.f32.mrf.mxu0 }
 0x2af   : > { %v2692_v28 = vadd.f32 %v2640_v14, %v2442_v31 }
 0x2b0   : > { %v1897_v26 = vpop.f32.mrf.mxu1 }
 0x2b1   : > { %2725 = vst.msk [vmem:[%s4197_s17 + $0x98] sm:$0xff] %vm2705_vm2, %v2692_v28  ;;  %v1944_v34 = vadd.f32 %v1897_v26, %v4125_v40 }
 0x2b2   : > { %v2143_v56 = vpop.f32.mrf.mxu2 }
 0x2b3   : > { %v2193_v13 = vadd.f32 %v2143_v56, %v1942_v61 }
 0x2b4   : > { %v2393_v29 = vpop.f32.mrf.mxu3 }
 0x2b5   : > { %v2443_v38 = vadd.f32 %v2393_v29, %v2193_v13 }
 0x2b6   : > { %v2648_v12 = vpop.f32.mrf.mxu0 }
 0x2b7   : > { %v2693_v44 = vadd.f32 %v2643_v36, %v2443_v38 }
 0x2b8   : > { %v1899_v27 = vpop.f32.mrf.mxu1 }
 0x2b9   : > { %2726 = vst.msk [vmem:[%s4197_s17 + $0xa0] sm:$0xff] %vm2705_vm2, %v2693_v44  ;;  %v1945_v30 = vadd.f32 %v1899_v27, %v4132_v52 }
 0x2ba   : > { %v2145_v2 = vpop.f32.mrf.mxu2 }
 0x2bb   : > { %v2194_v46 = vadd.f32 %v2145_v2, %v1943_v54 }
 0x2bc   : > { %v2395_v6 = vpop.f32.mrf.mxu3 }
 0x2bd   : > { %v2444_v42 = vadd.f32 %v2395_v6, %v2194_v46 }
 0x2be   : > { %v2650_v49 = vpop.f32.mrf.mxu0 }
 0x2bf   : > { %v2694_v8 = vadd.f32 %v2645_v53, %v2444_v42 }
 0x2c0   : > { %v1902_v43 = vpop.f32.mrf.mxu1 }
 0x2c1   : > { %2727 = vst.msk [vmem:[%s4197_s17 + $0xa8] sm:$0xff] %vm2705_vm2, %v2694_v8  ;;  %v1946_v40 = vadd.f32 %v1902_v43, %v4140_v55 }
 0x2c2   : > { %v2148_v47 = vpop.f32.mrf.mxu2 }
 0x2c3   : > { %v2195_v41 = vadd.f32 %v2148_v47, %v1944_v34 }
 0x2c4   : > { %v2398_v48 = vpop.f32.mrf.mxu3 }
 0x2c5   : > { %v2445_v11 = vadd.f32 %v2398_v48, %v2195_v41 }
 0x2c6   : > { %v2653_v51 = vpop.f32.mrf.mxu0 }
 0x2c7   : > { %v2695_v59 = vadd.f32 %v2648_v12, %v2445_v11 }
 0x2c8   : > { %v1904_v18 = vpop.f32.mrf.mxu1 }
 0x2c9   : > { %2728 = vst.msk [vmem:[%s4197_s17 + $0xb0] sm:$0xff] %vm2705_vm2, %v2695_v59  ;;  %v1947_v52 = vadd.f32 %v1904_v18, %v4147_v4 }
 0x2ca   : > { %v2150_v5 = vpop.f32.mrf.mxu2 }
 0x2cb   : > { %v2196_v50 = vadd.f32 %v2150_v5, %v1945_v30 }
 0x2cc   : > { %v2400_v15 = vpop.f32.mrf.mxu3 }
 0x2cd   : > { %v2446_v9 = vadd.f32 %v2400_v15, %v2196_v50 }
 0x2ce   : > { %v2655_v21 = vpop.f32.mrf.mxu0 }
 0x2cf   : > { %v2696_v45 = vadd.f32 %v2650_v49, %v2446_v9 }
 0x2d0   : > { %v1907_v63 = vpop.f32.mrf.mxu1 }
 0x2d1   : > { %2729 = vst.msk [vmem:[%s4197_s17 + $0xb8] sm:$0xff] %vm2705_vm2, %v2696_v45  ;;  %v1948_v36 = vadd.f32 %v1907_v63, %v4155_v32 }
 0x2d2   : > { %v2153_v23 = vpop.f32.mrf.mxu2 }
 0x2d3   : > { %v2197_v19 = vadd.f32 %v2153_v23, %v1946_v40 }
 0x2d4   : > { %v2403_v62 = vpop.f32.mrf.mxu3 }
 0x2d5   : > { %v2447_v14 = vadd.f32 %v2403_v62, %v2197_v19 }
 0x2d6   : > { %v2658_v35 = vpop.f32.mrf.mxu0 }
 0x2d7   : > { %v2697_v0 = vadd.f32 %v2653_v51, %v2447_v14 }
 0x2d8   : > { %v1909_v24 = vpop.f32.mrf.mxu1 }
 0x2d9   : > { %2730 = vst.msk [vmem:[%s4197_s17 + $0xc0] sm:$0xff] %vm2705_vm2, %v2697_v0  ;;  %v1949_v31 = vadd.f32 %v1909_v24, %v4162_v57 }
 0x2da   : > { %v2155_v16 = vpop.f32.mrf.mxu2 }
 0x2db   : > { %v2198_v20 = vadd.f32 %v2155_v16, %v1947_v52 }
 0x2dc   : > { %v2405_v22 = vpop.f32.mrf.mxu3 }
 0x2dd   : > { %v2448_v39 = vadd.f32 %v2405_v22, %v2198_v20 }
 0x2de   : > { %v2660_v37 = vpop.f32.mrf.mxu0 }
 0x2df   : > { %v2698_v55 = vadd.f32 %v2655_v21, %v2448_v39 }
 0x2e0   : > { %v1912_v4 = vpop.f32.mrf.mxu1 }
 0x2e1   : > { %2731 = vst.msk [vmem:[%s4197_s17 + $0xc8] sm:$0xff] %vm2705_vm2, %v2698_v55  ;;  %v1950_v32 = vadd.f32 %v1912_v4, %v4170_v33 }
 0x2e2   : > { %v2158_v7 = vpop.f32.mrf.mxu2 }
 0x2e3   : > { %v2199_v3 = vadd.f32 %v2158_v7, %v1948_v36 }
 0x2e4   : > { %v2408_v10 = vpop.f32.mrf.mxu3 }
 0x2e5   : > { %v2449_v25 = vadd.f32 %v2408_v10, %v2199_v3 }
 0x2e6   : > { %v2663_v13 = vpop.f32.mrf.mxu0 }
 0x2e7   : > { %v2699_v60 = vadd.f32 %v2658_v35, %v2449_v25 }
 0x2e8   : > { %v1914_v38 = vpop.f32.mrf.mxu1 }
 0x2e9   : > { %2732 = vst.msk [vmem:[%s4197_s17 + $0xd0] sm:$0xff] %vm2705_vm2, %v2699_v60  ;;  %v1951_v57 = vadd.f32 %v1914_v38, %v4175_v1 }
 0x2ea   : > { %v2160_v53 = vpop.f32.mrf.mxu2 }
 0x2eb   : > { %v2200_v28 = vadd.f32 %v2160_v53, %v1949_v31 }
 0x2ec   : > { %v2410_v26 = vpop.f32.mrf.mxu3 }
 0x2ed   : > { %v2450_v61 = vadd.f32 %v2410_v26, %v2200_v28 }
 0x2ee   : > { %v2665_v2 = vpop.f32.mrf.mxu0 }
 0x2ef   : > { %v2700_v56 = vadd.f32 %v2660_v37, %v2450_v61 }
 0x2f0   : > { %v1917_v49 = vpop.f32.mrf.mxu1 }
 0x2f1   : > { %2733 = vst.msk [vmem:[%s4197_s17 + $0xd8] sm:$0xff] %vm2705_vm2, %v2700_v56  ;;  %v1952_v33 = vadd.f32 %v1917_v49, %v4181_v17 }
 0x2f2   : > { %v2163_v29 = vpop.f32.mrf.mxu2 }
 0x2f3   : > { %v2201_v12 = vadd.f32 %v2163_v29, %v1950_v32 }
 0x2f4   : > { %v2413_v44 = vpop.f32.mrf.mxu3 }
 0x2f5   : > { %v2451_v27 = vadd.f32 %v2413_v44, %v2201_v12 }
 0x2f6   : > { %v2668_v41 = vpop.f32.mrf.mxu0 }
 0x2f7   : > { %v2701_v54 = vadd.f32 %v2663_v13, %v2451_v27 }
 0x2f8   : > { %v1919_v59 = vpop.f32.mrf.mxu1 }
 0x2f9   : > { %2734 = vst.msk [vmem:[%s4197_s17 + $0xe0] sm:$0xff] %vm2705_vm2, %v2701_v54  ;;  %v1953_v51 = vadd.f32 %v1919_v59, %v4186_v58 }
 0x2fa   : > { %v2165_v46 = vpop.f32.mrf.mxu2 }
 0x2fb   : > { %v2202_v6 = vadd.f32 %v2165_v46, %v1951_v57 }
 0x2fc   : > { %v2415_v42 = vpop.f32.mrf.mxu3 }
 0x2fd   : > { %v2452_v8 = vadd.f32 %v2415_v42, %v2202_v6 }
 0x2fe   : > { %v2670_v15 = vpop.f32.mrf.mxu0 }
 0x2ff   : > { %v2702_v43 = vadd.f32 %v2665_v2, %v2452_v8 }
 0x301   : > { %2735 = vst.msk [vmem:[%s4197_s17 + $0xe8] sm:$0xff] %vm2705_vm2, %v2702_v43 }
 0x302   : > { %v2168_v34 = vpop.f32.mrf.mxu2 }
 0x303   : > { %v2203_v47 = vadd.f32 %v2168_v34, %v1952_v33 }
 0x304   : > { %v2418_v48 = vpop.f32.mrf.mxu3 }
 0x305   : > { %v2453_v11 = vadd.f32 %v2418_v48, %v2203_v47 }
 0x307   : > { %v2703_v1 = vadd.f32 %v2668_v41, %v2453_v11 }
 0x309   : > { %2736 = vst.msk [vmem:[%s4197_s17 + $0xf0] sm:$0xff] %vm2705_vm2, %v2703_v1 }
 0x30a   : > { %v2170_v30 = vpop.f32.mrf.mxu2 }
 0x30b   : > { %v2204_v5 = vadd.f32 %v2170_v30, %v1953_v51 }
 0x30c   : > { %v2420_v18 = vpop.f32.mrf.mxu3 }
 0x30d   : > { %v2454_v50 = vadd.f32 %v2420_v18, %v2204_v5 }
 0x30f   : > { %v2704_v9 = vadd.f32 %v2670_v15, %v2454_v50 }
 0x311   : > { %2737 = vst.msk [vmem:[%s4197_s17 + $0xf8] sm:$0xff] %vm2705_vm2, %v2704_v9 }
 0x312 PF: > { %s15_s18 = sadd.s32 1, %s3305_s18  }
 0x313   : > { %p12_p4 = scmp.ge.s32.totalorder %s15_s18, 4  }
 0x315   :  { %14 = sbr.rel (!%p12_p4) target bundleno = 1 (0x1), region = 80 }

// kernel: dense_block_forward.10
= control target key start
LH: loop header
LB: loop body
LE: loop exit
PB: predicated region body
PF: predicated region fallthrough
CT: control target
= control target key end

     0   :  { %s996_s21 = smov 0   ;;  %s1511_s0 = inlined_call_operand.vmem [shape: f32[512,20], index: 0, kind: input, shape index: {}]   ;;  %s1512_s1 = inlined_call_operand.vmem [shape: f32[1,20], index: 1, kind: input, shape index: {}]   ;;  %s1513_s2 = inlined_call_operand.vmem [shape: f32[1,20], index: 2, kind: input, shape index: {}]   ;;  %s1514_s3 = inlined_call_operand.vmem [shape: bf16[20,64], index: 3, kind: input, shape index: {}]   ;;  %s1515_s4 = inlined_call_operand.vmem [shape: f32[1,64], index: 4, kind: input, shape index: {}]   ;;  %s1516_s5 = inlined_call_operand.vmem [shape: bf16[512,64], index: 5, kind: output, shape index: {0}]   ;;  %s1517_s6 = inlined_call_operand.vmem [shape: f32[2,2,64], index: 6, kind: output, shape index: {1}]  }
   0x1 LB: > { %s1002_s22 = sadd.s32 4294967295, %s959_s21   ;;  %p907_p0 = scmp.ge.s32.totalorder %s959_s21, 1  ;;  %s959_s21 = sphi %s996_s21, %s17_s21  }
   0x2   : > { %p216_p1 = scmp.lt.s32.totalorder %s959_s21, 3 }
   0x4   : > { %p217_p2 = pnand %p907_p0, %p216_p1 }
   0x5   : > { %s908_s25 = sshll.u32 (!%p217_p2), %s1002_s22, 5  ;;  %p262_p4 = scmp.lt.s32.totalorder (!%p217_p2), %s1002_s22, 1 }
   0x6   : > { %220 = sbr.rel (%p217_p2) target bundleno = 274 (0x112), region = 40  ;;  %p251_p3 = scmp.lt.s32.totalorder (!%p217_p2), %s908_s25, 63 }
   0xb   : > { %v421_v0 = vld [vmem:[%s1514_s3 + $0x8] sm:$0x3]  ;;  %vm484_vm0 = vcmask 1041408   ;;  %s1519_s25 = smov (!%p251_p3, %s908_s25), 63  ;;  %v1015_v3 = vld [vmem:[%s1512_s1] ss:$0 sm:$0xff] }
   0xc   : > { %v431_v1 = vunpack.c.l.b16 %v421_v0  ;;  %s909_s28 = sshll.u32 %s1519_s25, 3  ;;  %v935_v5 = vld [vmem:[%s1514_s3] sm:$0xff]  ;;  %vm435_vm1 = vcmask 162816   ;;  %s911_s14 = sshll.u32 %s1519_s25, 2  ;;  %vm609_vm2 = vcmask 519168   ;;  %vm642_vm3 = vcmask 523264  }
   0xd   : > { %s1024_s9 = scalar_lea.vmem %s1511_s0, %s909_s28  ;;  %v1029_v6 = vld [vmem:[%s1513_s2] ss:$0 sm:$0xff]  ;;  %s1155_s17 = scalar_lea.vmem %s1516_s5, %s911_s14  ;;  %vm813_vm4 = vcmask 516096  }
   0xe   : > { %v433_v2 = vpack.c.b16 %v431_v1, %v431_v1  ;;  %v267_v7 = vld [vmem:[%s1024_s9] sm:$0xff]  ;;  %v268_v8 = vld [vmem:[%s1024_s9 + $0x8] sm:$0xff]  ;;  %v269_v25 = vld [vmem:[%s1024_s9 + $0x10] sm:$0xff]  ;;  %s1521_s22 = smov (!%p262_p4, %s1002_s22), 1 }
   0xf   : > { %v275_v9 = vld [vmem:[%s1024_s9 + $0x40] sm:$0xff]  ;;  %v303_v10 = vmul.f32 %v1015_v3, %v267_v7  ;;  %v304_v11 = vmul.f32 %v1015_v3, %v268_v8  ;;  %v276_v12 = vld [vmem:[%s1024_s9 + $0x48] sm:$0xff]  ;;  %v270_v28 = vld [vmem:[%s1024_s9 + $0x18] sm:$0xff]  ;;  %v305_v36 = vmul.f32 %v1015_v3, %v269_v25  ;;  %s912_s18 = sshll.u32 %s1521_s22, 1 }
  0x10   : > { %v486_v4 = vsel %vm484_vm0, %v433_v2, 0  ;;  %v311_v13 = vmul.f32 %v1015_v3, %v275_v9  ;;  %v312_v14 = vmul.f32 %v1015_v3, %v276_v12  ;;  %v283_v15 = vld [vmem:[%s1024_s9 + $0x80] sm:$0xff]  ;;  %v284_v16 = vld [vmem:[%s1024_s9 + $0x88] sm:$0xff]  ;;  %v277_v32 = vld [vmem:[%s1024_s9 + $0x50] sm:$0xff]  ;;  %v306_v38 = vmul.f32 %v1015_v3, %v270_v28  ;;  %s265_s23 = scalar_lea.vmem %s1517_s6, %s912_s18 }
  0x11   : > { %494 = vmatpush.bf16.msra.mxu0 %v486_v4  ;;  %936 = vmatpush.bf16.msra.mxu1 %v486_v4  ;;  %v339_v17 = vadd.f32 %v1029_v6, %v303_v10  ;;  %v340_v18 = vadd.f32 %v1029_v6, %v304_v11  ;;  %v319_v21 = vmul.f32 %v1015_v3, %v283_v15  ;;  %v278_v33 = vld [vmem:[%s1024_s9 + $0x58] sm:$0xff]  ;;  %v291_v34 = vld [vmem:[%s1024_s9 + $0xc0] sm:$0xff]  ;;  %v292_v40 = vld [vmem:[%s1024_s9 + $0xc8] sm:$0xff] }
  0x12   : > { %937 = vmatpush.bf16.msra.mxu2 %v486_v4  ;;  %938 = vmatpush.bf16.msra.mxu3 %v486_v4  ;;  %v347_v19 = vadd.f32 %v1029_v6, %v311_v13  ;;  %v348_v20 = vadd.f32 %v1029_v6, %v312_v14  ;;  %v320_v26 = vmul.f32 %v1015_v3, %v284_v16  ;;  %v285_v43 = vld [vmem:[%s1024_s9 + $0x90] sm:$0xff]  ;;  %v286_v44 = vld [vmem:[%s1024_s9 + $0x98] sm:$0xff]  ;;  %v271_v11 = vld [vmem:[%s1024_s9 + $0x20] sm:$0xff] }
  0x13   : > { %v371_v22 = vmax.f32 %v339_v17, 0.0  ;;  %v372_v23 = vmax.f32 %v340_v18, 0.0  ;;  %v355_v29 = vadd.f32 %v1029_v6, %v319_v21  ;;  %v313_v41 = vmul.f32 %v1015_v3, %v277_v32  ;;  %v293_v1 = vld [vmem:[%s1024_s9 + $0xd0] sm:$0xff]  ;;  %v294_v2 = vld [vmem:[%s1024_s9 + $0xd8] sm:$0xff]  ;;  %v272_v12 = vld [vmem:[%s1024_s9 + $0x28] sm:$0xff] }
  0x14   : > { %v379_v24 = vmax.f32 %v347_v19, 0.0  ;;  %v380_v27 = vmax.f32 %v348_v20, 0.0  ;;  %v356_v31 = vadd.f32 %v1029_v6, %v320_v26  ;;  %v314_v42 = vmul.f32 %v1015_v3, %v278_v33  ;;  %v279_v13 = vld [vmem:[%s1024_s9 + $0x60] sm:$0xff]  ;;  %v280_v14 = vld [vmem:[%s1024_s9 + $0x68] sm:$0xff] }
  0x15   : > { %495 = vmatpush.bf16.msra.mxu0 %v935_v5  ;;  %939 = vmatpush.bf16.msra.mxu1 %v935_v5  ;;  %v403_v30 = vpack.c.bf16 %v372_v23, %v371_v22  ;;  %v387_v37 = vmax.f32 %v355_v29, 0.0  ;;  %v327_v45 = vmul.f32 %v1015_v3, %v291_v34  ;;  %v341_v47 = vadd.f32 %v1029_v6, %v305_v36  ;;  %v287_v22 = vld [vmem:[%s1024_s9 + $0xa0] sm:$0xff]  ;;  %v288_v23 = vld [vmem:[%s1024_s9 + $0xa8] sm:$0xff] }
  0x16   : > { %940 = vmatpush.bf16.msra.mxu2 %v935_v5  ;;  %941 = vmatpush.bf16.msra.mxu3 %v935_v5  ;;  %v407_v35 = vpack.c.bf16 %v380_v27, %v379_v24  ;;  %v388_v39 = vmax.f32 %v356_v31, 0.0  ;;  %v328_v48 = vmul.f32 %v1015_v3, %v292_v40  ;;  %v342_v49 = vadd.f32 %v1029_v6, %v306_v38  ;;  %v296_v38 = vld [vmem:[%s1024_s9 + $0xe8] sm:$0xff] }
  0x17   : > { %v321_v50 = vmul.f32 %v1015_v3, %v285_v43  ;;  %v322_v51 = vmul.f32 %v1015_v3, %v286_v44  ;;  %v363_v52 = vadd.f32 %v1029_v6, %v327_v45  ;;  %v349_v53 = vadd.f32 %v1029_v6, %v313_v41 }
  0x18   : > { %917 = vmatmul.msk.bf16.vlgmr.msra.gmra.mxu0 %vm435_vm1, %v403_v30  ;;  %921 = vmatmul.msk.bf16.vlgmr.msra.gmra.mxu1 %vm435_vm1, %v407_v35  ;;  %v411_v46 = vpack.c.bf16 %v388_v39, %v387_v37  ;;  %v350_v54 = vadd.f32 %v1029_v6, %v314_v42  ;;  %v364_v55 = vadd.f32 %v1029_v6, %v328_v48  ;;  %v373_v58 = vmax.f32 %v341_v47, 0.0  ;;  %v295_v37 = vld [vmem:[%s1024_s9 + $0xe0] sm:$0xff]  ;;  %v273_v47 = vld [vmem:[%s1024_s9 + $0x30] sm:$0xff]  ;;  %v274_v48 = vld [vmem:[%s1024_s9 + $0x38] sm:$0xff] }
  0x19   : > { %v395_v56 = vmax.f32 %v363_v52, 0.0  ;;  %v374_v59 = vmax.f32 %v342_v49, 0.0  ;;  %v357_v60 = vadd.f32 %v1029_v6, %v321_v50  ;;  %v358_v61 = vadd.f32 %v1029_v6, %v322_v51  ;;  %v281_v49 = vld [vmem:[%s1024_s9 + $0x70] sm:$0xff]  ;;  %v282_v50 = vld [vmem:[%s1024_s9 + $0x78] sm:$0xff] }
  0x1a   : > { %925 = vmatmul.msk.bf16.vlgmr.msra.gmra.mxu2 %vm435_vm1, %v411_v46  ;;  %v396_v57 = vmax.f32 %v364_v55, 0.0  ;;  %v381_v62 = vmax.f32 %v349_v53, 0.0  ;;  %v382_v63 = vmax.f32 %v350_v54, 0.0  ;;  %v329_v4 = vmul.f32 %v1015_v3, %v293_v1 }
  0x1b   : > { %v330_v5 = vmul.f32 %v1015_v3, %v294_v2  ;;  %v404_v7 = vpack.c.bf16 %v374_v59, %v373_v58  ;;  %v389_v8 = vmax.f32 %v357_v60, 0.0  ;;  %v390_v9 = vmax.f32 %v358_v61, 0.0  ;;  %v289_v58 = vld [vmem:[%s1024_s9 + $0xb0] sm:$0xff]  ;;  %v290_v59 = vld [vmem:[%s1024_s9 + $0xb8] sm:$0xff] }
  0x1c   : > { %v415_v0 = vpack.c.bf16 %v396_v57, %v395_v56  ;;  %v408_v10 = vpack.c.bf16 %v382_v63, %v381_v62  ;;  %v365_v15 = vadd.f32 %v1029_v6, %v329_v4  ;;  %v307_v17 = vmul.f32 %v1015_v3, %v271_v11  ;;  %v297_v11 = vld [vmem:[%s1024_s9 + $0xf0] sm:$0xff] }
  0x1d   : > { %v366_v16 = vadd.f32 %v1029_v6, %v330_v5  ;;  %v308_v18 = vmul.f32 %v1015_v3, %v272_v12  ;;  %v412_v19 = vpack.c.bf16 %v390_v9, %v389_v8  ;;  %v315_v20 = vmul.f32 %v1015_v3, %v279_v13  ;;  %v298_v12 = vld [vmem:[%s1024_s9 + $0xf8] sm:$0xff] }
  0x1e   : > { %929 = vmatmul.msk.bf16.vlgmr.msra.gmra.mxu3 %vm435_vm1, %v415_v0  ;;  %v316_v21 = vmul.f32 %v1015_v3, %v280_v14  ;;  %v397_v24 = vmax.f32 %v365_v15, 0.0  ;;  %v343_v26 = vadd.f32 %v1029_v6, %v307_v17  ;;  %v323_v28 = vmul.f32 %v1015_v3, %v287_v22 }
  0x1f   : > { %v398_v25 = vmax.f32 %v366_v16, 0.0  ;;  %v344_v27 = vadd.f32 %v1029_v6, %v308_v18  ;;  %v324_v29 = vmul.f32 %v1015_v3, %v288_v23  ;;  %v351_v30 = vadd.f32 %v1029_v6, %v315_v20 }
  0x20   : > { %v352_v31 = vadd.f32 %v1029_v6, %v316_v21  ;;  %v375_v33 = vmax.f32 %v343_v26, 0.0  ;;  %v359_v35 = vadd.f32 %v1029_v6, %v323_v28  ;;  %v331_v41 = vmul.f32 %v1015_v3, %v295_v37 }
  0x21   : > { %v416_v32 = vpack.c.bf16 %v398_v25, %v397_v24  ;;  %v376_v34 = vmax.f32 %v344_v27, 0.0  ;;  %v360_v36 = vadd.f32 %v1029_v6, %v324_v29  ;;  %v383_v39 = vmax.f32 %v351_v30, 0.0 }
  0x22   : > { %v384_v40 = vmax.f32 %v352_v31, 0.0  ;;  %v332_v42 = vmul.f32 %v1015_v3, %v296_v38  ;;  %v391_v44 = vmax.f32 %v359_v35, 0.0  ;;  %v367_v51 = vadd.f32 %v1029_v6, %v331_v41 }
  0x23   : > { %v405_v43 = vpack.c.bf16 %v376_v34, %v375_v33  ;;  %v392_v45 = vmax.f32 %v360_v36, 0.0  ;;  %v309_v53 = vmul.f32 %v1015_v3, %v273_v47  ;;  %v310_v54 = vmul.f32 %v1015_v3, %v274_v48 }
  0x24   : > { %v409_v46 = vpack.c.bf16 %v384_v40, %v383_v39  ;;  %v368_v52 = vadd.f32 %v1029_v6, %v332_v42  ;;  %v317_v56 = vmul.f32 %v1015_v3, %v281_v49  ;;  %v318_v57 = vmul.f32 %v1015_v3, %v282_v50 }
  0x25   : > { %v413_v55 = vpack.c.bf16 %v392_v45, %v391_v44  ;;  %v399_v60 = vmax.f32 %v367_v51, 0.0  ;;  %v345_v62 = vadd.f32 %v1029_v6, %v309_v53  ;;  %v346_v63 = vadd.f32 %v1029_v6, %v310_v54 }
  0x26   : > { %v400_v61 = vmax.f32 %v368_v52, 0.0  ;;  %v325_v0 = vmul.f32 %v1015_v3, %v289_v58  ;;  %v326_v1 = vmul.f32 %v1015_v3, %v290_v59  ;;  %v353_v2 = vadd.f32 %v1029_v6, %v317_v56 }
  0x27   : > { %v354_v4 = vadd.f32 %v1029_v6, %v318_v57  ;;  %v378_v8 = vmax.f32 %v346_v63, 0.0  ;;  %v333_v15 = vmul.f32 %v1015_v3, %v297_v11  ;;  %v334_v16 = vmul.f32 %v1015_v3, %v298_v12  ;;  %v1146_v3 = vld [vmem:[%s1515_s4] ss:$0 sm:$0xff] }
  0x28   : > { %918 = vmatmul.msk.bf16.gmra.mxu0 %vm435_vm1, %v404_v7  ;;  %922 = vmatmul.msk.bf16.gmra.mxu1 %vm435_vm1, %v408_v10  ;;  %v417_v5 = vpack.c.bf16 %v400_v61, %v399_v60  ;;  %v377_v7 = vmax.f32 %v345_v62, 0.0  ;;  %v361_v9 = vadd.f32 %v1029_v6, %v325_v0  ;;  %v362_v10 = vadd.f32 %v1029_v6, %v326_v1 }
  0x29   : > { %v385_v13 = vmax.f32 %v353_v2, 0.0  ;;  %v386_v14 = vmax.f32 %v354_v4, 0.0  ;;  %v369_v21 = vadd.f32 %v1029_v6, %v333_v15  ;;  %v370_v22 = vadd.f32 %v1029_v6, %v334_v16 }
  0x2a   : > { %926 = vmatmul.msk.bf16.gmra.mxu2 %vm435_vm1, %v412_v19  ;;  %v406_v17 = vpack.c.bf16 %v378_v8, %v377_v7  ;;  %v393_v18 = vmax.f32 %v361_v9, 0.0  ;;  %v394_v19 = vmax.f32 %v362_v10, 0.0 }
  0x2b   : > { %v410_v20 = vpack.c.bf16 %v386_v14, %v385_v13  ;;  %v401_v24 = vmax.f32 %v369_v21, 0.0  ;;  %v402_v25 = vmax.f32 %v370_v22, 0.0 }
  0x2c   : > { %v414_v23 = vpack.c.bf16 %v394_v19, %v393_v18 }
  0x2d   : > { %v418_v26 = vpack.c.bf16 %v402_v25, %v401_v24 }
  0x2e   : > { %930 = vmatmul.msk.bf16.gmra.mxu3 %vm435_vm1, %v416_v32 }
  0x38   : > { %919 = vmatmul.msk.bf16.gmra.mxu0 %vm435_vm1, %v405_v43  ;;  %923 = vmatmul.msk.bf16.gmra.mxu1 %vm435_vm1, %v409_v46 }
  0x3a   : > { %927 = vmatmul.msk.bf16.gmra.mxu2 %vm435_vm1, %v413_v55 }
  0x3e   : > { %931 = vmatmul.msk.bf16.gmra.mxu3 %vm435_vm1, %v417_v5 }
  0x48   : > { %920 = vmatmul.msk.bf16.gmra.mxu0 %vm435_vm1, %v406_v17  ;;  %924 = vmatmul.msk.bf16.gmra.mxu1 %vm435_vm1, %v410_v20 }
  0x4a   : > { %928 = vmatmul.msk.bf16.gmra.mxu2 %vm435_vm1, %v414_v23 }
  0x4e   : > { %932 = vmatmul.msk.bf16.gmra.mxu3 %vm435_vm1, %v418_v26 }
  0x95   : > { %v497_v27 = vpop.f32.mrf.mxu0  ;;  %v517_v28 = vpop.f32.mrf.mxu1 }
  0x96   : > { %v1150_v6 = vadd.f32 %v1146_v3, %v497_v27  ;;  %v1158_v29 = vadd.f32 %v1146_v3, %v517_v28 }
  0x98   : > { %v577_v30 = vpack.c.bf16 %v1150_v6, %v1150_v6  ;;  %v585_v31 = vpack.c.bf16 %v1158_v29, %v1158_v29  ;;  %v712_v23 = vmul.f32 %v1150_v6, %v1150_v6 }
  0x9a   : > { %610 = vst.msk [vmem:[%s1155_s17] sm:$0xf] %vm609_vm2, %v577_v30 }
  0x9b   : > { %618 = vst.msk [vmem:[%s1155_s17 + $0x20] sm:$0xf] %vm609_vm2, %v585_v31 }
  0x9d   : > { %v499_v32 = vpop.f32.mrf.mxu0  ;;  %v519_v34 = vpop.f32.mrf.mxu1 }
  0x9e   : > { %v1169_v33 = vadd.f32 %v1146_v3, %v499_v32  ;;  %v1172_v35 = vadd.f32 %v1146_v3, %v519_v34  ;;  %v537_v36 = vpop.f32.mrf.mxu2 }
  0x9f   : > { %v1177_v38 = vadd.f32 %v1146_v3, %v537_v36  ;;  %v643_v36 = vsel %vm642_vm3, %v1150_v6, 0.0 }
  0xa0   : > { %v578_v37 = vpack.c.bf16 %v1169_v33, %v1169_v33  ;;  %v586_v39 = vpack.c.bf16 %v1172_v35, %v1172_v35  ;;  %v713_v16 = vmul.f32 %v1169_v33, %v1169_v33  ;;  %v644_v27 = vsel %vm642_vm3, %v1169_v33, 0.0 }
  0xa1   : > { %v593_v40 = vpack.c.bf16 %v1177_v38, %v1177_v38  ;;  %v557_v44 = vpop.f32.mrf.mxu3  ;;  %v744_v33 = vsel %vm642_vm3, %v712_v23, 0.0 }
  0xa2   : > { %611 = vst.msk [vmem:[%s1155_s17 + $0x4] sm:$0xf] %vm609_vm2, %v578_v37  ;;  %v1196_v47 = vadd.f32 %v1146_v3, %v557_v44  ;;  %v745_v28 = vsel %vm642_vm3, %v713_v16, 0.0 }
  0xa3   : > { %619 = vst.msk [vmem:[%s1155_s17 + $0x24] sm:$0xf] %vm609_vm2, %v586_v39  ;;  %v645_v39 = vadd.f32 %v644_v27, %v643_v36 }
  0xa4   : > { %626 = vst.msk [vmem:[%s1155_s17 + $0x40] sm:$0xf] %vm609_vm2, %v593_v40  ;;  %v601_v52 = vpack.c.bf16 %v1196_v47, %v1196_v47  ;;  %v746_v40 = vadd.f32 %v745_v28, %v744_v33 }
  0xa5   : > { %v502_v41 = vpop.f32.mrf.mxu0  ;;  %v522_v43 = vpop.f32.mrf.mxu1 }
  0xa6   : > { %v1190_v42 = vadd.f32 %v1146_v3, %v502_v41  ;;  %v1193_v45 = vadd.f32 %v1146_v3, %v522_v43  ;;  %v539_v46 = vpop.f32.mrf.mxu2  ;;  %634 = vst.msk [vmem:[%s1155_s17 + $0x60] sm:$0xf] %vm609_vm2, %v601_v52 }
  0xa7   : > { %v1201_v49 = vadd.f32 %v1146_v3, %v539_v46 }
  0xa8   : > { %v579_v48 = vpack.c.bf16 %v1190_v42, %v1190_v42  ;;  %v587_v50 = vpack.c.bf16 %v1193_v45, %v1193_v45  ;;  %v714_v30 = vmul.f32 %v1190_v42, %v1190_v42  ;;  %v646_v37 = vsel %vm642_vm3, %v1190_v42, 0.0 }
  0xa9   : > { %v594_v51 = vpack.c.bf16 %v1201_v49, %v1201_v49  ;;  %v559_v56 = vpop.f32.mrf.mxu3 }
  0xaa   : > { %612 = vst.msk [vmem:[%s1155_s17 + $0x8] sm:$0xf] %vm609_vm2, %v579_v48  ;;  %v1222_v59 = vadd.f32 %v1146_v3, %v559_v56  ;;  %v747_v43 = vsel %vm642_vm3, %v714_v30, 0.0 }
  0xab   : > { %620 = vst.msk [vmem:[%s1155_s17 + $0x28] sm:$0xf] %vm609_vm2, %v587_v50 }
  0xac   : > { %627 = vst.msk [vmem:[%s1155_s17 + $0x44] sm:$0xf] %vm609_vm2, %v594_v51  ;;  %v602_v0 = vpack.c.bf16 %v1222_v59, %v1222_v59  ;;  %v647_v51 = vadd.f32 %v646_v37, %v645_v39 }
  0xad   : > { %v504_v53 = vpop.f32.mrf.mxu0  ;;  %v524_v55 = vpop.f32.mrf.mxu1 }
  0xae   : > { %v505_v54 = vadd.f32 %v1146_v3, %v504_v53  ;;  %v1219_v57 = vadd.f32 %v1146_v3, %v524_v55  ;;  %v542_v58 = vpop.f32.mrf.mxu2  ;;  %635 = vst.msk [vmem:[%s1155_s17 + $0x64] sm:$0xf] %vm609_vm2, %v602_v0 }
  0xaf   : > { %v1225_v61 = vadd.f32 %v1146_v3, %v542_v58 }
  0xb0   : > { %v580_v60 = vpack.c.bf16 %v505_v54, %v505_v54  ;;  %v588_v62 = vpack.c.bf16 %v1219_v57, %v1219_v57  ;;  %v715_v32 = vmul.f32 %v505_v54, %v505_v54  ;;  %v648_v44 = vsel %vm642_vm3, %v505_v54, 0.0 }
  0xb1   : > { %v595_v63 = vpack.c.bf16 %v1225_v61, %v1225_v61  ;;  %v562_v5 = vpop.f32.mrf.mxu3 }
  0xb2   : > { %613 = vst.msk [vmem:[%s1155_s17 + $0xc] sm:$0xf] %vm609_vm2, %v580_v60  ;;  %v1246_v9 = vadd.f32 %v1146_v3, %v562_v5  ;;  %v749_v42 = vsel %vm642_vm3, %v715_v32, 0.0 }
  0xb3   : > { %621 = vst.msk [vmem:[%s1155_s17 + $0x2c] sm:$0xf] %vm609_vm2, %v588_v62  ;;  %v748_v62 = vadd.f32 %v747_v43, %v746_v40  ;;  %v721_v43 = vmul.f32 %v1172_v35, %v1172_v35 }
  0xb4   : > { %628 = vst.msk [vmem:[%s1155_s17 + $0x48] sm:$0xf] %vm609_vm2, %v595_v63  ;;  %v603_v14 = vpack.c.bf16 %v1246_v9, %v1246_v9  ;;  %v649_v63 = vadd.f32 %v648_v44, %v647_v51 }
  0xb5   : > { %v507_v1 = vpop.f32.mrf.mxu0  ;;  %v527_v4 = vpop.f32.mrf.mxu1 }
  0xb6   : > { %v508_v2 = vadd.f32 %v1146_v3, %v507_v1  ;;  %v1243_v7 = vadd.f32 %v1146_v3, %v527_v4  ;;  %v544_v8 = vpop.f32.mrf.mxu2  ;;  %636 = vst.msk [vmem:[%s1155_s17 + $0x68] sm:$0xf] %vm609_vm2, %v603_v14 }
  0xb7   : > { %v1249_v11 = vadd.f32 %v1146_v3, %v544_v8  ;;  %v750_v8 = vadd.f32 %v749_v42, %v748_v62  ;;  %v722_v42 = vmul.f32 %v1193_v45, %v1193_v45  ;;  %v723_v62 = vmul.f32 %v1219_v57, %v1219_v57 }
  0xb8   : > { %v581_v10 = vpack.c.bf16 %v508_v2, %v508_v2  ;;  %v589_v12 = vpack.c.bf16 %v1243_v7, %v1243_v7  ;;  %v716_v46 = vmul.f32 %v508_v2, %v508_v2  ;;  %v650_v56 = vsel %vm642_vm3, %v508_v2, 0.0 }
  0xb9   : > { %v596_v13 = vpack.c.bf16 %v1249_v11, %v1249_v11  ;;  %v564_v19 = vpop.f32.mrf.mxu3 }
  0xba   : > { %614 = vst.msk [vmem:[%s1155_s17 + $0x10] sm:$0xf] %vm609_vm2, %v581_v10  ;;  %v1272_v22 = vadd.f32 %v1146_v3, %v564_v19  ;;  %v751_v1 = vsel %vm642_vm3, %v716_v46, 0.0  ;;  %v651_v10 = vadd.f32 %v650_v56, %v649_v63 }
  0xbb   : > { %622 = vst.msk [vmem:[%s1155_s17 + $0x30] sm:$0xf] %vm609_vm2, %v589_v12 }
  0xbc   : > { %629 = vst.msk [vmem:[%s1155_s17 + $0x4c] sm:$0xf] %vm609_vm2, %v596_v13  ;;  %v604_v34 = vpack.c.bf16 %v1272_v22, %v1272_v22 }
  0xbd   : > { %v509_v15 = vpop.f32.mrf.mxu0  ;;  %v529_v18 = vpop.f32.mrf.mxu1 }
  0xbe   : > { %v510_v17 = vadd.f32 %v1146_v3, %v509_v15  ;;  %v1269_v20 = vadd.f32 %v1146_v3, %v529_v18  ;;  %v547_v21 = vpop.f32.mrf.mxu2  ;;  %637 = vst.msk [vmem:[%s1155_s17 + $0x6c] sm:$0xf] %vm609_vm2, %v604_v34  ;;  %v752_v15 = vadd.f32 %v751_v1, %v750_v8  ;;  %v720_v18 = vmul.f32 %v1158_v29, %v1158_v29 }
  0xbf   : > { %v1277_v25 = vadd.f32 %v1146_v3, %v547_v21 }
  0xc0   : > { %v582_v24 = vpack.c.bf16 %v510_v17, %v510_v17  ;;  %v590_v26 = vpack.c.bf16 %v1269_v20, %v1269_v20  ;;  %v717_v54 = vmul.f32 %v510_v17, %v510_v17  ;;  %v652_v4 = vsel %vm642_vm3, %v510_v17, 0.0 }
  0xc1   : > { %v597_v31 = vpack.c.bf16 %v1277_v25, %v1277_v25  ;;  %v567_v50 = vpop.f32.mrf.mxu3  ;;  %v653_v16 = vadd.f32 %v652_v4, %v651_v10  ;;  %v759_v51 = vsel %vm642_vm3, %v720_v18, 0.0 }
  0xc2   : > { %615 = vst.msk [vmem:[%s1155_s17 + $0x14] sm:$0xf] %vm609_vm2, %v582_v24  ;;  %v1311_v55 = vadd.f32 %v1146_v3, %v567_v50  ;;  %v753_v13 = vsel %vm642_vm3, %v717_v54, 0.0  ;;  %v761_v54 = vsel %vm642_vm3, %v721_v43, 0.0 }
  0xc3   : > { %623 = vst.msk [vmem:[%s1155_s17 + $0x34] sm:$0xf] %vm609_vm2, %v590_v26  ;;  %v754_v26 = vadd.f32 %v753_v13, %v752_v15  ;;  %v666_v15 = vsel %vm642_vm3, %v1243_v7, 0.0 }
  0xc4   : > { %630 = vst.msk [vmem:[%s1155_s17 + $0x50] sm:$0xf] %vm609_vm2, %v597_v31  ;;  %v605_v12 = vpack.c.bf16 %v1311_v55, %v1311_v55 }
  0xc5   : > { %v512_v41 = vpop.f32.mrf.mxu0  ;;  %v532_v6 = vpop.f32.mrf.mxu1 }
  0xc6   : > { %v513_v48 = vadd.f32 %v1146_v3, %v512_v41  ;;  %v1308_v52 = vadd.f32 %v1146_v3, %v532_v6  ;;  %v549_v53 = vpop.f32.mrf.mxu2  ;;  %638 = vst.msk [vmem:[%s1155_s17 + $0x70] sm:$0xf] %vm609_vm2, %v605_v12  ;;  %v658_v41 = vsel %vm642_vm3, %v1158_v29, 0.0  ;;  %v660_v29 = vsel %vm642_vm3, %v1172_v35, 0.0 }
  0xc7   : > { %v1315_v60 = vadd.f32 %v1146_v3, %v549_v53 }
  0xc8   : > { %v583_v58 = vpack.c.bf16 %v513_v48, %v513_v48  ;;  %v591_v0 = vpack.c.bf16 %v1308_v52, %v1308_v52  ;;  %v718_v5 = vmul.f32 %v513_v48, %v513_v48  ;;  %v654_v14 = vsel %vm642_vm3, %v513_v48, 0.0 }
  0xc9   : > { %v598_v2 = vpack.c.bf16 %v1315_v60, %v1315_v60  ;;  %v569_v24 = vpop.f32.mrf.mxu3  ;;  %v655_v27 = vadd.f32 %v654_v14, %v653_v16  ;;  %v765_v14 = vsel %vm642_vm3, %v723_v62, 0.0 }
  0xca   : > { %616 = vst.msk [vmem:[%s1155_s17 + $0x18] sm:$0xf] %vm609_vm2, %v583_v58  ;;  %v755_v19 = vsel %vm642_vm3, %v718_v5, 0.0  ;;  %v1343_v31 = vadd.f32 %v1146_v3, %v569_v24  ;;  %v662_v58 = vsel %vm642_vm3, %v1193_v45, 0.0  ;;  %v763_v5 = vsel %vm642_vm3, %v722_v42, 0.0 }
  0xcb   : > { %624 = vst.msk [vmem:[%s1155_s17 + $0x38] sm:$0xf] %vm609_vm2, %v591_v0  ;;  %v756_v37 = vadd.f32 %v755_v19, %v754_v26  ;;  %v724_v45 = vmul.f32 %v1243_v7, %v1243_v7 }
  0xcc   : > { %631 = vst.msk [vmem:[%s1155_s17 + $0x54] sm:$0xf] %vm609_vm2, %v598_v2  ;;  %v606_v50 = vpack.c.bf16 %v1343_v31, %v1343_v31  ;;  %v664_v2 = vsel %vm642_vm3, %v1219_v57, 0.0  ;;  %v725_v57 = vmul.f32 %v1269_v20, %v1269_v20 }
  0xcd   : > { %v514_v17 = vpop.f32.mrf.mxu0  ;;  %v534_v23 = vpop.f32.mrf.mxu1  ;;  %v767_v19 = vsel %vm642_vm3, %v724_v45, 0.0 }
  0xce   : > { %v515_v21 = vadd.f32 %v1146_v3, %v514_v17  ;;  %v1340_v28 = vadd.f32 %v1146_v3, %v534_v23  ;;  %v552_v30 = vpop.f32.mrf.mxu2  ;;  %639 = vst.msk [vmem:[%s1155_s17 + $0x74] sm:$0xf] %vm609_vm2, %v606_v50  ;;  %v726_v23 = vmul.f32 %v1308_v52, %v1308_v52  ;;  %v769_v26 = vsel %vm642_vm3, %v725_v57, 0.0 }
  0xcf   : > { %v1347_v33 = vadd.f32 %v1146_v3, %v552_v30 }
  0xd0   : > { %v584_v32 = vpack.c.bf16 %v515_v21, %v515_v21  ;;  %v656_v34 = vsel %vm642_vm3, %v515_v21, 0.0  ;;  %v719_v36 = vmul.f32 %v515_v21, %v515_v21  ;;  %v592_v40 = vpack.c.bf16 %v1340_v28, %v1340_v28 }
  0xd1   : > { %v657_v39 = vadd.f32 %v656_v34, %v655_v27  ;;  %v599_v46 = vpack.c.bf16 %v1347_v33, %v1347_v33  ;;  %v572_v63 = vpop.f32.mrf.mxu3  ;;  %v668_v21 = vsel %vm642_vm3, %v1269_v20, 0.0  ;;  %v670_v27 = vsel %vm642_vm3, %v1308_v52, 0.0 }
  0xd2   : > { %617 = vst.msk [vmem:[%s1155_s17 + $0x1c] sm:$0xf] %vm609_vm2, %v584_v32  ;;  %v757_v44 = vsel %vm642_vm3, %v719_v36, 0.0  ;;  %v1379_v4 = vadd.f32 %v1146_v3, %v572_v63  ;;  %v727_v30 = vmul.f32 %v1340_v28, %v1340_v28  ;;  %v732_v63 = vmul.f32 %v1277_v25, %v1277_v25 }
  0xd3   : > { %v659_v48 = vadd.f32 %v658_v41, %v657_v39  ;;  %v758_v6 = vadd.f32 %v757_v44, %v756_v37  ;;  %625 = vst.msk [vmem:[%s1155_s17 + $0x3c] sm:$0xf] %vm609_vm2, %v592_v40  ;;  %v728_v37 = vmul.f32 %v1177_v38, %v1177_v38  ;;  %v771_v39 = vsel %vm642_vm3, %v726_v23, 0.0 }
  0xd4   : > { %632 = vst.msk [vmem:[%s1155_s17 + $0x58] sm:$0xf] %vm609_vm2, %v599_v46  ;;  %v607_v13 = vpack.c.bf16 %v1379_v4, %v1379_v4  ;;  %v672_v40 = vsel %vm642_vm3, %v1340_v28, 0.0  ;;  %v674_v44 = vsel %vm642_vm3, %v1177_v38, 0.0  ;;  %v773_v46 = vsel %vm642_vm3, %v727_v30, 0.0 }
  0xd5   : > { %v661_v53 = vadd.f32 %v660_v29, %v659_v48  ;;  %v760_v56 = vadd.f32 %v759_v51, %v758_v6  ;;  %v775_v50 = vsel %vm642_vm3, %v728_v37, 0.0  ;;  %v676_v28 = vsel %vm642_vm3, %v1201_v49, 0.0 }
  0xd6   : > { %v554_v1 = vpop.f32.mrf.mxu2  ;;  %640 = vst.msk [vmem:[%s1155_s17 + $0x78] sm:$0xf] %vm609_vm2, %v607_v13  ;;  %v730_v51 = vmul.f32 %v1225_v61, %v1225_v61 }
  0xd7   : > { %v663_v0 = vadd.f32 %v662_v58, %v661_v53  ;;  %v762_v35 = vadd.f32 %v761_v54, %v760_v56  ;;  %v1387_v8 = vadd.f32 %v1146_v3, %v554_v1  ;;  %v678_v53 = vsel %vm642_vm3, %v1225_v61, 0.0 }
  0xd8   : > { %v731_v56 = vmul.f32 %v1249_v11, %v1249_v11  ;;  %v779_v62 = vsel %vm642_vm3, %v730_v51, 0.0  ;;  %v682_v61 = vsel %vm642_vm3, %v1277_v25, 0.0  ;;  %v686_v25 = vsel %vm642_vm3, %v1347_v33, 0.0 }
  0xd9   : > { %v764_v10 = vadd.f32 %v763_v5, %v762_v35  ;;  %v665_v12 = vadd.f32 %v664_v2, %v663_v0  ;;  %v600_v16 = vpack.c.bf16 %v1387_v8, %v1387_v8  ;;  %v574_v32 = vpop.f32.mrf.mxu3  ;;  %v733_v5 = vmul.f32 %v1315_v60, %v1315_v60 }
  0xda   : > { %v1413_v20 = vadd.f32 %v1146_v3, %v574_v32  ;;  %v729_v3 = vmul.f32 %v1201_v49, %v1201_v49  ;;  %v680_v49 = vsel %vm642_vm3, %v1249_v11, 0.0  ;;  %v781_v1 = vsel %vm642_vm3, %v731_v56, 0.0 }
  0xdb   : > { %v667_v17 = vadd.f32 %v666_v15, %v665_v12  ;;  %v766_v18 = vadd.f32 %v765_v14, %v764_v10  ;;  %633 = vst.msk [vmem:[%s1155_s17 + $0x5c] sm:$0xf] %vm609_vm2, %v600_v16  ;;  %v783_v10 = vsel %vm642_vm3, %v732_v63, 0.0  ;;  %v684_v11 = vsel %vm642_vm3, %v1315_v60, 0.0 }
  0xdc   : > { %v608_v43 = vpack.c.bf16 %v1413_v20, %v1413_v20  ;;  %v777_v38 = vsel %vm642_vm3, %v729_v3, 0.0  ;;  %v734_v12 = vmul.f32 %v1347_v33, %v1347_v33  ;;  %v785_v15 = vsel %vm642_vm3, %v733_v5, 0.0 }
  0xdd   : > { %v669_v7 = vadd.f32 %v668_v21, %v667_v17  ;;  %v768_v24 = vadd.f32 %v767_v19, %v766_v18  ;;  %v735_v57 = vmul.f32 %v1387_v8, %v1387_v8  ;;  %v736_v18 = vmul.f32 %v1196_v47, %v1196_v47 }
  0xde   : > { %641 = vst.msk [vmem:[%s1155_s17 + $0x7c] sm:$0xf] %vm609_vm2, %v608_v43  ;;  %v787_v60 = vsel %vm642_vm3, %v734_v12, 0.0  ;;  %v688_v19 = vsel %vm642_vm3, %v1387_v8, 0.0  ;;  %v737_v33 = vmul.f32 %v1222_v59, %v1222_v59  ;;  %v692_v32 = vsel %vm642_vm3, %v1222_v59, 0.0 }
  0xdf   : > { %v671_v34 = vadd.f32 %v670_v27, %v669_v7  ;;  %v770_v36 = vadd.f32 %v769_v26, %v768_v24  ;;  %v690_v7 = vsel %vm642_vm3, %v1196_v47, 0.0  ;;  %v789_v24 = vsel %vm642_vm3, %v735_v57, 0.0 }
  0xe0   : > { %v791_v30 = vsel %vm642_vm3, %v736_v18, 0.0  ;;  %v738_v8 = vmul.f32 %v1246_v9, %v1246_v9  ;;  %v793_v37 = vsel %vm642_vm3, %v737_v33, 0.0  ;;  %v694_v47 = vsel %vm642_vm3, %v1246_v9, 0.0 }
  0xe1   : > { %v772_v41 = vadd.f32 %v771_v39, %v770_v36  ;;  %v673_v52 = vadd.f32 %v672_v40, %v671_v34  ;;  %v739_v39 = vmul.f32 %v1272_v22, %v1272_v22  ;;  %v696_v59 = vsel %vm642_vm3, %v1272_v22, 0.0 }
  0xe2   : > { %v740_v43 = vmul.f32 %v1311_v55, %v1311_v55  ;;  %v698_v9 = vsel %vm642_vm3, %v1311_v55, 0.0  ;;  %v700_v22 = vsel %vm642_vm3, %v1343_v31, 0.0  ;;  %v742_v51 = vmul.f32 %v1379_v4, %v1379_v4 }
  0xe3   : > { %v675_v48 = vadd.f32 %v674_v44, %v673_v52  ;;  %v774_v6 = vadd.f32 %v773_v46, %v772_v41  ;;  %v795_v52 = vsel %vm642_vm3, %v738_v8, 0.0  ;;  %v797_v46 = vsel %vm642_vm3, %v739_v39, 0.0 }
  0xe4   : > { %v702_v55 = vsel %vm642_vm3, %v1379_v4, 0.0 }
  0xe5   : > { %v677_v29 = vadd.f32 %v676_v28, %v675_v48  ;;  %v776_v42 = vadd.f32 %v775_v50, %v774_v6  ;;  %v741_v48 = vmul.f32 %v1343_v31, %v1343_v31  ;;  %v799_v28 = vsel %vm642_vm3, %v740_v43, 0.0 }
  0xe6   : > { %v704_v31 = vsel %vm642_vm3, %v1413_v20, 0.0 }
  0xe7   : > { %v778_v54 = vadd.f32 %v777_v38, %v776_v42  ;;  %v679_v58 = vadd.f32 %v678_v53, %v677_v29  ;;  %v801_v38 = vsel %vm642_vm3, %v741_v48, 0.0  ;;  %v743_v53 = vmul.f32 %v1413_v20, %v1413_v20 }
  0xe9   : > { %v681_v0 = vadd.f32 %v680_v49, %v679_v58  ;;  %v780_v35 = vadd.f32 %v779_v62, %v778_v54  ;;  %v803_v58 = vsel %vm642_vm3, %v742_v51, 0.0  ;;  %v805_v63 = vsel %vm642_vm3, %v743_v53, 0.0 }
  0xeb   : > { %v683_v2 = vadd.f32 %v682_v61, %v681_v0  ;;  %v782_v45 = vadd.f32 %v781_v1, %v780_v35 }
  0xed   : > { %v685_v13 = vadd.f32 %v684_v11, %v683_v2  ;;  %v784_v14 = vadd.f32 %v783_v10, %v782_v45 }
  0xef   : > { %v786_v16 = vadd.f32 %v785_v15, %v784_v14  ;;  %v687_v17 = vadd.f32 %v686_v25, %v685_v13 }
  0xf1   : > { %v788_v21 = vadd.f32 %v787_v60, %v786_v16  ;;  %v689_v23 = vadd.f32 %v688_v19, %v687_v17 }
  0xf3   : > { %v691_v26 = vadd.f32 %v690_v7, %v689_v23  ;;  %v790_v27 = vadd.f32 %v789_v24, %v788_v21 }
  0xf5   : > { %v693_v34 = vadd.f32 %v692_v32, %v691_v26  ;;  %v792_v36 = vadd.f32 %v791_v30, %v790_v27 }
  0xf7   : > { %v794_v40 = vadd.f32 %v793_v37, %v792_v36  ;;  %v695_v41 = vadd.f32 %v694_v47, %v693_v34 }
  0xf9   : > { %v697_v44 = vadd.f32 %v696_v59, %v695_v41  ;;  %v796_v3 = vadd.f32 %v795_v52, %v794_v40 }
  0xfb   : > { %v699_v6 = vadd.f32 %v698_v9, %v697_v44  ;;  %v798_v50 = vadd.f32 %v797_v46, %v796_v3 }
  0xfd   : > { %v701_v29 = vadd.f32 %v700_v22, %v699_v6  ;;  %v800_v42 = vadd.f32 %v799_v28, %v798_v50 }
  0xff   : > { %v802_v56 = vadd.f32 %v801_v38, %v800_v42  ;;  %v703_v54 = vadd.f32 %v702_v55, %v701_v29 }
 0x101   : > { %v804_v62 = vadd.f32 %v803_v58, %v802_v56  ;;  %v705_v49 = vadd.f32 %v704_v31, %v703_v54 }
 0x103   : > { %v706_v0 = vrot.slane %v705_v49, 4  ;;  %v806_v35 = vadd.f32 %v805_v63, %v804_v62 }
 0x105   : > { %v707_v1 = vadd.f32 %v706_v0, %v705_v49  ;;  %v807_v4 = vrot.slane %v806_v35, 4 }
 0x107   : > { %v708_v61 = vrot.slane %v707_v1, 2  ;;  %v808_v5 = vadd.f32 %v807_v4, %v806_v35 }
 0x109   : > { %v709_v2 = vadd.f32 %v708_v61, %v707_v1  ;;  %v809_v45 = vrot.slane %v808_v5, 2 }
 0x10b   : > { %v710_v10 = vrot.slane %v709_v2, 1  ;;  %v810_v11 = vadd.f32 %v809_v45, %v808_v5 }
 0x10d   : > { %v711_v20 = vadd.f32 %v710_v10, %v709_v2  ;;  %v811_v12 = vrot.slane %v810_v11, 1 }
 0x10f   : > { %v812_v13 = vadd.f32 %v811_v12, %v810_v11  ;;  %814 = vst.msk [vmem:[%s265_s23] sm:$0x1] %vm813_vm4, %v711_v20 }
 0x111   : > { %815 = vst.msk [vmem:[%s265_s23 + $0x1] sm:$0x1] %vm813_vm4, %v812_v13 }
 0x112 PF: > { %s17_s21 = sadd.s32 1, %s959_s21  }
 0x113   : > { %p14_p5 = scmp.ge.s32.totalorder %s17_s21, 4  }
 0x115   :  { %16 = sbr.rel (!%p14_p5) target bundleno = 1 (0x1), region = 82 }

</bundles_post_ra>
